<compile_context>
chip_gen: v6e
topology: v6e:2x2x1
jax: 0.10.0
libtpu: 0.0.40
codegen_flags: <defaults>
</compile_context>

<pallas_src>
import numpy as np

import jax
import jax.numpy as jnp
from jax.experimental import pallas as pl
from jax.experimental.pallas import tpu as pltpu

BN_EPS = 1e-5


def _round_up(x, m):
    return ((x + m - 1) // m) * m


def _pick_row_tile(mp):
    """Largest row tile (<=512) that still leaves >=2 grid blocks (so both
    TensorCores of dual-TC chips get work); single block only when forced."""
    for r in (512, 256, 128):
        if mp % r == 0 and mp // r >= 2:
            return r
    return min(mp, 512)


def _sigmoid(x):
    return 1.0 / (1.0 + jnp.exp(-x))


def _pad2d(a, rows, cols):
    m, n = a.shape
    return jnp.pad(a, ((0, rows - m), (0, cols - n)))


# ---------------------------------------------------------------------------
# Kernel 1: conv-as-matmul (single K block) with fused conv bias + per-block
# BatchNorm partial statistics.  No scratch, no pl.when, no pl.program_id.
# ---------------------------------------------------------------------------
def _conv_mm_kernel(a_ref, b_ref, bias_ref, mask_ref, o_ref, bsum_ref, bm2_ref):
    y = jnp.dot(a_ref[...], b_ref[...], preferred_element_type=jnp.float32)
    y = y + bias_ref[...]                          # fused conv bias (f32)
    o_ref[...] = y
    # Per-block BN partials: masked block sum + M2 around the block mean
    # (combined outside with Chan's parallel-variance formula).
    mask = mask_ref[...]                           # (bm, 1) f32, 1 = valid row
    cnt = jnp.sum(mask)                            # >= 1 by construction
    s = jnp.sum(y * mask, axis=0, keepdims=True)   # (1, bn)
    bmean = s / cnt
    d = (y - bmean) * mask
    m2 = jnp.sum(d * d, axis=0, keepdims=True)
    bsum_ref[...] = s.reshape(bsum_ref.shape)
    bm2_ref[...] = m2.reshape(bm2_ref.shape)


def conv_matmul_stats(patches_p, w2d, bias, m_total):
    """patches_p: (Mp, Kp) bf16, already padded.  w2d: (K, Cout) f32.
    Returns y_p:(Mp,Np) f32 (conv + bias), channel mean:(Np,), var:(Np,)."""
    Mp, Kp = patches_p.shape
    K, Cout = w2d.shape
    Np = _round_up(Cout, 128)
    bm = _pick_row_tile(Mp)
    bn = 256 if Np % 256 == 0 else 128
    nI = Mp // bm

    b = jnp.pad(w2d, ((0, Kp - K), (0, Np - Cout))).astype(jnp.bfloat16)
    bias_p = jnp.pad(bias, (0, Np - Cout)).astype(jnp.float32).reshape(1, Np)
    mask = (jnp.arange(Mp) < m_total).astype(jnp.float32).reshape(Mp, 1)

    y, bsum, bm2 = pl.pallas_call(
        _conv_mm_kernel,
        out_shape=(jax.ShapeDtypeStruct((Mp, Np), jnp.float32),
                   jax.ShapeDtypeStruct((nI, 1, Np), jnp.float32),
                   jax.ShapeDtypeStruct((nI, 1, Np), jnp.float32)),
        grid_spec=pltpu.PrefetchScalarGridSpec(
            num_scalar_prefetch=0,
            grid=(nI, Np // bn),
            in_specs=[pl.BlockSpec((bm, Kp), lambda i, j: (i, 0)),
                      pl.BlockSpec((Kp, bn), lambda i, j: (0, j)),
                      pl.BlockSpec((1, bn), lambda i, j: (0, j)),
                      pl.BlockSpec((bm, 1), lambda i, j: (i, 0))],
            out_specs=(pl.BlockSpec((bm, bn), lambda i, j: (i, j)),
                       pl.BlockSpec((1, 1, bn), lambda i, j: (i, 0, j)),
                       pl.BlockSpec((1, 1, bn), lambda i, j: (i, 0, j)))),
        compiler_params=pltpu.CompilerParams(
            dimension_semantics=("parallel", "parallel")),
    )(patches_p, b, bias_p, mask)

    # Chan parallel-variance combine of per-block partials (tiny arrays, JAX).
    counts = jnp.minimum(bm, m_total - jnp.arange(nI) * bm).astype(jnp.float32)
    s = bsum[:, 0, :]
    m2 = bm2[:, 0, :]
    mean = jnp.sum(s, axis=0) / m_total
    bmeans = s / counts[:, None]
    var = (jnp.sum(m2, axis=0)
           + jnp.sum(counts[:, None] * (bmeans - mean[None, :]) ** 2, axis=0)) / m_total
    return y, mean, var


# ---------------------------------------------------------------------------
# Kernel 2: BN-apply (scale*x + bias -> ReLU) with optional fused gate math.
# ---------------------------------------------------------------------------
def _bn_relu_kernel(y_ref, s_ref, b_ref, o_ref):
    o_ref[...] = jnp.maximum(y_ref[...] * s_ref[...] + b_ref[...], 0.0
                             ).astype(o_ref.dtype)


def _bn_relu_gate_kernel(y_ref, s_ref, b_ref, x_ref, o_ref):
    # reset branch epilogue:  x * sigmoid(relu(bn(conv(.))))
    r = jnp.maximum(y_ref[...] * s_ref[...] + b_ref[...], 0.0)
    o_ref[...] = (x_ref[...].astype(jnp.float32) * _sigmoid(r)).astype(o_ref.dtype)


def _bn_relu_dru_kernel(y_ref, s_ref, b_ref, h_ref, u_ref, o_ref):
    # out branch epilogue fused with the DRU combine:
    #   h*(1-sigmoid(update)) + tanh(relu(bn(conv(.)))) * sigmoid(update)
    g = jnp.tanh(jnp.maximum(y_ref[...] * s_ref[...] + b_ref[...], 0.0))
    u = _sigmoid(u_ref[...].astype(jnp.float32))
    h = h_ref[...].astype(jnp.float32)
    o_ref[...] = (h * (1.0 - u) + g * u).astype(o_ref.dtype)


def bn_apply(kernel_fn, y_p, scale, bias, extras=(), out_dtype=jnp.bfloat16):
    Mp, Np = y_p.shape
    bm = _pick_row_tile(Mp)
    bn = 256 if Np % 256 == 0 else 128
    tile = pl.BlockSpec((bm, bn), lambda i, j: (i, j))
    chan = pl.BlockSpec((1, bn), lambda i, j: (0, j))
    return pl.pallas_call(
        kernel_fn,
        out_shape=jax.ShapeDtypeStruct((Mp, Np), out_dtype),
        grid_spec=pltpu.PrefetchScalarGridSpec(
            num_scalar_prefetch=0,
            grid=(Mp // bm, Np // bn),
            in_specs=[tile, chan, chan] + [tile] * len(extras),
            out_specs=tile),
        compiler_params=pltpu.CompilerParams(
            dimension_semantics=("parallel", "parallel")),
    )(y_p, scale.reshape(1, Np), bias.reshape(1, Np), *extras)


# ---------------------------------------------------------------------------
# JAX glue: bf16 im2col (padding folded in), conv3x3 -> BN(batch stats) -> ReLU
# ---------------------------------------------------------------------------
def im2col3x3_padded(x_bf16, Kp, Mp):
    """3x3 im2col producing the already (Mp, Kp)-padded bf16 patch matrix."""
    N, H, W, C = x_bf16.shape
    M = N * H * W
    xp = jnp.pad(x_bf16, ((0, 0), (1, 1), (1, 1), (0, 0)))
    cols = [xp[:, dy:dy + H, dx:dx + W, :] for dy in range(3) for dx in range(3)]
    if Kp > 9 * C:
        cols.append(jnp.zeros((N, H, W, Kp - 9 * C), x_bf16.dtype))
    patches = jnp.concatenate(cols, axis=-1).reshape(M, Kp)
    if Mp > M:
        patches = jnp.pad(patches, ((0, Mp - M), (0, 0)))
    return patches


def conv_bn_layer(x_nhwc, p, *, epilogue=None, extras=(), out_dtype=jnp.bfloat16):
    """conv3x3(pad=1) -> BatchNorm2d(training batch stats) -> ReLU, with any
    extra gate pointwise math fused into the BN-apply epilogue kernel.
    Returns the padded (Mp, Np) activation; the valid region is [:M, :Cout]."""
    if epilogue is None:
        epilogue = _bn_relu_kernel
    N, H, W, Cin = x_nhwc.shape
    Cout = p["w"].shape[-1]
    M = N * H * W
    Mp = _round_up(M, 128)
    Kp = _round_up(9 * Cin, 128)

    patches = im2col3x3_padded(x_nhwc.astype(jnp.bfloat16), Kp, Mp)
    y_p, mean, var = conv_matmul_stats(patches, p["w"].reshape(9 * Cin, Cout),
                                       p["b"], M)
    Np = y_p.shape[1]
    gamma_p = jnp.pad(p["gamma"], (0, Np - Cout))
    beta_p = jnp.pad(p["beta"], (0, Np - Cout))
    scale = gamma_p * jax.lax.rsqrt(var + BN_EPS)
    bias = beta_p - mean * scale
    return bn_apply(epilogue, y_p, scale, bias, extras, out_dtype)


# ---------------------------------------------------------------------------
# ConvDRUbn forward (NCHW public API)
# ---------------------------------------------------------------------------
def conv_dru_bn_forward(P, x_nchw, h_nchw):
    x = jnp.transpose(x_nchw, (0, 2, 3, 1)).astype(jnp.float32)
    h = jnp.transpose(h_nchw, (0, 2, 3, 1)).astype(jnp.float32)
    N, H, W, Cin = x.shape
    hidden = h.shape[-1]
    M = N * H * W
    Mp = _round_up(M, 128)

    # reset_gate.conv1 and update_gate.conv1 share the same input: run them as
    # one matmul (weights concatenated along Cout; per-channel BN is unchanged).
    c_r = P["reset"]["c1"]["w"].shape[-1]
    p_cat = {k: jnp.concatenate([P["reset"]["c1"][k], P["update"]["c1"][k]], axis=-1)
             for k in ("w", "b", "gamma", "beta")}
    c_cat = p_cat["w"].shape[-1]
    mid_p = conv_bn_layer(x, p_cat)                               # (Mp, *) bf16
    mid = mid_p[:M, :c_cat].reshape(N, H, W, c_cat)

    # reset.c2 with fused "x * sigmoid(.)" epilogue -> gated conv input xr.
    Np_r = _round_up(P["reset"]["c2"]["w"].shape[-1], 128)
    x_flat = _pad2d(x.reshape(M, Cin), Mp, Np_r)
    xr_p = conv_bn_layer(mid[..., :c_r], P["reset"]["c2"],
                         epilogue=_bn_relu_gate_kernel, extras=(x_flat,))
    xr = xr_p[:M, :Cin].reshape(N, H, W, Cin)                     # bf16

    # update.c2 (plain) -> pre-sigmoid update gate, kept padded for the fuse.
    upd_p = conv_bn_layer(mid[..., c_r:], P["update"]["c2"])      # (Mp, *) bf16

    # out gate: conv1 on xr, conv2 with the DRU combine fused into its epilogue.
    o1_p = conv_bn_layer(xr, P["out"]["c1"])
    c_o1 = P["out"]["c1"]["w"].shape[-1]
    o1 = o1_p[:M, :c_o1].reshape(N, H, W, c_o1)

    Np_o = _round_up(P["out"]["c2"]["w"].shape[-1], 128)
    h_flat = _pad2d(h.reshape(M, hidden), Mp, Np_o)
    u_flat = _pad2d(upd_p[:, :hidden], Mp, Np_o)
    hn_p = conv_bn_layer(o1, P["out"]["c2"],
                         epilogue=_bn_relu_dru_kernel, extras=(h_flat, u_flat),
                         out_dtype=jnp.float32)
    h_new = hn_p[:M, :hidden].reshape(N, H, W, hidden)
    return jnp.transpose(h_new, (0, 3, 1, 2))


# ---------------------------------------------------------------------------
# Deterministic parameter construction
# ---------------------------------------------------------------------------
class ParamInit:
    def __init__(self, key):
        self.key = key

    def _next(self):
        self.key, sub = jax.random.split(self.key)
        return sub

    def conv(self, cin, cout):
        std = float(np.sqrt(2.0 / (9 * cin)))
        return {"w": std * jax.random.normal(self._next(), (3, 3, cin, cout), jnp.float32),
                "b": 0.01 * jax.random.normal(self._next(), (cout,), jnp.float32),
                "gamma": jnp.ones((cout,), jnp.float32),
                "beta": jnp.zeros((cout,), jnp.float32)}


def init_params(key, input_size, hidden_size):
    init = ParamInit(key)

    def block(cin, cmid, cout):
        return {"c1": init.conv(cin, cmid), "c2": init.conv(cmid, cout)}

    return {"reset": block(input_size, input_size, input_size),
            "update": block(input_size, hidden_size * 2, hidden_size),
            "out": block(input_size, hidden_size * 2, hidden_size)}


# ---------------------------------------------------------------------------
# Pure-JAX f32 reference (same semantics) for a sanity check
# ---------------------------------------------------------------------------
def _ref_conv_bn_relu(x, p):
    N, H, W, Cin = x.shape
    Cout = p["w"].shape[-1]
    xp = jnp.pad(x, ((0, 0), (1, 1), (1, 1), (0, 0)))
    cols = [xp[:, dy:dy + H, dx:dx + W, :] for dy in range(3) for dx in range(3)]
    patches = jnp.concatenate(cols, axis=-1).reshape(N * H * W, 9 * Cin)
    y = patches @ p["w"].reshape(9 * Cin, Cout) + p["b"]
    mean = jnp.mean(y, axis=0)
    var = jnp.mean((y - mean) ** 2, axis=0)
    yn = (y - mean) * jax.lax.rsqrt(var + BN_EPS) * p["gamma"] + p["beta"]
    return jnp.maximum(yn, 0.0).reshape(N, H, W, Cout)


def _ref_forward(P, x_nchw, h_nchw):
    x = jnp.transpose(x_nchw, (0, 2, 3, 1)).astype(jnp.float32)
    h = jnp.transpose(h_nchw, (0, 2, 3, 1)).astype(jnp.float32)

    def block(inp, bp):
        return _ref_conv_bn_relu(_ref_conv_bn_relu(inp, bp["c1"]), bp["c2"])

    update = jax.nn.sigmoid(block(x, P["update"]))
    reset = jax.nn.sigmoid(block(x, P["reset"]))
    out_inputs = jnp.tanh(block(x * reset, P["out"]))
    h_new = h * (1.0 - update) + out_inputs * update
    return jnp.transpose(h_new, (0, 3, 1, 2))


# ---------------------------------------------------------------------------
if __name__ == "__main__":
    INPUT_SIZE, HIDDEN_SIZE = 64, 32
    N, H, W = 2, 16, 16

    key = jax.random.PRNGKey(0)
    kx, kh, kp = jax.random.split(key, 3)
    x = jax.random.normal(kx, (N, INPUT_SIZE, H, W), jnp.float32)
    h0 = jax.random.normal(kh, (N, HIDDEN_SIZE, H, W), jnp.float32)
    params = init_params(kp, INPUT_SIZE, HIDDEN_SIZE)

    fwd = jax.jit(conv_dru_bn_forward)
    out = jax.block_until_ready(fwd(params, x, h0))

    assert out.shape == (N, HIDDEN_SIZE, H, W), out.shape
    assert out.dtype == jnp.float32
    assert bool(jnp.all(jnp.isfinite(out)))

    ref = jax.block_until_ready(_ref_forward(params, x, h0))
    max_diff = float(jnp.max(jnp.abs(out - ref)))
    assert max_diff < 0.25, f"mismatch vs f32 reference: {max_diff}"

    print("KERNEL_OK")
</pallas_src>

<mosaic_0001>
module attributes {stable_mosaic.version = 11 : i64} {
  func.func @_conv_mm_kernel(%arg0: i32, %arg1: i32, %arg2: memref<256x640xbf16, #tpu.memory_space<vmem>>, %arg3: memref<640x128xbf16, #tpu.memory_space<vmem>>, %arg4: memref<1x128xf32, #tpu.memory_space<vmem>>, %arg5: memref<256x1xf32, #tpu.memory_space<vmem>>, %arg6: memref<256x128xf32, #tpu.memory_space<vmem>>, %arg7: memref<1x1x128xf32, #tpu.memory_space<vmem>>, %arg8: memref<1x1x128xf32, #tpu.memory_space<vmem>>) attributes {dimension_semantics = [#tpu.dimension_semantics<parallel>, #tpu.dimension_semantics<parallel>], iteration_bounds = array<i64: 2, 1>, scalar_prefetch = 0 : i64, scratch_operands = 0 : i64, tpu.core_type = #tpu.core_type<tc>, window_params = [{transform_indices = @transform_0, window_bounds = array<i64: 256, 640>}, {transform_indices = @transform_1, window_bounds = array<i64: 640, 128>}, {transform_indices = @transform_2, window_bounds = array<i64: 1, 128>}, {transform_indices = @transform_3, window_bounds = array<i64: 256, 1>}, {transform_indices = @transform_4, window_bounds = array<i64: 256, 128>}, {transform_indices = @transform_5, window_bounds = array<i64: 1, 1, 128>}, {transform_indices = @transform_6, window_bounds = array<i64: 1, 1, 128>}]} {
    %c0 = arith.constant 0 : index
    %c0_0 = arith.constant 0 : index
    %0 = vector.load %arg2[%c0, %c0_0] : memref<256x640xbf16, #tpu.memory_space<vmem>>, vector<256x640xbf16>
    %c0_1 = arith.constant 0 : index
    %c0_2 = arith.constant 0 : index
    %1 = vector.load %arg3[%c0_1, %c0_2] : memref<640x128xbf16, #tpu.memory_space<vmem>>, vector<640x128xbf16>
    %cst = arith.constant dense<0.000000e+00> : vector<256x128xf32>
    %2 = tpu.matmul %0, %1, %cst {dimension_numbers = #tpu.dot_dimension_numbers<[1], [0], [0], [1], [0, 0, 1, 1], [], []>} : vector<256x640xbf16>, vector<640x128xbf16>, vector<256x128xf32> -> vector<256x128xf32>
    %c0_3 = arith.constant 0 : index
    %c0_4 = arith.constant 0 : index
    %3 = vector.load %arg4[%c0_3, %c0_4] : memref<1x128xf32, #tpu.memory_space<vmem>>, vector<1x128xf32>
    %4 = vector.broadcast %3 : vector<1x128xf32> to vector<256x128xf32>
    %5 = arith.addf %2, %4 : vector<256x128xf32>
    %c0_5 = arith.constant 0 : index
    %c0_6 = arith.constant 0 : index
    %6 = vector.load %arg6[%c0_5, %c0_6] : memref<256x128xf32, #tpu.memory_space<vmem>>, vector<256x128xf32>
    tpu.vector_store %arg6[%c0_5, %c0_6], %5 {strides = array<i32>} : memref<256x128xf32, #tpu.memory_space<vmem>>, vector<256x128xf32>,
    %c0_7 = arith.constant 0 : index
    %c0_8 = arith.constant 0 : index
    %7 = vector.load %arg5[%c0_7, %c0_8] : memref<256x1xf32, #tpu.memory_space<vmem>>, vector<256x1xf32>
    %8 = vector.shape_cast %7 : vector<256x1xf32> to vector<1x256x1xf32>
    %cst_9 = arith.constant dense<0.000000e+00> : vector<1xf32>
    %9 = vector.multi_reduction <add>, %8, %cst_9 [1, 2] : vector<1x256x1xf32> to vector<1xf32>
    %10 = vector.shape_cast %9 : vector<1xf32> to vector<1x1x1xf32>
    %11 = vector.extract %10[0, 0, 0] : f32 from vector<1x1x1xf32>
    %12 = vector.broadcast %7 : vector<256x1xf32> to vector<256x128xf32>
    %13 = arith.mulf %5, %12 : vector<256x128xf32>
    %cst_10 = arith.constant dense<0.000000e+00> : vector<128xf32>
    %14 = vector.multi_reduction <add>, %13, %cst_10 [0] : vector<256x128xf32> to vector<128xf32>
    %15 = vector.shape_cast %14 : vector<128xf32> to vector<1x128xf32>
    %16 = vector.broadcast %11 : f32 to vector<1x128xf32>
    %17 = arith.divf %15, %16 : vector<1x128xf32>
    %18 = vector.broadcast %17 : vector<1x128xf32> to vector<256x128xf32>
    %19 = arith.subf %5, %18 : vector<256x128xf32>
    %20 = vector.broadcast %7 : vector<256x1xf32> to vector<256x128xf32>
    %21 = arith.mulf %19, %20 : vector<256x128xf32>
    %22 = arith.mulf %21, %21 : vector<256x128xf32>
    %cst_11 = arith.constant dense<0.000000e+00> : vector<128xf32>
    %23 = vector.multi_reduction <add>, %22, %cst_11 [0] : vector<256x128xf32> to vector<128xf32>
    %24 = vector.shape_cast %23 : vector<128xf32> to vector<1x128xf32>
    %25 = vector.shape_cast %15 : vector<1x128xf32> to vector<1x1x128xf32>
    %c0_12 = arith.constant 0 : index
    %c0_13 = arith.constant 0 : index
    %c0_14 = arith.constant 0 : index
    %26 = vector.load %arg7[%c0_12, %c0_13, %c0_14] : memref<1x1x128xf32, #tpu.memory_space<vmem>>, vector<1x1x128xf32>
    tpu.vector_store %arg7[%c0_12, %c0_13, %c0_14], %25 {strides = array<i32>} : memref<1x1x128xf32, #tpu.memory_space<vmem>>, vector<1x1x128xf32>,
    %27 = vector.shape_cast %24 : vector<1x128xf32> to vector<1x1x128xf32>
    %c0_15 = arith.constant 0 : index
    %c0_16 = arith.constant 0 : index
    %c0_17 = arith.constant 0 : index
    %28 = vector.load %arg8[%c0_15, %c0_16, %c0_17] : memref<1x1x128xf32, #tpu.memory_space<vmem>>, vector<1x1x128xf32>
    tpu.vector_store %arg8[%c0_15, %c0_16, %c0_17], %27 {strides = array<i32>} : memref<1x1x128xf32, #tpu.memory_space<vmem>>, vector<1x1x128xf32>,
    return
  }
  func.func @transform_0(%arg0: i32, %arg1: i32) -> (i32, i32) {
    %c0_i32 = arith.constant 0 : i32
    %c0_i32_0 = arith.constant 0 : i32
    return %arg0, %c0_i32 : i32, i32
  }
  func.func @transform_1(%arg0: i32, %arg1: i32) -> (i32, i32) {
    %c0_i32 = arith.constant 0 : i32
    %c0_i32_0 = arith.constant 0 : i32
    return %c0_i32, %arg1 : i32, i32
  }
  func.func @transform_2(%arg0: i32, %arg1: i32) -> (i32, i32) {
    %c0_i32 = arith.constant 0 : i32
    %c0_i32_0 = arith.constant 0 : i32
    return %c0_i32, %arg1 : i32, i32
  }
  func.func @transform_3(%arg0: i32, %arg1: i32) -> (i32, i32) {
    %c0_i32 = arith.constant 0 : i32
    %c0_i32_0 = arith.constant 0 : i32
    return %arg0, %c0_i32 : i32, i32
  }
  func.func @transform_4(%arg0: i32, %arg1: i32) -> (i32, i32) {
    %c0_i32 = arith.constant 0 : i32
    return %arg0, %arg1 : i32, i32
  }
  func.func @transform_5(%arg0: i32, %arg1: i32) -> (i32, i32, i32) {
    %c0_i32 = arith.constant 0 : i32
    %c0_i32_0 = arith.constant 0 : i32
    return %arg0, %c0_i32, %arg1 : i32, i32, i32
  }
  func.func @transform_6(%arg0: i32, %arg1: i32) -> (i32, i32, i32) {
    %c0_i32 = arith.constant 0 : i32
    %c0_i32_0 = arith.constant 0 : i32
    return %arg0, %c0_i32, %arg1 : i32, i32, i32
  }
}

module attributes {stable_mosaic.version = 11 : i64} {
  func.func @_bn_relu_kernel(%arg0: i32, %arg1: i32, %arg2: memref<256x128xf32, #tpu.memory_space<vmem>>, %arg3: memref<1x128xf32, #tpu.memory_space<vmem>>, %arg4: memref<1x128xf32, #tpu.memory_space<vmem>>, %arg5: memref<256x128xbf16, #tpu.memory_space<vmem>>) attributes {dimension_semantics = [#tpu.dimension_semantics<parallel>, #tpu.dimension_semantics<parallel>], iteration_bounds = array<i64: 2, 1>, scalar_prefetch = 0 : i64, scratch_operands = 0 : i64, tpu.core_type = #tpu.core_type<tc>, window_params = [{transform_indices = @transform_0, window_bounds = array<i64: 256, 128>}, {transform_indices = @transform_1, window_bounds = array<i64: 1, 128>}, {transform_indices = @transform_2, window_bounds = array<i64: 1, 128>}, {transform_indices = @transform_3, window_bounds = array<i64: 256, 128>}]} {
    %c0 = arith.constant 0 : index
    %c0_0 = arith.constant 0 : index
    %0 = vector.load %arg2[%c0, %c0_0] : memref<256x128xf32, #tpu.memory_space<vmem>>, vector<256x128xf32>
    %c0_1 = arith.constant 0 : index
    %c0_2 = arith.constant 0 : index
    %1 = vector.load %arg3[%c0_1, %c0_2] : memref<1x128xf32, #tpu.memory_space<vmem>>, vector<1x128xf32>
    %2 = vector.broadcast %1 : vector<1x128xf32> to vector<256x128xf32>
    %3 = arith.mulf %0, %2 : vector<256x128xf32>
    %c0_3 = arith.constant 0 : index
    %c0_4 = arith.constant 0 : index
    %4 = vector.load %arg4[%c0_3, %c0_4] : memref<1x128xf32, #tpu.memory_space<vmem>>, vector<1x128xf32>
    %5 = vector.broadcast %4 : vector<1x128xf32> to vector<256x128xf32>
    %6 = arith.addf %3, %5 : vector<256x128xf32>
    %cst = arith.constant 0.000000e+00 : f32
    %7 = vector.broadcast %cst : f32 to vector<256x128xf32>
    %8 = arith.maximumf %6, %7 : vector<256x128xf32>
    %9 = arith.truncf %8 : vector<256x128xf32> to vector<256x128xbf16>
    %c0_5 = arith.constant 0 : index
    %c0_6 = arith.constant 0 : index
    %10 = vector.load %arg5[%c0_5, %c0_6] : memref<256x128xbf16, #tpu.memory_space<vmem>>, vector<256x128xbf16>
    tpu.vector_store %arg5[%c0_5, %c0_6], %9 {strides = array<i32>} : memref<256x128xbf16, #tpu.memory_space<vmem>>, vector<256x128xbf16>,
    return
  }
  func.func @transform_0(%arg0: i32, %arg1: i32) -> (i32, i32) {
    %c0_i32 = arith.constant 0 : i32
    return %arg0, %arg1 : i32, i32
  }
  func.func @transform_1(%arg0: i32, %arg1: i32) -> (i32, i32) {
    %c0_i32 = arith.constant 0 : i32
    %c0_i32_0 = arith.constant 0 : i32
    return %c0_i32, %arg1 : i32, i32
  }
  func.func @transform_2(%arg0: i32, %arg1: i32) -> (i32, i32) {
    %c0_i32 = arith.constant 0 : i32
    %c0_i32_0 = arith.constant 0 : i32
    return %c0_i32, %arg1 : i32, i32
  }
  func.func @transform_3(%arg0: i32, %arg1: i32) -> (i32, i32) {
    %c0_i32 = arith.constant 0 : i32
    return %arg0, %arg1 : i32, i32
  }
}

module attributes {stable_mosaic.version = 11 : i64} {
  func.func @_bn_relu_gate_kernel(%arg0: i32, %arg1: i32, %arg2: memref<256x128xf32, #tpu.memory_space<vmem>>, %arg3: memref<1x128xf32, #tpu.memory_space<vmem>>, %arg4: memref<1x128xf32, #tpu.memory_space<vmem>>, %arg5: memref<256x128xf32, #tpu.memory_space<vmem>>, %arg6: memref<256x128xbf16, #tpu.memory_space<vmem>>) attributes {dimension_semantics = [#tpu.dimension_semantics<parallel>, #tpu.dimension_semantics<parallel>], iteration_bounds = array<i64: 2, 1>, scalar_prefetch = 0 : i64, scratch_operands = 0 : i64, tpu.core_type = #tpu.core_type<tc>, window_params = [{transform_indices = @transform_0, window_bounds = array<i64: 256, 128>}, {transform_indices = @transform_1, window_bounds = array<i64: 1, 128>}, {transform_indices = @transform_2, window_bounds = array<i64: 1, 128>}, {transform_indices = @transform_3, window_bounds = array<i64: 256, 128>}, {transform_indices = @transform_4, window_bounds = array<i64: 256, 128>}]} {
    %c0 = arith.constant 0 : index
    %c0_0 = arith.constant 0 : index
    %0 = vector.load %arg2[%c0, %c0_0] : memref<256x128xf32, #tpu.memory_space<vmem>>, vector<256x128xf32>
    %c0_1 = arith.constant 0 : index
    %c0_2 = arith.constant 0 : index
    %1 = vector.load %arg3[%c0_1, %c0_2] : memref<1x128xf32, #tpu.memory_space<vmem>>, vector<1x128xf32>
    %2 = vector.broadcast %1 : vector<1x128xf32> to vector<256x128xf32>
    %3 = arith.mulf %0, %2 : vector<256x128xf32>
    %c0_3 = arith.constant 0 : index
    %c0_4 = arith.constant 0 : index
    %4 = vector.load %arg4[%c0_3, %c0_4] : memref<1x128xf32, #tpu.memory_space<vmem>>, vector<1x128xf32>
    %5 = vector.broadcast %4 : vector<1x128xf32> to vector<256x128xf32>
    %6 = arith.addf %3, %5 : vector<256x128xf32>
    %cst = arith.constant 0.000000e+00 : f32
    %7 = vector.broadcast %cst : f32 to vector<256x128xf32>
    %8 = arith.maximumf %6, %7 : vector<256x128xf32>
    %c0_5 = arith.constant 0 : index
    %c0_6 = arith.constant 0 : index
    %9 = vector.load %arg5[%c0_5, %c0_6] : memref<256x128xf32, #tpu.memory_space<vmem>>, vector<256x128xf32>
    %cst_7 = arith.constant 0.000000e+00 : f32
    %10 = vector.broadcast %cst_7 : f32 to vector<256x128xf32>
    %11 = arith.subf %10, %8 : vector<256x128xf32>
    %12 = math.exp %11 : vector<256x128xf32>
    %cst_8 = arith.constant 1.000000e+00 : f32
    %13 = vector.broadcast %cst_8 : f32 to vector<256x128xf32>
    %14 = arith.addf %13, %12 : vector<256x128xf32>
    %cst_9 = arith.constant 1.000000e+00 : f32
    %15 = vector.broadcast %cst_9 : f32 to vector<256x128xf32>
    %16 = arith.divf %15, %14 : vector<256x128xf32>
    %17 = arith.mulf %9, %16 : vector<256x128xf32>
    %18 = arith.truncf %17 : vector<256x128xf32> to vector<256x128xbf16>
    %c0_10 = arith.constant 0 : index
    %c0_11 = arith.constant 0 : index
    %19 = vector.load %arg6[%c0_10, %c0_11] : memref<256x128xbf16, #tpu.memory_space<vmem>>, vector<256x128xbf16>
    tpu.vector_store %arg6[%c0_10, %c0_11], %18 {strides = array<i32>} : memref<256x128xbf16, #tpu.memory_space<vmem>>, vector<256x128xbf16>,
    return
  }
  func.func @transform_0(%arg0: i32, %arg1: i32) -> (i32, i32) {
    %c0_i32 = arith.constant 0 : i32
    return %arg0, %arg1 : i32, i32
  }
  func.func @transform_1(%arg0: i32, %arg1: i32) -> (i32, i32) {
    %c0_i32 = arith.constant 0 : i32
    %c0_i32_0 = arith.constant 0 : i32
    return %c0_i32, %arg1 : i32, i32
  }
  func.func @transform_2(%arg0: i32, %arg1: i32) -> (i32, i32) {
    %c0_i32 = arith.constant 0 : i32
    %c0_i32_0 = arith.constant 0 : i32
    return %c0_i32, %arg1 : i32, i32
  }
  func.func @transform_3(%arg0: i32, %arg1: i32) -> (i32, i32) {
    %c0_i32 = arith.constant 0 : i32
    return %arg0, %arg1 : i32, i32
  }
  func.func @transform_4(%arg0: i32, %arg1: i32) -> (i32, i32) {
    %c0_i32 = arith.constant 0 : i32
    return %arg0, %arg1 : i32, i32
  }
}

module attributes {stable_mosaic.version = 11 : i64} {
  func.func @_bn_relu_dru_kernel(%arg0: i32, %arg1: i32, %arg2: memref<256x128xf32, #tpu.memory_space<vmem>>, %arg3: memref<1x128xf32, #tpu.memory_space<vmem>>, %arg4: memref<1x128xf32, #tpu.memory_space<vmem>>, %arg5: memref<256x128xf32, #tpu.memory_space<vmem>>, %arg6: memref<256x128xbf16, #tpu.memory_space<vmem>>, %arg7: memref<256x128xf32, #tpu.memory_space<vmem>>) attributes {dimension_semantics = [#tpu.dimension_semantics<parallel>, #tpu.dimension_semantics<parallel>], iteration_bounds = array<i64: 2, 1>, scalar_prefetch = 0 : i64, scratch_operands = 0 : i64, tpu.core_type = #tpu.core_type<tc>, window_params = [{transform_indices = @transform_0, window_bounds = array<i64: 256, 128>}, {transform_indices = @transform_1, window_bounds = array<i64: 1, 128>}, {transform_indices = @transform_2, window_bounds = array<i64: 1, 128>}, {transform_indices = @transform_3, window_bounds = array<i64: 256, 128>}, {transform_indices = @transform_4, window_bounds = array<i64: 256, 128>}, {transform_indices = @transform_5, window_bounds = array<i64: 256, 128>}]} {
    %c0 = arith.constant 0 : index
    %c0_0 = arith.constant 0 : index
    %0 = vector.load %arg2[%c0, %c0_0] : memref<256x128xf32, #tpu.memory_space<vmem>>, vector<256x128xf32>
    %c0_1 = arith.constant 0 : index
    %c0_2 = arith.constant 0 : index
    %1 = vector.load %arg3[%c0_1, %c0_2] : memref<1x128xf32, #tpu.memory_space<vmem>>, vector<1x128xf32>
    %2 = vector.broadcast %1 : vector<1x128xf32> to vector<256x128xf32>
    %3 = arith.mulf %0, %2 : vector<256x128xf32>
    %c0_3 = arith.constant 0 : index
    %c0_4 = arith.constant 0 : index
    %4 = vector.load %arg4[%c0_3, %c0_4] : memref<1x128xf32, #tpu.memory_space<vmem>>, vector<1x128xf32>
    %5 = vector.broadcast %4 : vector<1x128xf32> to vector<256x128xf32>
    %6 = arith.addf %3, %5 : vector<256x128xf32>
    %cst = arith.constant 0.000000e+00 : f32
    %7 = vector.broadcast %cst : f32 to vector<256x128xf32>
    %8 = arith.maximumf %6, %7 : vector<256x128xf32>
    %9 = math.tanh %8 : vector<256x128xf32>
    %c0_5 = arith.constant 0 : index
    %c0_6 = arith.constant 0 : index
    %10 = vector.load %arg6[%c0_5, %c0_6] : memref<256x128xbf16, #tpu.memory_space<vmem>>, vector<256x128xbf16>
    %11 = arith.extf %10 : vector<256x128xbf16> to vector<256x128xf32>
    %cst_7 = arith.constant 0.000000e+00 : f32
    %12 = vector.broadcast %cst_7 : f32 to vector<256x128xf32>
    %13 = arith.subf %12, %11 : vector<256x128xf32>
    %14 = math.exp %13 : vector<256x128xf32>
    %cst_8 = arith.constant 1.000000e+00 : f32
    %15 = vector.broadcast %cst_8 : f32 to vector<256x128xf32>
    %16 = arith.addf %15, %14 : vector<256x128xf32>
    %cst_9 = arith.constant 1.000000e+00 : f32
    %17 = vector.broadcast %cst_9 : f32 to vector<256x128xf32>
    %18 = arith.divf %17, %16 : vector<256x128xf32>
    %c0_10 = arith.constant 0 : index
    %c0_11 = arith.constant 0 : index
    %19 = vector.load %arg5[%c0_10, %c0_11] : memref<256x128xf32, #tpu.memory_space<vmem>>, vector<256x128xf32>
    %cst_12 = arith.constant 1.000000e+00 : f32
    %20 = vector.broadcast %cst_12 : f32 to vector<256x128xf32>
    %21 = arith.subf %20, %18 : vector<256x128xf32>
    %22 = arith.mulf %19, %21 : vector<256x128xf32>
    %23 = arith.mulf %9, %18 : vector<256x128xf32>
    %24 = arith.addf %22, %23 : vector<256x128xf32>
    %c0_13 = arith.constant 0 : index
    %c0_14 = arith.constant 0 : index
    %25 = vector.load %arg7[%c0_13, %c0_14] : memref<256x128xf32, #tpu.memory_space<vmem>>, vector<256x128xf32>
    tpu.vector_store %arg7[%c0_13, %c0_14], %24 {strides = array<i32>} : memref<256x128xf32, #tpu.memory_space<vmem>>, vector<256x128xf32>,
    return
  }
  func.func @transform_0(%arg0: i32, %arg1: i32) -> (i32, i32) {
    %c0_i32 = arith.constant 0 : i32
    return %arg0, %arg1 : i32, i32
  }
  func.func @transform_1(%arg0: i32, %arg1: i32) -> (i32, i32) {
    %c0_i32 = arith.constant 0 : i32
    %c0_i32_0 = arith.constant 0 : i32
    return %c0_i32, %arg1 : i32, i32
  }
  func.func @transform_2(%arg0: i32, %arg1: i32) -> (i32, i32) {
    %c0_i32 = arith.constant 0 : i32
    %c0_i32_0 = arith.constant 0 : i32
    return %c0_i32, %arg1 : i32, i32
  }
  func.func @transform_3(%arg0: i32, %arg1: i32) -> (i32, i32) {
    %c0_i32 = arith.constant 0 : i32
    return %arg0, %arg1 : i32, i32
  }
  func.func @transform_4(%arg0: i32, %arg1: i32) -> (i32, i32) {
    %c0_i32 = arith.constant 0 : i32
    return %arg0, %arg1 : i32, i32
  }
  func.func @transform_5(%arg0: i32, %arg1: i32) -> (i32, i32) {
    %c0_i32 = arith.constant 0 : i32
    return %arg0, %arg1 : i32, i32
  }
}

</mosaic_0001>

<bundles_post_ra>
// kernel: conv_dru_bn_forward.11
= control target key start
LH: loop header
LB: loop body
LE: loop exit
PB: predicated region body
PF: predicated region fallthrough
CT: control target
= control target key end

     0   :  { %s879_s12 = smov 0   ;;  %s881_s13 = smov 0   ;;  %s1042_s0 = inlined_call_operand.vmem [shape: f32[512,128], index: 0, kind: input, shape index: {}]   ;;  %s1043_s1 = inlined_call_operand.vmem [shape: f32[1,128], index: 1, kind: input, shape index: {}]   ;;  %s1044_s2 = inlined_call_operand.vmem [shape: f32[1,128], index: 2, kind: input, shape index: {}]   ;;  %s1045_s3 = inlined_call_operand.vmem [shape: bf16[512,128], index: 3, kind: output, shape index: {}]  }
   0x1   :  { %s883_s14 = smov 0  }
   0x2 LB: > { %s25_s15 = sadd.s32 1, %s853_s13  ;;  %p643_p0 = scmp.ge.s32.totalorder %s857_s14, 1  ;;  %s857_s14 = sphi %s883_s14, %s13_s14   ;;  %s853_s13 = sphi %s881_s13, %s1047_s13   ;;  %s849_s12 = sphi %s879_s12, %s1046_s12  }
   0x3   : > { %p27_p1 = scmp.ge.s32.totalorder %s25_s15, 2  ;;  %p173_p2 = scmp.lt.s32.totalorder %s857_s14, 3 }
   0x5   : > { %s1049_s15 = smov (%p27_p1, %s25_s15), 0  ;;  %p174_p3 = pnand %p643_p0, %p173_p2 }
   0x6   : > { %s644_s16 = sshll.u32 (!%p174_p3), %s849_s12, 5 }
   0x7   : > { %177 = sbr.rel (%p174_p3) target bundleno = 50 (0x32), region = 32  ;;  %p210_p4 = scmp.lt.s32.totalorder (!%p174_p3), %s644_s16, 63 }
   0xc   : > { %s1051_s16 = smov (!%p210_p4, %s644_s16), 63  ;;  %v903_v0 = vld [vmem:[%s1043_s1] ss:$0 sm:$0xff] }
   0xd   : > { %s645_s17 = sshll.u32 %s1051_s16, 3  ;;  %v913_v1 = vld [vmem:[%s1044_s2] ss:$0 sm:$0xff]  ;;  %s647_s25 = sshll.u32 %s1051_s16, 2 }
   0xe   : > { %s908_s22 = scalar_lea.vmem %s1042_s0, %s645_s17  ;;  %s945_s28 = scalar_lea.vmem %s1045_s3, %s647_s25 }
   0xf   : > { %v233_v2 = vld [vmem:[%s908_s22] sm:$0xff]  ;;  %v234_v3 = vld [vmem:[%s908_s22 + $0x8] sm:$0xff]  ;;  %v235_v4 = vld [vmem:[%s908_s22 + $0x10] sm:$0xff] }
  0x10   : > { %v272_v5 = vmul.f32 %v903_v0, %v233_v2  ;;  %v273_v6 = vmul.f32 %v903_v0, %v234_v3  ;;  %v236_v7 = vld [vmem:[%s908_s22 + $0x18] sm:$0xff]  ;;  %v274_v8 = vmul.f32 %v903_v0, %v235_v4  ;;  %v237_v9 = vld [vmem:[%s908_s22 + $0x20] sm:$0xff]  ;;  %v238_v10 = vld [vmem:[%s908_s22 + $0x28] sm:$0xff] }
  0x11   : > { %v275_v11 = vmul.f32 %v903_v0, %v236_v7  ;;  %v276_v12 = vmul.f32 %v903_v0, %v237_v9  ;;  %v277_v13 = vmul.f32 %v903_v0, %v238_v10  ;;  %v239_v14 = vld [vmem:[%s908_s22 + $0x30] sm:$0xff]  ;;  %v240_v15 = vld [vmem:[%s908_s22 + $0x38] sm:$0xff]  ;;  %v241_v24 = vld [vmem:[%s908_s22 + $0x40] sm:$0xff] }
  0x12   : > { %v311_v16 = vadd.f32 %v913_v1, %v272_v5  ;;  %v312_v17 = vadd.f32 %v913_v1, %v273_v6  ;;  %v313_v18 = vadd.f32 %v913_v1, %v274_v8  ;;  %v278_v19 = vmul.f32 %v903_v0, %v239_v14  ;;  %v242_v25 = vld [vmem:[%s908_s22 + $0x48] sm:$0xff]  ;;  %v243_v30 = vld [vmem:[%s908_s22 + $0x50] sm:$0xff]  ;;  %v244_v35 = vld [vmem:[%s908_s22 + $0x58] sm:$0xff] }
  0x13   : > { %v314_v20 = vadd.f32 %v913_v1, %v275_v11  ;;  %v315_v21 = vadd.f32 %v913_v1, %v276_v12  ;;  %v316_v22 = vadd.f32 %v913_v1, %v277_v13  ;;  %v279_v23 = vmul.f32 %v903_v0, %v240_v15  ;;  %v245_v36 = vld [vmem:[%s908_s22 + $0x60] sm:$0xff]  ;;  %v246_v41 = vld [vmem:[%s908_s22 + $0x68] sm:$0xff]  ;;  %v247_v42 = vld [vmem:[%s908_s22 + $0x70] sm:$0xff] }
  0x14   : > { %v343_v26 = vmax.f32 %v311_v16, 0.0  ;;  %v344_v27 = vmax.f32 %v312_v17, 0.0  ;;  %v345_v28 = vmax.f32 %v313_v18, 0.0  ;;  %v317_v29 = vadd.f32 %v913_v1, %v278_v19  ;;  %v248_v51 = vld [vmem:[%s908_s22 + $0x78] sm:$0xff]  ;;  %v249_v56 = vld [vmem:[%s908_s22 + $0x80] sm:$0xff]  ;;  %v250_v61 = vld [vmem:[%s908_s22 + $0x88] sm:$0xff] }
  0x15   : > { %v346_v31 = vmax.f32 %v314_v20, 0.0  ;;  %v347_v32 = vmax.f32 %v315_v21, 0.0  ;;  %v348_v33 = vmax.f32 %v316_v22, 0.0  ;;  %v318_v34 = vadd.f32 %v913_v1, %v279_v23  ;;  %v251_v4 = vld [vmem:[%s908_s22 + $0x90] sm:$0xff]  ;;  %v252_v5 = vld [vmem:[%s908_s22 + $0x98] sm:$0xff]  ;;  %v253_v10 = vld [vmem:[%s908_s22 + $0xa0] sm:$0xff] }
  0x16   : > { %v719_v37 = vpack.c.bf16 %v344_v27, %v343_v26  ;;  %v349_v38 = vmax.f32 %v317_v29, 0.0  ;;  %v280_v39 = vmul.f32 %v903_v0, %v241_v24  ;;  %v281_v40 = vmul.f32 %v903_v0, %v242_v25  ;;  %v254_v15 = vld [vmem:[%s908_s22 + $0xa8] sm:$0xff]  ;;  %v255_v20 = vld [vmem:[%s908_s22 + $0xb0] sm:$0xff]  ;;  %v256_v25 = vld [vmem:[%s908_s22 + $0xb8] sm:$0xff] }
  0x17   : > { %v724_v43 = vpack.c.bf16 %v346_v31, %v345_v28  ;;  %v729_v44 = vpack.c.bf16 %v348_v33, %v347_v32  ;;  %v350_v45 = vmax.f32 %v318_v34, 0.0  ;;  %v282_v46 = vmul.f32 %v903_v0, %v243_v30  ;;  %v257_v30 = vld [vmem:[%s908_s22 + $0xc0] sm:$0xff] }
  0x18   : > { %720 = vst [vmem:[%s945_s28] sm:$0xff] %v719_v37   ;;  %v319_v47 = vadd.f32 %v913_v1, %v280_v39  ;;  %v320_v48 = vadd.f32 %v913_v1, %v281_v40  ;;  %v283_v49 = vmul.f32 %v903_v0, %v244_v35  ;;  %v284_v50 = vmul.f32 %v903_v0, %v245_v36  ;;  %v258_v35 = vld [vmem:[%s908_s22 + $0xc8] sm:$0xff]  ;;  %v259_v40 = vld [vmem:[%s908_s22 + $0xd0] sm:$0xff] }
  0x19   : > { %796 = vst [vmem:[%s945_s28 + $0x8] sm:$0xff] %v724_v43   ;;  %797 = vst [vmem:[%s945_s28 + $0x10] sm:$0xff] %v729_v44   ;;  %v734_v52 = vpack.c.bf16 %v350_v45, %v349_v38  ;;  %v321_v53 = vadd.f32 %v913_v1, %v282_v46  ;;  %v285_v54 = vmul.f32 %v903_v0, %v246_v41  ;;  %v260_v41 = vld [vmem:[%s908_s22 + $0xd8] sm:$0xff]  ;;  %v261_v46 = vld [vmem:[%s908_s22 + $0xe0] sm:$0xff] }
  0x1a   : > { %v286_v55 = vmul.f32 %v903_v0, %v247_v42  ;;  %v351_v57 = vmax.f32 %v319_v47, 0.0  ;;  %v352_v58 = vmax.f32 %v320_v48, 0.0  ;;  %v322_v59 = vadd.f32 %v913_v1, %v283_v49 }
  0x1b   : > { %v323_v60 = vadd.f32 %v913_v1, %v284_v50  ;;  %798 = vst [vmem:[%s945_s28 + $0x18] sm:$0xff] %v734_v52   ;;  %v353_v62 = vmax.f32 %v321_v53, 0.0  ;;  %v324_v63 = vadd.f32 %v913_v1, %v285_v54  ;;  %v287_v2 = vmul.f32 %v903_v0, %v248_v51  ;;  %v262_v51 = vld [vmem:[%s908_s22 + $0xe8] sm:$0xff] }
  0x1c   : > { %v325_v3 = vadd.f32 %v913_v1, %v286_v55  ;;  %v739_v6 = vpack.c.bf16 %v352_v58, %v351_v57  ;;  %v354_v7 = vmax.f32 %v322_v59, 0.0  ;;  %v288_v9 = vmul.f32 %v903_v0, %v249_v56  ;;  %v263_v56 = vld [vmem:[%s908_s22 + $0xf0] sm:$0xff] }
  0x1d   : > { %v355_v8 = vmax.f32 %v323_v60, 0.0  ;;  %v356_v11 = vmax.f32 %v324_v63, 0.0  ;;  %v326_v12 = vadd.f32 %v913_v1, %v287_v2  ;;  %v289_v14 = vmul.f32 %v903_v0, %v250_v61  ;;  %v264_v61 = vld [vmem:[%s908_s22 + $0xf8] sm:$0xff] }
  0x1e   : > { %v357_v13 = vmax.f32 %v325_v3, 0.0  ;;  %799 = vst [vmem:[%s945_s28 + $0x20] sm:$0xff] %v739_v6   ;;  %v744_v16 = vpack.c.bf16 %v354_v7, %v353_v62  ;;  %v327_v17 = vadd.f32 %v913_v1, %v288_v9  ;;  %v290_v18 = vmul.f32 %v903_v0, %v251_v4 }
  0x1f   : > { %v291_v19 = vmul.f32 %v903_v0, %v252_v5  ;;  %v749_v21 = vpack.c.bf16 %v356_v11, %v355_v8  ;;  %v358_v22 = vmax.f32 %v326_v12, 0.0  ;;  %v328_v23 = vadd.f32 %v913_v1, %v289_v14 }
  0x20   : > { %v292_v24 = vmul.f32 %v903_v0, %v253_v10  ;;  %800 = vst [vmem:[%s945_s28 + $0x28] sm:$0xff] %v744_v16   ;;  %v359_v26 = vmax.f32 %v327_v17, 0.0  ;;  %v329_v27 = vadd.f32 %v913_v1, %v290_v18  ;;  %v293_v29 = vmul.f32 %v903_v0, %v254_v15 }
  0x21   : > { %v330_v28 = vadd.f32 %v913_v1, %v291_v19  ;;  %801 = vst [vmem:[%s945_s28 + $0x30] sm:$0xff] %v749_v21   ;;  %v754_v31 = vpack.c.bf16 %v358_v22, %v357_v13  ;;  %v360_v32 = vmax.f32 %v328_v23, 0.0  ;;  %v294_v34 = vmul.f32 %v903_v0, %v255_v20 }
  0x22   : > { %v331_v33 = vadd.f32 %v913_v1, %v292_v24  ;;  %v361_v36 = vmax.f32 %v329_v27, 0.0  ;;  %v332_v38 = vadd.f32 %v913_v1, %v293_v29  ;;  %v295_v39 = vmul.f32 %v903_v0, %v256_v25 }
  0x23   : > { %v362_v37 = vmax.f32 %v330_v28, 0.0  ;;  %802 = vst [vmem:[%s945_s28 + $0x38] sm:$0xff] %v754_v31   ;;  %v759_v42 = vpack.c.bf16 %v360_v32, %v359_v26  ;;  %v333_v44 = vadd.f32 %v913_v1, %v294_v34  ;;  %v296_v45 = vmul.f32 %v903_v0, %v257_v30 }
  0x24   : > { %v363_v43 = vmax.f32 %v331_v33, 0.0  ;;  %v364_v48 = vmax.f32 %v332_v38, 0.0  ;;  %v334_v49 = vadd.f32 %v913_v1, %v295_v39  ;;  %v297_v50 = vmul.f32 %v903_v0, %v258_v35 }
  0x25   : > { %v764_v47 = vpack.c.bf16 %v362_v37, %v361_v36  ;;  %803 = vst [vmem:[%s945_s28 + $0x40] sm:$0xff] %v759_v42   ;;  %v365_v52 = vmax.f32 %v333_v44, 0.0  ;;  %v335_v53 = vadd.f32 %v913_v1, %v296_v45  ;;  %v298_v54 = vmul.f32 %v903_v0, %v259_v40 }
  0x26   : > { %v299_v55 = vmul.f32 %v903_v0, %v260_v41  ;;  %v769_v57 = vpack.c.bf16 %v364_v48, %v363_v43  ;;  %v366_v58 = vmax.f32 %v334_v49, 0.0  ;;  %v336_v59 = vadd.f32 %v913_v1, %v297_v50 }
  0x27   : > { %804 = vst [vmem:[%s945_s28 + $0x48] sm:$0xff] %v764_v47   ;;  %v300_v60 = vmul.f32 %v903_v0, %v261_v46  ;;  %v367_v62 = vmax.f32 %v335_v53, 0.0  ;;  %v337_v63 = vadd.f32 %v913_v1, %v298_v54  ;;  %v301_v3 = vmul.f32 %v903_v0, %v262_v51 }
  0x28   : > { %v338_v2 = vadd.f32 %v913_v1, %v299_v55  ;;  %805 = vst [vmem:[%s945_s28 + $0x50] sm:$0xff] %v769_v57   ;;  %v774_v4 = vpack.c.bf16 %v366_v58, %v365_v52  ;;  %v368_v5 = vmax.f32 %v336_v59, 0.0  ;;  %v302_v7 = vmul.f32 %v903_v0, %v263_v56 }
  0x29   : > { %v339_v6 = vadd.f32 %v913_v1, %v300_v60  ;;  %v369_v8 = vmax.f32 %v337_v63, 0.0  ;;  %v340_v10 = vadd.f32 %v913_v1, %v301_v3  ;;  %v303_v11 = vmul.f32 %v903_v0, %v264_v61 }
  0x2a   : > { %v370_v9 = vmax.f32 %v338_v2, 0.0  ;;  %806 = vst [vmem:[%s945_s28 + $0x58] sm:$0xff] %v774_v4   ;;  %v779_v12 = vpack.c.bf16 %v368_v5, %v367_v62  ;;  %v341_v14 = vadd.f32 %v913_v1, %v302_v7 }
  0x2b   : > { %v371_v13 = vmax.f32 %v339_v6, 0.0  ;;  %v372_v16 = vmax.f32 %v340_v10, 0.0  ;;  %v342_v17 = vadd.f32 %v913_v1, %v303_v11 }
  0x2c   : > { %v784_v15 = vpack.c.bf16 %v370_v9, %v369_v8  ;;  %807 = vst [vmem:[%s945_s28 + $0x60] sm:$0xff] %v779_v12   ;;  %v373_v18 = vmax.f32 %v341_v14, 0.0 }
  0x2d   : > { %v789_v19 = vpack.c.bf16 %v372_v16, %v371_v13  ;;  %v374_v20 = vmax.f32 %v342_v17, 0.0 }
  0x2e   : > { %808 = vst [vmem:[%s945_s28 + $0x68] sm:$0xff] %v784_v15  }
  0x2f   : > { %809 = vst [vmem:[%s945_s28 + $0x70] sm:$0xff] %v789_v19   ;;  %v794_v21 = vpack.c.bf16 %v374_v20, %v373_v18 }
  0x31   : > { %810 = vst [vmem:[%s945_s28 + $0x78] sm:$0xff] %v794_v21  }
  0x32 PF: > { %s13_s14 = sadd.s32 1, %s857_s14   ;;  %s1046_s12 = smov %s853_s13 }
  0x33   : > { %p10_p5 = scmp.ge.s32.totalorder %s13_s14, 4   ;;  %s1047_s13 = smov %s1049_s15 }
  0x35   :  { %12 = sbr.rel (!%p10_p5) target bundleno = 2 (0x2), region = 68 }

// kernel: conv_dru_bn_forward.10
= control target key start
LH: loop header
LB: loop body
LE: loop exit
PB: predicated region body
PF: predicated region fallthrough
CT: control target
= control target key end

     0   :  { %s3067_s21 = smov 0   ;;  %s3069_s22 = smov 0   ;;  %s4157_s0 = inlined_call_operand.vmem [shape: bf16[512,640], index: 0, kind: input, shape index: {}]   ;;  %s4158_s1 = inlined_call_operand.vmem [shape: bf16[640,128], index: 1, kind: input, shape index: {}]   ;;  %s4159_s2 = inlined_call_operand.vmem [shape: f32[1,128], index: 2, kind: input, shape index: {}]   ;;  %s4160_s3 = inlined_call_operand.vmem [shape: f32[512,1], index: 3, kind: input, shape index: {}]   ;;  %s4161_s4 = inlined_call_operand.vmem [shape: f32[512,128], index: 4, kind: output, shape index: {0}]   ;;  %s4162_s5 = inlined_call_operand.vmem [shape: f32[2,1,128], index: 5, kind: output, shape index: {1}]   ;;  %s4163_s6 = inlined_call_operand.vmem [shape: f32[2,1,128], index: 6, kind: output, shape index: {2}]  }
   0x1   :  { %s3071_s23 = smov 0  }
   0x2 LB: > { %s29_s24 = sadd.s32 1, %s3025_s22  ;;  %p2381_p0 = scmp.ge.s32.totalorder %s3029_s23, 1  ;;  %s3029_s23 = sphi %s3071_s23, %s17_s23   ;;  %s3025_s22 = sphi %s3069_s22, %s4285_s22   ;;  %s3021_s21 = sphi %s3067_s21, %s4284_s21  }
   0x3   : > { %p31_p1 = scmp.ge.s32.totalorder %s29_s24, 2  ;;  %p265_p2 = scmp.lt.s32.totalorder %s3029_s23, 3 }
   0x5   : > { %s4287_s24 = smov (%p31_p1, %s29_s24), 0  ;;  %p266_p3 = pnand %p2381_p0, %p265_p2 }
   0x7   : > { %269 = sbr.rel (%p266_p3) target bundleno = 504 (0x1f8), region = 36 }
   0xc   : > { %v2853_v0 = vld [vmem:[%s4158_s1 + $0x78] sm:$0xff]   ;;  %s2382_s27 = sshll.u32 %s3021_s21, 5  ;;  %v2855_v2 = vld [vmem:[%s4158_s1 + $0x70] sm:$0xff]   ;;  %v2857_v4 = vld [vmem:[%s4158_s1 + $0x68] sm:$0xff]   ;;  %v3031_v5 = vmov 0   ;;  %vm1751_vm0 = vcmask 7168  }
   0xd   : > { %v2854_v1 = vld [vmem:[%s4158_s1 + $0x38] sm:$0xff]   ;;  %p324_p4 = scmp.lt.s32.totalorder %s2382_s27, 63  ;;  %2511 = vmatprep.subr.bf16.mxu0 %v2853_v0  ;;  %2807 = vmatprep.subr.bf16.mxu1 %v2853_v0  ;;  %v2856_v3 = vld [vmem:[%s4158_s1 + $0x30] sm:$0xff]   ;;  %v2858_v6 = vld [vmem:[%s4158_s1 + $0x28] sm:$0xff]   ;;  %p352_p5 = scmp.lt.s32.totalorder %s3021_s21, 1 }
   0xe   : > { %2512 = vmatpush3.bf16.msra.mxu0 %v2854_v1  ;;  %2815 = vmatpush3.bf16.msra.mxu1 %v2854_v1  ;;  %v2859_v7 = vld [vmem:[%s4158_s1 + $0x60] sm:$0xff]   ;;  %v2861_v9 = vld [vmem:[%s4158_s1 + $0x58] sm:$0xff]   ;;  %v2863_v11 = vld [vmem:[%s4158_s1 + $0x50] sm:$0xff]  }
   0xf   : > { %2513 = vmatprep.subr.bf16.mxu0 %v2855_v2  ;;  %2808 = vmatprep.subr.bf16.mxu1 %v2855_v2  ;;  %s4289_s27 = smov (!%p324_p4, %s2382_s27), 63  ;;  %v2860_v8 = vld [vmem:[%s4158_s1 + $0x20] sm:$0xff]   ;;  %v2862_v10 = vld [vmem:[%s4158_s1 + $0x18] sm:$0xff]   ;;  %v2864_v14 = vld [vmem:[%s4158_s1 + $0x10] sm:$0xff]   ;;  %s4291_s21 = smov (!%p352_p5, %s3021_s21), 1 }
  0x10   : > { %2852 = vset.pattern.permute.xlu1 %v3031_v5  ;;  %2851 = vset.pattern.permute.xlu0 %v3031_v5  ;;  %s2823_s16 = smul.u32 20, %s4289_s27  ;;  %v2865_v15 = vld [vmem:[%s4158_s1 + $0x48] sm:$0xff]   ;;  %v2867_v17 = vld [vmem:[%s4158_s1 + $0x40] sm:$0xff]   ;;  %v2875_v19 = vld [vmem:[%s4158_s1 + $0xf8] sm:$0xff]   ;;  %s2385_s7 = sshll.u32 %s4289_s27, 3 }
  0x11   : > { %v2866_v16 = vld [vmem:[%s4158_s1 + $0x8] sm:$0xff]   ;;  %v2868_v18 = vld [vmem:[%s4158_s1] sm:$0xff]   ;;  %v2876_v21 = vld [vmem:[%s4158_s1 + $0x138] sm:$0xff]   ;;  %s3236_s12 = scalar_lea.vmem %s4160_s3, %s2385_s7  ;;  %s3622_s20 = scalar_lea.vmem %s4161_s4, %s2385_s7 }
  0x12   : > { %2514 = vmatpush3.bf16.msra.mxu0 %v2856_v3  ;;  %2816 = vmatpush3.bf16.msra.mxu1 %v2856_v3  ;;  %s3121_s28 = scalar_lea.vmem %s4157_s0, %s2823_s16  ;;  %v2877_v23 = vld [vmem:[%s4158_s1 + $0xb8] sm:$0xff]   ;;  %v2878_v24 = vld [vmem:[%s4158_s1 + $0xf0] sm:$0xff]   ;;  %v2886_v30 = vld [vmem:[%s4158_s1 + $0xe8] sm:$0xff]   ;;  %s357_s29 = scalar_lea.vmem %s4162_s5, %s4291_s21 }
  0x13   : > { %2515 = vmatprep.subr.bf16.mxu0 %v2857_v4  ;;  %2809 = vmatprep.subr.bf16.mxu1 %v2857_v4  ;;  %v2871_v12 = vld [vmem:[%s3121_s28 + $0x4] ss:$20 sps:$4 sm:$0xff]   ;;  %v2869_v20 = vld [vmem:[%s3121_s28] ss:$20 sps:$4 sm:$0xff]   ;;  %v2884_v29 = vld [vmem:[%s3121_s28 + $0x28] ss:$20 sps:$4 sm:$0xff]   ;;  %s363_s8 = scalar_lea.vmem %s4163_s6, %s4291_s21 }
  0x14   : > { %v2874_v13 = vld [vmem:[%s3121_s28 + $0x1e4] ss:$20 sps:$4 sm:$0xff]   ;;  %1236 = vmatprep.mubr.bf16.mxu0 %v2871_v12  ;;  %v2872_v22 = vld [vmem:[%s3121_s28 + $0x1e0] ss:$20 sps:$4 sm:$0xff]   ;;  %v2885_v31 = vld [vmem:[%s3121_s28 + $0x208] ss:$20 sps:$4 sm:$0xff]  }
  0x15   : > { %1332 = vmatprep.mubr.bf16.mxu1 %v2874_v13  ;;  %v2880_v25 = vld [vmem:[%s3121_s28 + $0x2c] ss:$20 sps:$4 sm:$0xff]   ;;  %v2889_v27 = vld [vmem:[%s4158_s1 + $0x130] sm:$0xff]   ;;  %v2897_v39 = vld [vmem:[%s4158_s1 + $0xd8] sm:$0xff]  }
  0x16   : > { %2516 = vmatpush3.bf16.msra.mxu0 %v2858_v6  ;;  %2817 = vmatpush3.bf16.msra.mxu1 %v2858_v6  ;;  %v2882_v26 = vld [vmem:[%s3121_s28 + $0x20c] ss:$20 sps:$4 sm:$0xff]   ;;  %v2879_v28 = vld [vmem:[%s4158_s1 + $0xb0] sm:$0xff]   ;;  %v2898_v41 = vld [vmem:[%s4158_s1 + $0x98] sm:$0xff]  }
  0x17   : > { %2517 = vmatprep.subr.bf16.mxu0 %v2859_v7  ;;  %2810 = vmatprep.subr.bf16.mxu1 %v2859_v7  ;;  %v2887_v32 = vld [vmem:[%s4158_s1 + $0xa8] sm:$0xff]   ;;  %v2888_v34 = vld [vmem:[%s4158_s1 + $0xe0] sm:$0xff]   ;;  %v2899_v42 = vld [vmem:[%s4158_s1 + $0xd0] sm:$0xff]  }
  0x18   : > { %v2891_v33 = vld [vmem:[%s3121_s28 + $0x54] ss:$20 sps:$4 sm:$0xff]   ;;  %v2890_v37 = vld [vmem:[%s4158_s1 + $0xa0] sm:$0xff]   ;;  %v2901_v43 = vld [vmem:[%s3121_s28 + $0x7c] ss:$20 sps:$4 sm:$0xff]  }
  0x19   : > { %v2893_v35 = vld [vmem:[%s3121_s28 + $0x234] ss:$20 sps:$4 sm:$0xff]   ;;  %v2895_v38 = vld [vmem:[%s3121_s28 + $0x50] ss:$20 sps:$4 sm:$0xff]   ;;  %v2905_v47 = vld [vmem:[%s3121_s28 + $0x78] ss:$20 sps:$4 sm:$0xff]  }
  0x1a   : > { %2518 = vmatpush3.bf16.msra.mxu0 %v2860_v8  ;;  %2818 = vmatpush3.bf16.msra.mxu1 %v2860_v8  ;;  %v2908_v36 = vld [vmem:[%s4158_s1 + $0x128] sm:$0xff]   ;;  %v2896_v40 = vld [vmem:[%s3121_s28 + $0x230] ss:$20 sps:$4 sm:$0xff]   ;;  %v2931_v53 = vld [vmem:[%s4158_s1 + $0x118] sm:$0xff]  }
  0x1b   : > { %2519 = vmatprep.subr.bf16.mxu0 %v2861_v9  ;;  %2811 = vmatprep.subr.bf16.mxu1 %v2861_v9  ;;  %v2903_v44 = vld [vmem:[%s3121_s28 + $0x25c] ss:$20 sps:$4 sm:$0xff]   ;;  %v2918_v45 = vld [vmem:[%s4158_s1 + $0x120] sm:$0xff]   ;;  %v2906_v48 = vld [vmem:[%s3121_s28 + $0x258] ss:$20 sps:$4 sm:$0xff]  }
  0x1c   : > { %v2900_v46 = vld [vmem:[%s4158_s1 + $0x90] sm:$0xff]   ;;  %v2907_v49 = vld [vmem:[%s4158_s1 + $0xc8] sm:$0xff]   ;;  %v2910_v51 = vld [vmem:[%s4158_s1 + $0xc0] sm:$0xff]  }
  0x1d   : > { %v2909_v50 = vld [vmem:[%s4158_s1 + $0x88] sm:$0xff]   ;;  %v2912_v52 = vld [vmem:[%s3121_s28 + $0xa4] ss:$20 sps:$4 sm:$0xff]   ;;  %v2938_v56 = vld [vmem:[%s4158_s1 + $0x110] sm:$0xff]  }
  0x1e   : > { %2520 = vmatpush3.bf16.msra.mxu0 %v2862_v10  ;;  %2819 = vmatpush3.bf16.msra.mxu1 %v2862_v10  ;;  %v2916_v54 = vld [vmem:[%s3121_s28 + $0xc] ss:$20 sps:$4 sm:$0xff]   ;;  %v2914_v57 = vld [vmem:[%s3121_s28 + $0x8] ss:$20 sps:$4 sm:$0xff]   ;;  %v1721_v3 = vld [vmem:[%s3236_s12 + $0x10] sm:$0xff] }
  0x1f   : > { %2521 = vmatprep.subr.bf16.mxu0 %v2863_v11  ;;  %2812 = vmatprep.subr.bf16.mxu1 %v2863_v11  ;;  %v2911_v55 = vld [vmem:[%s4158_s1 + $0x80] sm:$0xff]   ;;  %v2921_v60 = vld [vmem:[%s3121_s28 + $0x34] ss:$20 sps:$4 sm:$0xff]   ;;  %v1755_v4 = vsel %vm1751_vm0, %v1721_v3, 0.0  ;;  %v2927_v9 = vld [vmem:[%s3121_s28 + $0x5c] ss:$20 sps:$4 sm:$0xff]  }
  0x20   : > { %v2917_v58 = vld [vmem:[%s3121_s28 + $0xa0] ss:$20 sps:$4 sm:$0xff]   ;;  %v1720_v61 = vld [vmem:[%s3236_s12 + $0x8] sm:$0xff]  ;;  %v2924_v6 = vld [vmem:[%s3121_s28 + $0x30] ss:$20 sps:$4 sm:$0xff]  }
  0x21   : > { %v2919_v59 = vld [vmem:[%s3121_s28 + $0xcc] ss:$20 sps:$4 sm:$0xff]   ;;  %1831 = vperm.xlu1 %2852, %v1720_v61   ;;  %v1753_v0 = vsel %vm1751_vm0, %v1720_v61, 0.0  ;;  %v2923_v5 = vld [vmem:[%s3121_s28 + $0xc8] ss:$20 sps:$4 sm:$0xff]  }
  0x22   : > { %2522 = vmatpush3.bf16.msra.mxu0 %v2864_v14  ;;  %2820 = vmatpush3.bf16.msra.mxu1 %v2864_v14  ;;  %v3242_v62 = vld [vmem:[%s3236_s12] sm:$0xff]  ;;  %v2951_v2 = vld [vmem:[%s4158_s1 + $0x108] sm:$0xff]   ;;  %v1722_v10 = vld [vmem:[%s3236_s12 + $0x18] sm:$0xff] }
  0x23   : > { %2523 = vmatprep.subr.bf16.mxu0 %v2865_v15  ;;  %2813 = vmatprep.subr.bf16.mxu1 %v2865_v15  ;;  %v1752_v63 = vsel %vm1751_vm0, %v3242_v62, 0.0  ;;  %v2925_v8 = vld [vmem:[%s3121_s28 + $0xf4] ss:$20 sps:$4 sm:$0xff]   ;;  %v1757_v11 = vsel %vm1751_vm0, %v1722_v10, 0.0  ;;  %v1723_v12 = vld [vmem:[%s3236_s12 + $0x20] sm:$0xff] }
  0x24   : > { %v1754_v1 = vadd.f32 %v1753_v0, %v1752_v63  ;;  %v1759_v14 = vsel %vm1751_vm0, %v1723_v12, 0.0  ;;  %v2958_v15 = vld [vmem:[%s4158_s1 + $0x100] sm:$0xff]   ;;  %v2947_v0 = vld [vmem:[%s3121_s28 + $0xd4] ss:$20 sps:$4 sm:$0xff]  }
  0x25   : > { %1836 = vperm.xlu1 %2852, %v1721_v3  }
  0x26   : > { %2524 = vmatpush3.bf16.msra.mxu0 %v2866_v16  ;;  %2821 = vmatpush3.bf16.msra.mxu1 %v2866_v16  ;;  %v1756_v7 = vadd.f32 %v1755_v4, %v1754_v1  ;;  %v3318_v1 = vld [vmem:[%s3236_s12 + $0x90] sm:$0xff]  ;;  %v3323_v4 = vld [vmem:[%s3236_s12 + $0x98] sm:$0xff] }
  0x27   : > { %2525 = vmatprep.subr.bf16.mxu0 %v2867_v17  ;;  %2814 = vmatprep.subr.bf16.mxu1 %v2867_v17  ;;  %v1724_v17 = vld [vmem:[%s3236_s12 + $0x28] sm:$0xff] }
  0x28   : > { %v1758_v13 = vadd.f32 %v1757_v11, %v1756_v7  ;;  %v3328_v7 = vld [vmem:[%s3236_s12 + $0xa0] sm:$0xff]  ;;  %v1789_v11 = vsel %vm1751_vm0, %v3323_v4, 0.0 }
  0x29   : > { %1841 = vperm.xlu1 %2852, %v1722_v10   ;;  %v2950_v10 = vld [vmem:[%s3121_s28 + $0xd0] ss:$20 sps:$4 sm:$0xff]  }
  0x2a   : > { %2526 = vmatpush3.bf16.msra.mxu0 %v2868_v18  ;;  %2822 = vmatpush3.bf16.msra.mxu1 %v2868_v18  ;;  %v1760_v16 = vadd.f32 %v1759_v14, %v1758_v13  ;;  %v1761_v18 = vsel %vm1751_vm0, %v1724_v17, 0.0  ;;  %v2954_v13 = vld [vmem:[%s3121_s28 + $0xfc] ss:$20 sps:$4 sm:$0xff]  }
  0x2b   : > { %2623 = vmatprep.subr.bf16.mxu1 %v2875_v19  ;;  %2759 = vmatprep.subr.bf16.mxu0 %v2876_v21  ;;  %v1725_v19 = vld [vmem:[%s3236_s12 + $0x30] sm:$0xff] }
  0x2d   : > { %1237 = vmatmul.mubr.bf16.vlgmr.msra.gmra.mxu0 %v2869_v20  ;;  %1333 = vmatmul.mubr.bf16.vlgmr.msra.gmra.mxu1 %v2872_v22  ;;  %v1762_v20 = vadd.f32 %v1761_v18, %v1760_v16  ;;  %v2929_v22 = vld [vmem:[%s3121_s28 + $0xf0] ss:$20 sps:$4 sm:$0xff]   ;;  %v1791_v16 = vsel %vm1751_vm0, %v3328_v7, 0.0 }
  0x2e   : > { %2624 = vmatpush3.bf16.msra.mxu1 %v2877_v23  ;;  %2760 = vmatpush3.bf16.msra.mxu0 %v2876_v21  ;;  %v1763_v21 = vsel %vm1751_vm0, %v1725_v19, 0.0  ;;  %v1726_v23 = vld [vmem:[%s3236_s12 + $0x38] sm:$0xff]  ;;  %v3342_v18 = vld [vmem:[%s3236_s12 + $0xb0] sm:$0xff] }
  0x2f   : > { %2625 = vmatprep.subr.bf16.mxu1 %v2878_v24  ;;  %1244 = vmatprep.mubr.bf16.mxu0 %v2880_v25  ;;  %v2930_v24 = vld [vmem:[%s3121_s28 + $0x58] ss:$20 sps:$4 sm:$0xff]   ;;  %v1764_v25 = vadd.f32 %v1763_v21, %v1762_v20 }
  0x30   : > { %1340 = vmatprep.mubr.bf16.mxu1 %v2882_v26  ;;  %2761 = vmatprep.subr.bf16.mxu0 %v2889_v27  ;;  %v1765_v26 = vsel %vm1751_vm0, %v1726_v23, 0.0  ;;  %v3347_v21 = vld [vmem:[%s3236_s12 + $0xb8] sm:$0xff] }
  0x31   : > { %1846 = vperm.xlu1 %2852, %v1723_v12   ;;  %v2952_v12 = vld [vmem:[%s3121_s28 + $0x194] ss:$20 sps:$4 sm:$0xff]  }
  0x32   : > { %2626 = vmatpush3.bf16.msra.mxu1 %v2879_v28  ;;  %2762 = vmatpush3.bf16.msra.mxu0 %v2889_v27  ;;  %v1727_v27 = vld [vmem:[%s3236_s12 + $0x40] sm:$0xff]  ;;  %v2932_v28 = vld [vmem:[%s3121_s28 + $0x11c] ss:$20 sps:$4 sm:$0xff]  }
  0x33   : > { %2627 = vmatprep.subr.bf16.mxu1 %v2886_v30  ;;  %2763 = vmatprep.subr.bf16.mxu0 %v2908_v36  ;;  %v2934_v30 = vld [vmem:[%s3121_s28 + $0x84] ss:$20 sps:$4 sm:$0xff]  }
  0x35   : > { %1245 = vmatmul.mubr.bf16.gmra.mxu0 %v2884_v29  ;;  %1341 = vmatmul.mubr.bf16.gmra.mxu1 %v2885_v31  ;;  %v1767_v29 = vsel %vm1751_vm0, %v1727_v27, 0.0  ;;  %v1766_v31 = vadd.f32 %v1765_v26, %v1764_v25  ;;  %v1797_v25 = vsel %vm1751_vm0, %v3347_v21, 0.0  ;;  %v3355_v26 = vld [vmem:[%s3236_s12 + $0xc8] sm:$0xff] }
  0x36   : > { %2628 = vmatpush3.bf16.msra.mxu1 %v2887_v32  ;;  %1252 = vmatprep.mubr.bf16.mxu0 %v2891_v33  ;;  %v1728_v32 = vld [vmem:[%s3236_s12 + $0x48] sm:$0xff] }
  0x37   : > { %2629 = vmatprep.subr.bf16.mxu1 %v2888_v34  ;;  %1348 = vmatprep.mubr.bf16.mxu1 %v2893_v35  ;;  %v1768_v33 = vadd.f32 %v1767_v29, %v1766_v31  ;;  %v1769_v34 = vsel %vm1751_vm0, %v1728_v32, 0.0  ;;  %v1729_v35 = vld [vmem:[%s3236_s12 + $0x50] sm:$0xff]  ;;  %v2957_v29 = vld [vmem:[%s3121_s28 + $0xf8] ss:$20 sps:$4 sm:$0xff]  }
  0x38   : > { %2764 = vmatpush3.bf16.msra.mxu0 %v2908_v36  ;;  %1851 = vperm.xlu1 %2852, %v1724_v17   ;;  %v1771_v36 = vsel %vm1751_vm0, %v1729_v35, 0.0  ;;  %v2959_v31 = vld [vmem:[%s3121_s28 + $0x1bc] ss:$20 sps:$4 sm:$0xff]  }
  0x39   : > { %2765 = vmatprep.subr.bf16.mxu0 %v2918_v45 }
  0x3a   : > { %2630 = vmatpush3.bf16.msra.mxu1 %v2890_v37  ;;  %v1770_v37 = vadd.f32 %v1769_v34, %v1768_v33  ;;  %v1745_v33 = vld [vmem:[%s3236_s12 + $0xd0] sm:$0xff] }
  0x3b   : > { %2631 = vmatprep.subr.bf16.mxu1 %v2897_v39 }
  0x3c   : > { %2766 = vmatpush3.bf16.msra.mxu0 %v2918_v45  ;;  %1856 = vperm.xlu1 %2852, %v1725_v19   ;;  %v1772_v39 = vadd.f32 %v1771_v36, %v1770_v37  ;;  %v3367_v36 = vld [vmem:[%s3236_s12 + $0xd8] sm:$0xff] }
  0x3d   : > { %1253 = vmatmul.mubr.bf16.gmra.mxu0 %v2895_v38  ;;  %1349 = vmatmul.mubr.bf16.gmra.mxu1 %v2896_v40  ;;  %v1730_v38 = vld [vmem:[%s3236_s12 + $0x58] sm:$0xff]  ;;  %v3281_v40 = vld [vmem:[%s3236_s12 + $0x60] sm:$0xff] }
  0x3e   : > { %2632 = vmatpush3.bf16.msra.mxu1 %v2898_v41  ;;  %1260 = vmatprep.mubr.bf16.mxu0 %v2901_v43  ;;  %v3284_v41 = vld [vmem:[%s3236_s12 + $0x68] sm:$0xff]  ;;  %v1775_v45 = vsel %vm1751_vm0, %v3281_v40, 0.0 }
  0x3f   : > { %2633 = vmatprep.subr.bf16.mxu1 %v2899_v42  ;;  %1356 = vmatprep.mubr.bf16.mxu1 %v2903_v44  ;;  %v1773_v42 = vsel %vm1751_vm0, %v1730_v38, 0.0  ;;  %v2936_v43 = vld [vmem:[%s3121_s28 + $0x118] ss:$20 sps:$4 sm:$0xff]   ;;  %v2937_v44 = vld [vmem:[%s3121_s28 + $0x80] ss:$20 sps:$4 sm:$0xff]  }
  0x40   : > { %2767 = vmatprep.subr.bf16.mxu0 %v2931_v53  ;;  %1861 = vperm.xlu1 %2852, %v1726_v23   ;;  %v1743_v23 = vld [vmem:[%s3236_s12 + $0xc0] sm:$0xff] }
  0x41   : > { %2768 = vmatpush3.bf16.msra.mxu0 %v2931_v53 }
  0x42   : > { %2634 = vmatpush3.bf16.msra.mxu1 %v2900_v46  ;;  %2769 = vmatprep.subr.bf16.mxu0 %v2938_v56  ;;  %v2939_v46 = vld [vmem:[%s3121_s28 + $0x144] ss:$20 sps:$4 sm:$0xff]  }
  0x43   : > { %2635 = vmatprep.subr.bf16.mxu1 %v2907_v49  ;;  %v1774_v49 = vadd.f32 %v1773_v42, %v1772_v39  ;;  %v1747_v39 = vld [vmem:[%s3236_s12 + $0xe0] sm:$0xff]  ;;  %v1805_v42 = vsel %vm1751_vm0, %v3367_v36, 0.0 }
  0x44   : > { %1866 = vperm.xlu1 %2852, %v1727_v27  }
  0x45   : > { %1261 = vmatmul.mubr.bf16.gmra.mxu0 %v2905_v47  ;;  %1357 = vmatmul.mubr.bf16.gmra.mxu1 %v2906_v48  ;;  %v2941_v47 = vld [vmem:[%s3121_s28 + $0xac] ss:$20 sps:$4 sm:$0xff]   ;;  %v3294_v48 = vld [vmem:[%s3236_s12 + $0x70] sm:$0xff] }
  0x46   : > { %2636 = vmatpush3.bf16.msra.mxu1 %v2909_v50  ;;  %1268 = vmatprep.mubr.bf16.mxu0 %v2912_v52  ;;  %v1777_v50 = vsel %vm1751_vm0, %v3284_v41, 0.0  ;;  %v1776_v52 = vadd.f32 %v1775_v45, %v1774_v49  ;;  %v1779_v53 = vsel %vm1751_vm0, %v3294_v48, 0.0  ;;  %v2963_v45 = vld [vmem:[%s3121_s28 + $0x1b8] ss:$20 sps:$4 sm:$0xff]   ;;  %v2967_v49 = vld [vmem:[%s3121_s28 + $0x10] ss:$20 sps:$4 sm:$0xff]  }
  0x47   : > { %2637 = vmatprep.subr.bf16.mxu1 %v2910_v51  ;;  %1397 = vmatprep.mubr.bf16.mxu1 %v2916_v54  ;;  %v3299_v51 = vld [vmem:[%s3236_s12 + $0x78] sm:$0xff]  ;;  %v3304_v54 = vld [vmem:[%s3236_s12 + $0x80] sm:$0xff] }
  0x48   : > { %2770 = vmatpush3.bf16.msra.mxu0 %v2938_v56  ;;  %v2943_v56 = vld [vmem:[%s3121_s28 + $0x140] ss:$20 sps:$4 sm:$0xff]   ;;  %v1783_v63 = vsel %vm1751_vm0, %v3304_v54, 0.0  ;;  %1871 = vperm.xlu1 %2852, %v1728_v32   ;;  %v2961_v32 = vld [vmem:[%s3121_s28 + $0x124] ss:$20 sps:$4 sm:$0xff]  }
  0x49   : > { %2771 = vmatprep.subr.bf16.mxu0 %v2951_v2 }
  0x4a   : > { %2638 = vmatpush3.bf16.msra.mxu1 %v2911_v55  ;;  %v1778_v55 = vadd.f32 %v1777_v50, %v1776_v52  ;;  %v1749_v50 = vld [vmem:[%s3236_s12 + $0xf0] sm:$0xff] }
  0x4c   : > { %2772 = vmatpush3.bf16.msra.mxu0 %v2951_v2  ;;  %v1780_v61 = vadd.f32 %v1779_v53, %v1778_v55  ;;  %1876 = vperm.xlu1 %2852, %v1729_v35   ;;  %v1801_v35 = vsel %vm1751_vm0, %v3355_v26, 0.0  ;;  %v3387_v55 = vld [vmem:[%s3236_s12 + $0xf8] sm:$0xff] }
  0x4d   : > { %1269 = vmatmul.mubr.bf16.gmra.mxu0 %v2917_v58  ;;  %1398 = vmatmul.mubr.bf16.vlgmr.msra.gmra.mxu1 %v2914_v57  ;;  %v2944_v57 = vld [vmem:[%s3121_s28 + $0xa8] ss:$20 sps:$4 sm:$0xff]   ;;  %v1781_v58 = vsel %vm1751_vm0, %v3299_v51, 0.0 }
  0x4e   : > { %1276 = vmatprep.mubr.bf16.mxu0 %v2919_v59  ;;  %1405 = vmatprep.mubr.bf16.mxu1 %v2921_v60  ;;  %v2945_v59 = vld [vmem:[%s3121_s28 + $0x16c] ss:$20 sps:$4 sm:$0xff]   ;;  %v1782_v2 = vadd.f32 %v1781_v58, %v1780_v61  ;;  %v1813_v58 = vsel %vm1751_vm0, %v3387_v55, 0.0  ;;  %v2968_v61 = vld [vmem:[%s3121_s28 + $0x148] ss:$20 sps:$4 sm:$0xff]  }
  0x4f   : > { %2773 = vmatprep.subr.bf16.mxu0 %v2958_v15  ;;  %v3312_v60 = vld [vmem:[%s3236_s12 + $0x88] sm:$0xff] }
  0x50   : > { %2774 = vmatpush3.bf16.msra.mxu0 %v2958_v15  ;;  %v1785_v3 = vsel %vm1751_vm0, %v3312_v60, 0.0  ;;  %v3337_v15 = vld [vmem:[%s3236_s12 + $0xa8] sm:$0xff]  ;;  %1881 = vperm.xlu1 %2852, %v1730_v38   ;;  %v1803_v38 = vsel %vm1751_vm0, %v1745_v33, 0.0 }
  0x51   : > { %v1793_v19 = vsel %vm1751_vm0, %v3337_v15, 0.0 }
  0x54   : > { %1886 = vperm.xlu1 %2852, %v3281_v40  }
  0x55   : > { %1277 = vmatmul.mubr.bf16.gmra.mxu0 %v2923_v5  ;;  %1406 = vmatmul.mubr.bf16.gmra.mxu1 %v2924_v6  ;;  %v1784_v5 = vadd.f32 %v1783_v63, %v1782_v2  ;;  %v1787_v6 = vsel %vm1751_vm0, %v3318_v1, 0.0  ;;  %v2969_v63 = vld [vmem:[%s3121_s28 + $0x38] ss:$20 sps:$4 sm:$0xff]  }
  0x56   : > { %1284 = vmatprep.mubr.bf16.mxu0 %v2925_v8  ;;  %1413 = vmatprep.mubr.bf16.mxu1 %v2927_v9  ;;  %v2949_v9 = vld [vmem:[%s3121_s28 + $0x168] ss:$20 sps:$4 sm:$0xff]  }
  0x57   : > { %v1786_v8 = vadd.f32 %v1785_v3, %v1784_v5  ;;  %v2973_v3 = vld [vmem:[%s3121_s28 + $0x170] ss:$20 sps:$4 sm:$0xff]   ;;  %v2974_v5 = vld [vmem:[%s3121_s28 + $0x88] ss:$20 sps:$4 sm:$0xff]  }
  0x58   : > { %1896 = vperm.xlu1 %2852, %v3294_v48   ;;  %v2965_v48 = vld [vmem:[%s3121_s28 + $0x14c] ss:$20 sps:$4 sm:$0xff]  }
  0x59   : > { %v1788_v14 = vadd.f32 %v1787_v6, %v1786_v8  ;;  %v2975_v6 = vld [vmem:[%s3121_s28 + $0x19c] ss:$20 sps:$4 sm:$0xff]   ;;  %v2978_v8 = vld [vmem:[%s3121_s28 + $0x198] ss:$20 sps:$4 sm:$0xff]  }
  0x5b   : > { %v1790_v17 = vadd.f32 %v1789_v11, %v1788_v14  ;;  %v2982_v11 = vld [vmem:[%s3121_s28 + $0x100] ss:$20 sps:$4 sm:$0xff]  }
  0x5c   : > { %1906 = vperm.xlu1 %2852, %v3304_v54   ;;  %v1811_v54 = vsel %vm1751_vm0, %v1749_v50, 0.0  ;;  %v2985_v14 = vld [vmem:[%s3121_s28 + $0x1ec] ss:$20 sps:$4 sm:$0xff]  }
  0x5d   : > { %1285 = vmatmul.mubr.bf16.gmra.mxu0 %v2929_v22  ;;  %1414 = vmatmul.mubr.bf16.gmra.mxu1 %v2930_v24  ;;  %v1792_v20 = vadd.f32 %v1791_v16, %v1790_v17  ;;  %v1795_v22 = vsel %vm1751_vm0, %v3342_v18, 0.0  ;;  %v2987_v16 = vld [vmem:[%s3121_s28 + $0x150] ss:$20 sps:$4 sm:$0xff]   ;;  %v2988_v17 = vld [vmem:[%s3121_s28 + $0x1e8] ss:$20 sps:$4 sm:$0xff]  }
  0x5e   : > { %1292 = vmatprep.mubr.bf16.mxu0 %v2932_v28  ;;  %1421 = vmatprep.mubr.bf16.mxu1 %v2934_v30  ;;  %v2956_v28 = vld [vmem:[%s3121_s28 + $0x190] ss:$20 sps:$4 sm:$0xff]   ;;  %v1799_v30 = vsel %vm1751_vm0, %v1743_v23, 0.0 }
  0x5f   : > { %v1794_v24 = vadd.f32 %v1793_v19, %v1792_v20  ;;  %v2990_v19 = vld [vmem:[%s3121_s28 + $0x214] ss:$20 sps:$4 sm:$0xff]  }
  0x60   : > { %1916 = vperm.xlu1 %2852, %v3318_v1   ;;  %v2972_v1 = vld [vmem:[%s3121_s28 + $0x60] ss:$20 sps:$4 sm:$0xff]  }
  0x61   : > { %v1796_v27 = vadd.f32 %v1795_v22, %v1794_v24  ;;  %v2992_v20 = vld [vmem:[%s3121_s28 + $0x1a0] ss:$20 sps:$4 sm:$0xff]   ;;  %v2994_v22 = vld [vmem:[%s3121_s28 + $0x1c8] ss:$20 sps:$4 sm:$0xff]   ;;  %v2999_v24 = vld [vmem:[%s3121_s28 + $0x218] ss:$20 sps:$4 sm:$0xff]  }
  0x63   : > { %v1798_v34 = vadd.f32 %v1797_v25, %v1796_v27  ;;  %v3000_v25 = vld [vmem:[%s3121_s28 + $0x264] ss:$20 sps:$4 sm:$0xff]   ;;  %v3002_v27 = vld [vmem:[%s3121_s28 + $0x240] ss:$20 sps:$4 sm:$0xff]  }
  0x64   : > { %1926 = vperm.xlu1 %2852, %v3328_v7   ;;  %v2977_v7 = vld [vmem:[%s3121_s28 + $0xb0] ss:$20 sps:$4 sm:$0xff]  }
  0x65   : > { %1293 = vmatmul.mubr.bf16.gmra.mxu0 %v2936_v43  ;;  %1422 = vmatmul.mubr.bf16.gmra.mxu1 %v2937_v44  ;;  %v1800_v37 = vadd.f32 %v1799_v30, %v1798_v34  ;;  %v3375_v43 = vld [vmem:[%s3236_s12 + $0xe8] sm:$0xff] }
  0x66   : > { %1300 = vmatprep.mubr.bf16.mxu0 %v2939_v46  ;;  %1429 = vmatprep.mubr.bf16.mxu1 %v2941_v47  ;;  %v2964_v46 = vld [vmem:[%s3121_s28 + $0x120] ss:$20 sps:$4 sm:$0xff]   ;;  %v1807_v47 = vsel %vm1751_vm0, %v1747_v39, 0.0  ;;  %v1809_v53 = vsel %vm1751_vm0, %v3375_v43, 0.0 }
  0x67   : > { %v1802_v40 = vadd.f32 %v1801_v35, %v1800_v37 }
  0x68   : > { %1936 = vperm.xlu1 %2852, %v3342_v18   ;;  %v2989_v18 = vld [vmem:[%s3121_s28 + $0x178] ss:$20 sps:$4 sm:$0xff]  }
  0x69   : > { %v1804_v44 = vadd.f32 %v1803_v38, %v1802_v40 }
  0x6b   : > { %v1806_v52 = vadd.f32 %v1805_v42, %v1804_v44 }
  0x6c   : > { %1946 = vperm.xlu1 %2852, %v1743_v23   ;;  %v2995_v23 = vld [vmem:[%s3121_s28 + $0x23c] ss:$20 sps:$4 sm:$0xff]  }
  0x6d   : > { %1301 = vmatmul.mubr.bf16.gmra.mxu0 %v2943_v56  ;;  %1430 = vmatmul.mubr.bf16.gmra.mxu1 %v2944_v57  ;;  %v1808_v56 = vadd.f32 %v1807_v47, %v1806_v52 }
  0x6e   : > { %1308 = vmatprep.mubr.bf16.mxu0 %v2945_v59  ;;  %1437 = vmatprep.mubr.bf16.mxu1 %v2947_v0  ;;  %v2970_v0 = vld [vmem:[%s3121_s28 + $0x174] ss:$20 sps:$4 sm:$0xff]  }
  0x6f   : > { %v1810_v57 = vadd.f32 %v1809_v53, %v1808_v56 }
  0x70   : > { %1956 = vperm.xlu1 %2852, %v1745_v33  }
  0x71   : > { %v1812_v59 = vadd.f32 %v1811_v54, %v1810_v57 }
  0x73   : > { %v1814_v2 = vadd.f32 %v1813_v58, %v1812_v59 }
  0x74   : > { %1966 = vperm.xlu1 %2852, %v1747_v39  }
  0x75   : > { %1309 = vmatmul.mubr.bf16.gmra.mxu0 %v2949_v9  ;;  %1438 = vmatmul.mubr.bf16.gmra.mxu1 %v2950_v10  ;;  %v2979_v9 = vld [vmem:[%s3121_s28 + $0xd8] ss:$20 sps:$4 sm:$0xff]  }
  0x76   : > { %1316 = vmatprep.mubr.bf16.mxu0 %v2952_v12  ;;  %1445 = vmatprep.mubr.bf16.mxu1 %v2954_v13  ;;  %v2980_v10 = vld [vmem:[%s3121_s28 + $0x1c4] ss:$20 sps:$4 sm:$0xff]   ;;  %v2983_v12 = vld [vmem:[%s3121_s28 + $0x1c0] ss:$20 sps:$4 sm:$0xff]   ;;  %v2984_v13 = vld [vmem:[%s3121_s28 + $0x128] ss:$20 sps:$4 sm:$0xff]  }
  0x77   : > { %1815 = vadd.xlane.f32.xlu0 %v1814_v2 }
  0x78   : > { %1976 = vperm.xlu1 %2852, %v1749_v50  }
  0x7d   : > { %1317 = vmatmul.mubr.bf16.gmra.mxu0 %v2956_v28  ;;  %1446 = vmatmul.mubr.bf16.gmra.mxu1 %v2957_v29 }
  0x7e   : > { %1324 = vmatprep.mubr.bf16.mxu0 %v2959_v31  ;;  %1453 = vmatprep.mubr.bf16.mxu1 %v2961_v32 }
  0x85   : > { %1325 = vmatmul.mubr.bf16.gmra.mxu0 %v2963_v45  ;;  %1454 = vmatmul.mubr.bf16.gmra.mxu1 %v2964_v46 }
  0x86   : > { %1461 = vmatprep.mubr.bf16.mxu1 %v2965_v48  ;;  %2775 = vmatprep.mubr.bf16.mxu0 %v2967_v49 }
  0x8d   : > { %1462 = vmatmul.mubr.bf16.gmra.mxu1 %v2968_v61  ;;  %2776 = vmatmul.mubr.bf16.vlgmr.msra.gmra.mxu0 %v2969_v63 }
  0x8e   : > { %1469 = vmatprep.mubr.bf16.mxu1 %v2970_v0  ;;  %2779 = vmatprep.mubr.bf16.mxu0 %v2972_v1 }
  0x8f   : > { %1826 = vperm.xlu0 %2851, %v3242_v62   ;;  %v2993_v62 = vld [vmem:[%s3121_s28 + $0x210] ss:$20 sps:$4 sm:$0xff]  }
  0x93   : > { %1891 = vperm.xlu0 %2851, %v3284_v41   ;;  %v2997_v41 = vld [vmem:[%s3121_s28 + $0x1f0] ss:$20 sps:$4 sm:$0xff]  }
  0x95   : > { %1470 = vmatmul.mubr.bf16.gmra.mxu1 %v2973_v3  ;;  %2780 = vmatmul.mubr.bf16.gmra.mxu0 %v2974_v5 }
  0x96   : > { %1477 = vmatprep.mubr.bf16.mxu1 %v2975_v6  ;;  %2783 = vmatprep.mubr.bf16.mxu0 %v2977_v7 }
  0x97   : > { %1901 = vperm.xlu0 %2851, %v3299_v51   ;;  %v2998_v51 = vld [vmem:[%s3121_s28 + $0x238] ss:$20 sps:$4 sm:$0xff]  }
  0x9b   : > { %1911 = vperm.xlu0 %2851, %v3312_v60   ;;  %v3003_v60 = vld [vmem:[%s3121_s28 + $0x260] ss:$20 sps:$4 sm:$0xff]  }
  0x9d   : > { %1478 = vmatmul.mubr.bf16.gmra.mxu1 %v2978_v8  ;;  %2784 = vmatmul.mubr.bf16.gmra.mxu0 %v2979_v9 }
  0x9e   : > { %1485 = vmatprep.mubr.bf16.mxu1 %v2980_v10  ;;  %2787 = vmatprep.mubr.bf16.mxu0 %v2982_v11 }
  0x9f   : > { %1921 = vperm.xlu0 %2851, %v3323_v4   ;;  %v3004_v4 = vld [vmem:[%s3121_s28 + $0x268] ss:$20 sps:$4 sm:$0xff]  }
  0xa3   : > { %1931 = vperm.xlu0 %2851, %v3337_v15  }
  0xa5   : > { %1486 = vmatmul.mubr.bf16.gmra.mxu1 %v2983_v12  ;;  %2788 = vmatmul.mubr.bf16.gmra.mxu0 %v2984_v13 }
  0xa6   : > { %1493 = vmatprep.mubr.bf16.mxu1 %v2985_v14  ;;  %2791 = vmatprep.mubr.bf16.mxu0 %v2987_v16 }
  0xa7   : > { %1941 = vperm.xlu0 %2851, %v3347_v21  }
  0xab   : > { %1951 = vperm.xlu0 %2851, %v3355_v26  }
  0xad   : > { %1494 = vmatmul.mubr.bf16.gmra.mxu1 %v2988_v17  ;;  %2792 = vmatmul.mubr.bf16.gmra.mxu0 %v2989_v18 }
  0xae   : > { %1501 = vmatprep.mubr.bf16.mxu1 %v2990_v19  ;;  %2795 = vmatprep.mubr.bf16.mxu0 %v2992_v20 }
  0xaf   : > { %1961 = vperm.xlu0 %2851, %v3367_v36  }
  0xb3   : > { %1971 = vperm.xlu0 %2851, %v3375_v43  }
  0xb5   : > { %1502 = vmatmul.mubr.bf16.gmra.mxu1 %v2993_v62  ;;  %2796 = vmatmul.mubr.bf16.gmra.mxu0 %v2994_v22 }
  0xb6   : > { %1509 = vmatprep.mubr.bf16.mxu1 %v2995_v23  ;;  %2799 = vmatprep.mubr.bf16.mxu0 %v2997_v41 }
  0xb7   : > { %1981 = vperm.xlu0 %2851, %v3387_v55  }
  0xbd   : > { %1510 = vmatmul.mubr.bf16.gmra.mxu1 %v2998_v51  ;;  %2800 = vmatmul.mubr.bf16.gmra.mxu0 %v2999_v24 }
  0xbe   : > { %1517 = vmatprep.mubr.bf16.mxu1 %v3000_v25  ;;  %2803 = vmatprep.mubr.bf16.mxu0 %v3002_v27  ;;  %v3482_v25 = vpop.permute.xlu1 %1831 }
  0xc5   : > { %1518 = vmatmul.mubr.bf16.gmra.mxu1 %v3003_v60  ;;  %2804 = vmatmul.mubr.bf16.gmra.mxu0 %v3004_v4 }
  0xed   : > { %v2527_v15 = vpop.f32.mrf.mxu0  ;;  %v2599_v28 = vpop.f32.mrf.mxu1 }
  0xef   : > { %v2528_v29 = vpop.f32.mrf.mxu0  ;;  %v2600_v21 = vpop.f32.mrf.mxu1 }
  0xf0   : > { %v3436_v30 = vadd.f32 %v2528_v29, %v2527_v15  ;;  %v3438_v31 = vadd.f32 %v2600_v21, %v2599_v28 }
  0xf1   : > { %v2530_v32 = vpop.f32.mrf.mxu0  ;;  %v2602_v26 = vpop.f32.mrf.mxu1 }
  0xf2   : > { %4182 = vst [vmem:[#allocation2_spill] sm:$0xff] %v3438_v31 }
  0xf3   : > { %v2531_v33 = vpop.f32.mrf.mxu0  ;;  %v2603_v34 = vpop.f32.mrf.mxu1 }
  0xf4   : > { %v3440_v35 = vadd.f32 %v2531_v33, %v2530_v32  ;;  %v3442_v36 = vadd.f32 %v2603_v34, %v2602_v26 }
  0xf5   : > { %v2533_v37 = vpop.f32.mrf.mxu0  ;;  %v2605_v38 = vpop.f32.mrf.mxu1 }
  0xf6   : > { %4183 = vst [vmem:[#allocation3_spill] sm:$0xff] %v3442_v36 }
  0xf7   : > { %v2534_v39 = vpop.f32.mrf.mxu0  ;;  %v2606_v40 = vpop.f32.mrf.mxu1 }
  0xf8   : > { %v3444_v42 = vadd.f32 %v2534_v39, %v2533_v37  ;;  %v3446_v43 = vadd.f32 %v2606_v40, %v2605_v38  ;;  %v3492_v37 = vpop.permute.xlu1 %1836 }
  0xf9   : > { %v2536_v44 = vpop.f32.mrf.mxu0  ;;  %v2608_v45 = vpop.f32.mrf.mxu1 }
  0xfa   : > { %4184 = vst [vmem:[#allocation4_spill] sm:$0xff] %v3446_v43 }
  0xfb   : > { %v2537_v46 = vpop.f32.mrf.mxu0  ;;  %v2609_v47 = vpop.f32.mrf.mxu1 }
  0xfc   : > { %v3448_v48 = vadd.f32 %v2537_v46, %v2536_v44  ;;  %v3450_v49 = vadd.f32 %v2609_v47, %v2608_v45 }
  0xfd   : > { %v2539_v50 = vpop.f32.mrf.mxu0  ;;  %v2611_v52 = vpop.f32.mrf.mxu1 }
  0xfe   : > { %4185 = vst [vmem:[#allocation5_spill] sm:$0xff] %v3450_v49 }
  0xff   : > { %v2540_v53 = vpop.f32.mrf.mxu0  ;;  %v2612_v55 = vpop.f32.mrf.mxu1 }
 0x100   : > { %v3452_v56 = vadd.f32 %v2540_v53, %v2539_v50  ;;  %v3454_v54 = vadd.f32 %v2612_v55, %v2611_v52  ;;  %v1816_v27 = vpop.xlane.xlu0 %1815 }
 0x101   : > { %v2542_v57 = vpop.f32.mrf.mxu0  ;;  %v2614_v58 = vpop.f32.mrf.mxu1  ;;  %v1817_v15 = vrot.slane %v1816_v27, 4 }
 0x102   : > { %4186 = vst [vmem:[#allocation6_spill] sm:$0xff] %v3454_v54 }
 0x103   : > { %v2543_v59 = vpop.f32.mrf.mxu0  ;;  %v2615_v61 = vpop.f32.mrf.mxu1  ;;  %v1818_v32 = vadd.f32 %v1817_v15, %v1816_v27 }
 0x104   : > { %v3456_v63 = vadd.f32 %v2543_v59, %v2542_v57  ;;  %v3458_v0 = vadd.f32 %v2615_v61, %v2614_v58  ;;  %v3504_v57 = vpop.permute.xlu1 %1841 }
 0x105   : > { %v2545_v1 = vpop.f32.mrf.mxu0  ;;  %v2617_v2 = vpop.f32.mrf.mxu1  ;;  %v1819_v34 = vrot.slane %v1818_v32, 2 }
 0x106   : > { %4187 = vst [vmem:[#allocation7_spill] sm:$0xff] %v3458_v0 }
 0x107   : > { %v2546_v3 = vpop.f32.mrf.mxu0  ;;  %v2618_v5 = vpop.f32.mrf.mxu1  ;;  %v1820_v44 = vadd.f32 %v1819_v34, %v1818_v32 }
 0x108   : > { %v3460_v6 = vadd.f32 %v2546_v3, %v2545_v1  ;;  %v3462_v7 = vadd.f32 %v2618_v5, %v2617_v2 }
 0x109   : > { %v2548_v8 = vpop.f32.mrf.mxu0  ;;  %v2620_v9 = vpop.f32.mrf.mxu1  ;;  %v1821_v47 = vrot.slane %v1820_v44, 1 }
 0x10a   : > { %4188 = vst [vmem:[#allocation8_spill] sm:$0xff] %v3462_v7 }
 0x10b   : > { %v2549_v10 = vpop.f32.mrf.mxu0  ;;  %v2621_v11 = vpop.f32.mrf.mxu1  ;;  %v1822_v55 = vadd.f32 %v1821_v47, %v1820_v44 }
 0x10c   : > { %v3464_v12 = vadd.f32 %v2549_v10, %v2548_v8  ;;  %v3466_v13 = vadd.f32 %v2621_v11, %v2620_v9  ;;  %v3516_v8 = vpop.permute.xlu1 %1846 }
 0x10d   : > { %v2551_v14 = vpop.f32.mrf.mxu0  ;;  %v3468_v16 = vpop.f32.mrf.mxu1  ;;  %2824 = vpush %v1822_v55 }
 0x10e   : > { %4189 = vst [vmem:[#allocation9_spill] sm:$0xff] %v3466_v13 }
 0x10f   : > { %v2552_v17 = vpop.f32.mrf.mxu0  ;;  %v3470_v18 = vpop.f32.mrf.mxu1 }
 0x110   : > { %v3472_v19 = vadd.f32 %v2552_v17, %v2551_v14 }
 0x111   : > { %v2554_v20 = vpop.f32.mrf.mxu0  ;;  %v3474_v62 = vpop.f32.mrf.mxu1 }
 0x113   : > { %v2555_v22 = vpop.f32.mrf.mxu0  ;;  %v3476_v23 = vpop.f32.mrf.mxu1 }
 0x114   : > { %v3478_v41 = vadd.f32 %v2555_v22, %v2554_v20  ;;  %v3530_v22 = vpop.permute.xlu1 %1851 }
 0x115   : > { %v2557_v51 = vpop.f32.mrf.mxu0  ;;  %v3480_v24 = vpop.f32.mrf.mxu1 }
 0x117   : > { %v2558_v60 = vpop.f32.mrf.mxu0  ;;  %v3484_v4 = vpop.f32.mrf.mxu1 }
 0x118   : > { %v3486_v28 = vadd.f32 %v2558_v60, %v2557_v51 }
 0x119   : > { %v2560_v29 = vpop.f32.mrf.mxu0  ;;  %v3488_v21 = vpop.f32.mrf.mxu1 }
 0x11b   : > { %v2561_v26 = vpop.f32.mrf.mxu0  ;;  %v3490_v33 = vpop.f32.mrf.mxu1 }
 0x11c   : > { %v3494_v38 = vadd.f32 %v2561_v26, %v2560_v29  ;;  %v3544_v26 = vpop.permute.xlu1 %1856 }
 0x11d   : > { %v2563_v39 = vpop.f32.mrf.mxu0  ;;  %v3496_v40 = vpop.f32.mrf.mxu1 }
 0x11f   : > { %v2564_v45 = vpop.f32.mrf.mxu0  ;;  %v3498_v46 = vpop.f32.mrf.mxu1 }
 0x120   : > { %v3500_v50 = vadd.f32 %v2564_v45, %v2563_v39  ;;  %v3558_v55 = vpop.permute.xlu1 %1861 }
 0x121   : > { %v2566_v52 = vpop.f32.mrf.mxu0  ;;  %v3502_v53 = vpop.f32.mrf.mxu1 }
 0x123   : > { %v2567_v58 = vpop.f32.mrf.mxu0  ;;  %v3506_v59 = vpop.f32.mrf.mxu1 }
 0x124   : > { %v3508_v61 = vadd.f32 %v2567_v58, %v2566_v52  ;;  %v3572_v49 = vpop.permute.xlu1 %1866 }
 0x125   : > { %v3510_v1 = vpop.f32.mrf.mxu0  ;;  %v3512_v2 = vpop.f32.mrf.mxu1  ;;  %4200 = vst [vmem:[#allocation20_spill] sm:$0xff] %v3572_v49 }
 0x126   : > { %4190 = vst [vmem:[#allocation10_spill] sm:$0xff] %v3508_v61 }
 0x127   : > { %v3514_v3 = vpop.f32.mrf.mxu0  ;;  %v2658_v5 = vpop.f32.mrf.mxu1 }
 0x129   : > { %v3518_v9 = vpop.f32.mrf.mxu0  ;;  %v3520_v10 = vpop.f32.mrf.mxu1 }
 0x12b   : > { %v3522_v11 = vpop.f32.mrf.mxu0  ;;  %v3524_v14 = vpop.f32.mrf.mxu1 }
 0x12d   : > { %v3526_v17 = vpop.f32.mrf.mxu0  ;;  %v3528_v20 = vpop.f32.mrf.mxu1 }
 0x12e   : > { %4191 = vst [vmem:[#allocation11_spill] sm:$0xff] %v3526_v17 }
 0x12f   : > { %v3532_v51 = vpop.f32.mrf.mxu0  ;;  %v3534_v27 = vpop.f32.mrf.mxu1 }
 0x130   : > { %4192 = vst [vmem:[#allocation12_spill] sm:$0xff] %v3532_v51 }
 0x131   : > { %v3536_v60 = vpop.f32.mrf.mxu0  ;;  %v3538_v15 = vpop.f32.mrf.mxu1 }
 0x132   : > { %4193 = vst [vmem:[#allocation13_spill] sm:$0xff] %v3536_v60 }
 0x133   : > { %v3540_v29 = vpop.f32.mrf.mxu0  ;;  %v3542_v32 = vpop.f32.mrf.mxu1 }
 0x134   : > { %4194 = vst [vmem:[#allocation14_spill] sm:$0xff] %v3540_v29 }
 0x135   : > { %v3546_v34 = vpop.f32.mrf.mxu0  ;;  %v3548_v39 = vpop.f32.mrf.mxu1 }
 0x137   : > { %v3550_v44 = vpop.f32.mrf.mxu0  ;;  %v3552_v45 = vpop.f32.mrf.mxu1 }
 0x138   : > { %4195 = vst [vmem:[#allocation15_spill] sm:$0xff] %v3550_v44 }
 0x139   : > { %v3554_v47 = vpop.f32.mrf.mxu0  ;;  %v3556_v52 = vpop.f32.mrf.mxu1 }
 0x13a   : > { %4196 = vst [vmem:[#allocation16_spill] sm:$0xff] %v3554_v47 }
 0x13b   : > { %v3560_v58 = vpop.f32.mrf.mxu0  ;;  %v3562_v13 = vpop.f32.mrf.mxu1 }
 0x13c   : > { %4197 = vst [vmem:[#allocation17_spill] sm:$0xff] %v3560_v58 }
 0x13d   : > { %v3564_v7 = vpop.f32.mrf.mxu0  ;;  %v3566_v0 = vpop.f32.mrf.mxu1 }
 0x13e   : > { %4198 = vst [vmem:[#allocation18_spill] sm:$0xff] %v3564_v7  ;;  %v3586_v7 = vpop.permute.xlu1 %1871  ;;  %s2825_s27 = spop %2824 }
 0x13f   : > { %v3568_v54 = vpop.f32.mrf.mxu0  ;;  %v3570_v36 = vpop.f32.mrf.mxu1  ;;  %4206 = vst [vmem:[#allocation26_spill] sm:$0xff] %v3586_v7 }
 0x140   : > { %4199 = vst [vmem:[#allocation19_spill] sm:$0xff] %v3568_v54 }
 0x141   : > { %v3574_v31 = vpop.f32.mrf.mxu0  ;;  %v3576_v43 = vpop.f32.mrf.mxu1 }
 0x142   : > { %4201 = vst [vmem:[#allocation21_spill] sm:$0xff] %v3574_v31  ;;  %4202 = vst [vmem:[#allocation22_spill] sm:$0xff] %v3576_v43  ;;  %v2647_v31 = vadd.f32 %v3484_v4, %v3480_v24  ;;  %v3613_v4 = vpop.permute.xlu1 %1876 }
 0x143   : > { %v3578_v29 = vpop.f32.mrf.mxu0  ;;  %v3580_v60 = vpop.f32.mrf.mxu1  ;;  %4210 = vst [vmem:[#allocation30_spill] sm:$0xff] %v3613_v4  ;;  %v2659_v4 = vadd.f32 %v2658_v5, %v3512_v2  ;;  %v2662_v5 = vadd.f32 %v3524_v14, %v3520_v10 }
 0x144   : > { %4203 = vst [vmem:[#allocation23_spill] sm:$0xff] %v3578_v29  ;;  %4204 = vst [vmem:[#allocation24_spill] sm:$0xff] %v3580_v60  ;;  %v3597_v29 = vld [vmem:[%s4159_s2] ss:$0 sm:$0xff] }
 0x145   : > { %v3582_v58 = vpop.f32.mrf.mxu0  ;;  %v3584_v47 = vpop.f32.mrf.mxu1  ;;  %v1247_v61 = vadd.f32 %v3444_v42, %v3597_v29  ;;  %v1239_v24 = vadd.f32 %v3436_v30, %v3597_v29  ;;  %v2644_v30 = vadd.f32 %v3476_v23, %v3474_v62  ;;  %v2653_v23 = vadd.f32 %v3498_v46, %v3496_v40 }
 0x146   : > { %4205 = vst [vmem:[#allocation25_spill] sm:$0xff] %v3582_v58 }
 0x147   : > { %v3588_v54 = vpop.f32.mrf.mxu0  ;;  %v3590_v51 = vpop.f32.mrf.mxu1  ;;  %v1408_v43 = vadd.f32 %v2647_v31, %v1247_v61  ;;  %v1242_v61 = vadd.f32 %v3440_v35, %v3597_v29 }
 0x148   : > { %4207 = vst [vmem:[#allocation27_spill] sm:$0xff] %v3588_v54  ;;  %v2641_v54 = vadd.f32 %v3470_v18, %v3468_v16  ;;  %v1250_v18 = vadd.f32 %v3448_v48, %v3597_v29 }
 0x149   : > { %v3599_v17 = vpop.f32.mrf.mxu0  ;;  %v3601_v58 = vpop.f32.mrf.mxu1  ;;  %v1403_v2 = vadd.f32 %v2644_v30, %v1242_v61  ;;  %v2656_v30 = vadd.f32 %v3506_v59, %v3502_v53 }
 0x14a   : > { %4208 = vst [vmem:[#allocation28_spill] sm:$0xff] %v3599_v17  ;;  %v2650_v17 = vadd.f32 %v3490_v33, %v3488_v21  ;;  %v1400_v31 = vadd.f32 %v2641_v54, %v1239_v24  ;;  %v3645_v54 = vpop.permute.xlu1 %1881 }
 0x14b   : > { %v3607_v7 = vpop.f32.mrf.mxu0  ;;  %v3609_v60 = vpop.f32.mrf.mxu1  ;;  %4212 = vst [vmem:[#allocation32_spill] sm:$0xff] %v3645_v54 }
 0x14c   : > { %4209 = vst [vmem:[#allocation29_spill] sm:$0xff] %v3607_v7  ;;  %v1411_v48 = vadd.f32 %v2650_v17, %v1250_v18  ;;  %v1266_v18 = vadd.f32 %v3464_v12, %v3597_v29  ;;  %v1258_v12 = vadd.f32 %v3456_v63, %v3597_v29  ;;  %v1279_v63 = vadd.f32 %v3486_v28, %v3597_v29 }
 0x14d   : > { %v3624_v42 = vpop.f32.mrf.mxu1  ;;  %v2777_v16 = vpop.f32.mrf.mxu0  ;;  %v1271_v28 = vadd.f32 %v3472_v19, %v3597_v29  ;;  %v2571_v19 = vadd.f32 %v3514_v3, %v3510_v1  ;;  %v1274_v1 = vadd.f32 %v3478_v41, %v3597_v29 }
 0x14e   : > { %4211 = vst [vmem:[#allocation31_spill] sm:$0xff] %v3624_v42  ;;  %v3630_v7 = vadd.f32 %v2777_v16, %v1408_v43  ;;  %v1263_v43 = vadd.f32 %v3460_v6, %v3597_v29  ;;  %v1255_v6 = vadd.f32 %v3452_v56, %v3597_v29  ;;  %v3659_v16 = vpop.permute.xlu0 %1826  ;;  %v1427_v59 = vadd.f32 %v2662_v5, %v1266_v18 }
 0x14f   : > { %v3632_v21 = vpop.f32.mrf.mxu1  ;;  %v1560_v33 = vpop.f32.mrf.mxu0  ;;  %v1295_v41 = vadd.f32 %v2571_v19, %v3597_v29 }
 0x150   : > { %1689 = vst [vmem:[%s3622_s20 + $0x10] sm:$0xff] %v3630_v7  ;;  %v3639_v42 = vadd.f32 %v1560_v33, %v1400_v31  ;;  %v1424_v46 = vadd.f32 %v2659_v4, %v1263_v43  ;;  %v1416_v4 = vadd.f32 %v2653_v23, %v1255_v6  ;;  %v1986_v43 = vmul.f32 %v3492_v37, %v3630_v7 }
 0x151   : > { %v3641_v44 = vpop.f32.mrf.mxu1  ;;  %v2778_v62 = vpop.f32.mrf.mxu0  ;;  %v1419_v6 = vadd.f32 %v2656_v30, %v1258_v12  ;;  %v2674_v30 = vadd.f32 %v3562_v13, %v3556_v52  ;;  %v2668_v13 = vadd.f32 %v3542_v32, %v3538_v15 }
 0x152   : > { %1687 = vst [vmem:[%s3622_s20] sm:$0xff] %v3639_v42  ;;  %v3651_v35 = vadd.f32 %v2778_v62, %v1411_v48  ;;  %v1984_v56 = vmul.f32 %v3659_v16, %v3639_v42  ;;  %v3683_v48 = vpop.permute.xlu1 %1886  ;;  %v2671_v62 = vadd.f32 %v3552_v45, %v3548_v39  ;;  %v3699_v39 = vpop.permute.xlu0 %1891 }
 0x153   : > { %v3655_v17 = vpop.f32.mrf.mxu1  ;;  %v1563_v24 = vpop.f32.mrf.mxu0  ;;  %4213 = vst [vmem:[#allocation33_spill] sm:$0xff] %v3683_v48 }
 0x154   : > { %1690 = vst [vmem:[%s3622_s20 + $0x18] sm:$0xff] %v3651_v35  ;;  %v3663_v40 = vadd.f32 %v1563_v24, %v1403_v2  ;;  %v1987_v45 = vmul.f32 %v3504_v57, %v3651_v35  ;;  %v1440_v12 = vadd.f32 %v2671_v62, %v1279_v63 }
 0x155   : > { %v3669_v10 = vpop.f32.mrf.mxu1  ;;  %v2781_v14 = vpop.f32.mrf.mxu0 }
 0x156   : > { %1688 = vst [vmem:[%s3622_s20 + $0x8] sm:$0xff] %v3663_v40  ;;  %v1985_v31 = vmul.f32 %v3482_v25, %v3663_v40  ;;  %v3677_v33 = vadd.f32 %v2781_v14, %v1424_v46  ;;  %v2665_v46 = vadd.f32 %v3534_v27, %v3528_v20 }
 0x157   : > { %v3681_v61 = vpop.f32.mrf.mxu1  ;;  %v1576_v53 = vpop.f32.mrf.mxu0 }
 0x158   : > { %v2016_v2 = vadd.f32 %v1985_v31, %v1984_v56  ;;  %1693 = vst [vmem:[%s3622_s20 + $0x30] sm:$0xff] %v3677_v33  ;;  %v3691_v23 = vadd.f32 %v1576_v53, %v1416_v4  ;;  %v1282_v53 = vadd.f32 %v3494_v38, %v3597_v29  ;;  %v1432_v38 = vadd.f32 %v2665_v46, %v1271_v28 }
 0x159   : > { %v3695_v24 = vpop.f32.mrf.mxu1  ;;  %v2782_v5 = vpop.f32.mrf.mxu0  ;;  %v2574_v28 = vadd.f32 %v3522_v11, %v3518_v9  ;;  %v2686_v9 = vadd.f32 %v3609_v60, %v3601_v58  ;;  %v4218_v58 = vld [vmem:[#allocation22_spill] sm:$0xff] }
 0x15a   : > { %v2017_v18 = vadd.f32 %v2016_v2, %v1986_v43  ;;  %1691 = vst [vmem:[%s3622_s20 + $0x20] sm:$0xff] %v3691_v23  ;;  %v3705_v14 = vadd.f32 %v2782_v5, %v1427_v59  ;;  %v1988_v27 = vmul.f32 %v3516_v8, %v3691_v23  ;;  %v3727_v43 = vpop.permute.xlu1 %1896  ;;  %v1443_v32 = vadd.f32 %v2674_v30, %v1282_v53  ;;  %v3739_v5 = vpop.permute.xlu0 %1901 }
 0x15b   : > { %v3711_v56 = vpop.f32.mrf.mxu1  ;;  %v1579_v20 = vpop.f32.mrf.mxu0  ;;  %4214 = vst [vmem:[#allocation34_spill] sm:$0xff] %v3727_v43  ;;  %v1287_v53 = vadd.f32 %v3500_v50, %v3597_v29  ;;  %v1298_v50 = vadd.f32 %v2574_v28, %v3597_v29  ;;  %v4222_v28 = vld [vmem:[#allocation10_spill] sm:$0xff] }
 0x15c   : > { %v2018_v31 = vadd.f32 %v2017_v18, %v1987_v45  ;;  %1694 = vst [vmem:[%s3622_s20 + $0x38] sm:$0xff] %v3705_v14  ;;  %v3717_v4 = vadd.f32 %v1579_v20, %v1419_v6  ;;  %v2683_v6 = vadd.f32 %v3590_v51, %v3584_v47  ;;  %v1990_v45 = vmul.f32 %v3544_v26, %v3677_v33 }
 0x15d   : > { %v3725_v52 = vpop.f32.mrf.mxu1  ;;  %v2785_v59 = vpop.f32.mrf.mxu0  ;;  %v2677_v51 = vadd.f32 %v3570_v36, %v3566_v0  ;;  %v1991_v47 = vmul.f32 %v3558_v55, %v3705_v14 }
 0x15e   : > { %v2019_v2 = vadd.f32 %v2018_v31, %v1988_v27  ;;  %1692 = vst [vmem:[%s3622_s20 + $0x28] sm:$0xff] %v3717_v4  ;;  %v1989_v62 = vmul.f32 %v3530_v22, %v3717_v4  ;;  %v3733_v63 = vadd.f32 %v2785_v59, %v1440_v12  ;;  %v1435_v27 = vadd.f32 %v2668_v13, %v1274_v1  ;;  %v3768_v13 = vpop.permute.xlu1 %1906 }
 0x15f   : > { %v3737_v3 = vpop.f32.mrf.mxu1  ;;  %v1592_v15 = vpop.f32.mrf.mxu0  ;;  %4216 = vst [vmem:[#allocation36_spill] sm:$0xff] %v3768_v13 }
 0x160   : > { %v2020_v18 = vadd.f32 %v2019_v2, %v1989_v62  ;;  %1697 = vst [vmem:[%s3622_s20 + $0x50] sm:$0xff] %v3733_v63  ;;  %v3747_v46 = vadd.f32 %v1592_v15, %v1432_v38  ;;  %v1456_v2 = vadd.f32 %v2683_v6, %v1295_v41  ;;  %v4217_v62 = vld [vmem:[#allocation15_spill] sm:$0xff]  ;;  %v4219_v38 = vld [vmem:[#allocation24_spill] sm:$0xff]  ;;  %v1448_v41 = vadd.f32 %v2677_v51, %v1287_v53 }
 0x161   : > { %v3752_v30 = vpop.f32.mrf.mxu1  ;;  %v2786_v20 = vpop.f32.mrf.mxu0  ;;  %v2583_v60 = vadd.f32 %v4217_v62, %v3546_v34  ;;  %v2680_v1 = vadd.f32 %v4219_v38, %v4218_v58  ;;  %v1290_v34 = vadd.f32 %v4222_v28, %v3597_v29  ;;  %v1459_v38 = vadd.f32 %v2686_v9, %v1298_v50 }
 0x162   : > { %v2021_v31 = vadd.f32 %v2020_v18, %v1990_v45  ;;  %1695 = vst [vmem:[%s3622_s20 + $0x40] sm:$0xff] %v3747_v46  ;;  %v3760_v12 = vadd.f32 %v2786_v20, %v1443_v32  ;;  %v1992_v36 = vmul.f32 %v3572_v49, %v3747_v46  ;;  %v3781_v45 = vpop.permute.xlu0 %1911  ;;  %v4221_v20 = vld [vmem:[#allocation26_spill] sm:$0xff]  ;;  %v3804_v50 = vpop.permute.xlu1 %1916 }
 0x163   : > { %v3766_v11 = vpop.f32.mrf.mxu1  ;;  %v1595_v19 = vpop.f32.mrf.mxu0  ;;  %4220 = vst [vmem:[#allocation15_spill] sm:$0xff] %v3781_v45  ;;  %v1311_v53 = vadd.f32 %v2583_v60, %v3597_v29  ;;  %v1451_v9 = vadd.f32 %v2680_v1, %v1290_v34  ;;  %4228 = vst [vmem:[#allocation22_spill] sm:$0xff] %v3804_v50  ;;  %v2698_v1 = vadd.f32 %v3711_v56, %v3695_v24 }
 0x164   : > { %4215 = vst [vmem:[#allocation35_spill] sm:$0xff] %v3760_v12  ;;  %v2022_v0 = vadd.f32 %v2021_v31, %v1991_v47  ;;  %1698 = vst [vmem:[%s3622_s20 + $0x58] sm:$0xff] %v3760_v12  ;;  %v3774_v59 = vadd.f32 %v1595_v19, %v1435_v27  ;;  %v4223_v47 = vld [vmem:[#allocation11_spill] sm:$0xff]  ;;  %v4224_v31 = vld [vmem:[#allocation12_spill] sm:$0xff]  ;;  %v2692_v24 = vadd.f32 %v3655_v17, %v3641_v44 }
 0x165   : > { %v2705_v15 = vpop.f32.mrf.mxu1  ;;  %v2789_v32 = vpop.f32.mrf.mxu0  ;;  %v2577_v19 = vadd.f32 %v4224_v31, %v4223_v47 }
 0x166   : > { %v2023_v18 = vadd.f32 %v2022_v0, %v1992_v36  ;;  %1696 = vst [vmem:[%s3622_s20 + $0x48] sm:$0xff] %v3774_v59  ;;  %v1993_v27 = vmul.f32 %v4221_v20, %v3774_v59  ;;  %v3787_v6 = vadd.f32 %v2789_v32, %v1456_v2  ;;  %v2695_v36 = vadd.f32 %v3681_v61, %v3669_v10  ;;  %v4225_v0 = vld [vmem:[#allocation30_spill] sm:$0xff]  ;;  %v4226_v2 = vld [vmem:[#allocation16_spill] sm:$0xff]  ;;  %v4227_v32 = vld [vmem:[#allocation17_spill] sm:$0xff] }
 0x167   : > { %v2706_v62 = vpop.f32.mrf.mxu1  ;;  %v1608_v58 = vpop.f32.mrf.mxu0  ;;  %v1994_v49 = vmul.f32 %v4225_v0, %v3733_v63  ;;  %v2586_v28 = vadd.f32 %v4227_v32, %v4226_v2  ;;  %v4229_v10 = vld [vmem:[#allocation31_spill] sm:$0xff]  ;;  %v1303_v60 = vadd.f32 %v2577_v19, %v3597_v29  ;;  %v4231_v2 = vld [vmem:[#allocation14_spill] sm:$0xff] }
 0x168   : > { %v2024_v20 = vadd.f32 %v2023_v18, %v1993_v27  ;;  %1701 = vst [vmem:[%s3622_s20 + $0x70] sm:$0xff] %v3787_v6  ;;  %v3799_v51 = vadd.f32 %v1608_v58, %v1448_v41  ;;  %v2689_v61 = vadd.f32 %v3632_v21, %v4229_v10  ;;  %v1995_v18 = vmul.f32 %v3645_v54, %v3760_v12  ;;  %v4230_v58 = vld [vmem:[#allocation13_spill] sm:$0xff]  ;;  %v3819_v21 = vpop.permute.xlu0 %1921 }
 0x169   : > { %v2708_v47 = vpop.f32.mrf.mxu1  ;;  %v2790_v31 = vpop.f32.mrf.mxu0  ;;  %v2580_v32 = vadd.f32 %v4231_v2, %v4230_v58  ;;  %4232 = vst [vmem:[#allocation24_spill] sm:$0xff] %v3819_v21  ;;  %v1472_v19 = vadd.f32 %v2695_v36, %v1311_v53  ;;  %v4233_v10 = vld [vmem:[#allocation25_spill] sm:$0xff]  ;;  %v4234_v58 = vld [vmem:[#allocation27_spill] sm:$0xff] }
 0x16a   : > { %v2025_v27 = vadd.f32 %v2024_v20, %v1994_v49  ;;  %1699 = vst [vmem:[%s3622_s20 + $0x60] sm:$0xff] %v3799_v51  ;;  %v3812_v41 = vadd.f32 %v2790_v31, %v1459_v38  ;;  %v1996_v49 = vmul.f32 %v3683_v48, %v3799_v51  ;;  %v1314_v31 = vadd.f32 %v2586_v28, %v3597_v29  ;;  %v4235_v28 = vld [vmem:[#allocation18_spill] sm:$0xff] }
 0x16b   : > { %v2709_v34 = vpop.f32.mrf.mxu1  ;;  %v1611_v0 = vpop.f32.mrf.mxu0  ;;  %v2595_v2 = vadd.f32 %v4234_v58, %v4233_v10  ;;  %v1464_v36 = vadd.f32 %v2689_v61, %v1303_v60  ;;  %v1306_v53 = vadd.f32 %v2580_v32, %v3597_v29  ;;  %v4238_v60 = vld [vmem:[#allocation28_spill] sm:$0xff]  ;;  %v4239_v32 = vld [vmem:[#allocation29_spill] sm:$0xff] }
 0x16c   : > { %v2026_v20 = vadd.f32 %v2025_v27, %v1995_v18  ;;  %1702 = vst [vmem:[%s3622_s20 + $0x78] sm:$0xff] %v3812_v41  ;;  %v3825_v38 = vadd.f32 %v1611_v0, %v1451_v9  ;;  %v4236_v18 = vld [vmem:[#allocation19_spill] sm:$0xff]  ;;  %v1475_v17 = vadd.f32 %v2698_v1, %v1314_v31  ;;  %v3843_v58 = vpop.permute.xlu1 %1926 }
 0x16d   : > { %v3832_v56 = vpop.f32.mrf.mxu1  ;;  %v2793_v54 = vpop.f32.mrf.mxu0  ;;  %v2589_v27 = vadd.f32 %v4236_v18, %v4235_v28  ;;  %4237 = vst [vmem:[#allocation10_spill] sm:$0xff] %v3843_v58  ;;  %v1327_v61 = vadd.f32 %v2595_v2, %v3597_v29  ;;  %v1467_v31 = vadd.f32 %v2692_v24, %v1306_v53  ;;  %v2710_v24 = vadd.f32 %v2709_v34, %v2708_v47 }
 0x16e   : > { %v2027_v12 = vadd.f32 %v2026_v20, %v1996_v49  ;;  %1700 = vst [vmem:[%s3622_s20 + $0x68] sm:$0xff] %v3825_v38  ;;  %v1997_v0 = vmul.f32 %v3699_v39, %v3825_v38  ;;  %v3838_v9 = vadd.f32 %v2793_v54, %v1472_v19  ;;  %v1998_v49 = vmul.f32 %v3727_v43, %v3787_v6  ;;  %v3854_v18 = vpop.permute.xlu0 %1931 }
 0x16f   : > { %v2712_v10 = vpop.f32.mrf.mxu1  ;;  %v1624_v44 = vpop.f32.mrf.mxu0  ;;  %v2707_v20 = vadd.f32 %v2706_v62, %v2705_v15  ;;  %v2598_v19 = vadd.f32 %v4239_v32, %v4238_v60  ;;  %4240 = vst [vmem:[#allocation11_spill] sm:$0xff] %v3854_v18  ;;  %v2701_v43 = vadd.f32 %v3737_v3, %v3725_v52  ;;  %v1319_v2 = vadd.f32 %v2589_v27, %v3597_v29 }
 0x170   : > { %v2028_v48 = vadd.f32 %v2027_v12, %v1997_v0  ;;  %1705 = vst [vmem:[%s3622_s20 + $0x90] sm:$0xff] %v3838_v9  ;;  %v3849_v54 = vadd.f32 %v1624_v44, %v1464_v36  ;;  %v1999_v12 = vmul.f32 %v3739_v5, %v3812_v41  ;;  %v4241_v0 = vld [vmem:[#allocation21_spill] sm:$0xff]  ;;  %v4242_v36 = vld [vmem:[#allocation23_spill] sm:$0xff]  ;;  %v2704_v27 = vadd.f32 %v3766_v11, %v3752_v30  ;;  %v3876_v47 = vpop.permute.xlu1 %1936 }
 0x171   : > { %v2714_v28 = vpop.f32.mrf.mxu1  ;;  %v2794_v1 = vpop.f32.mrf.mxu0  ;;  %v2592_v44 = vadd.f32 %v4242_v36, %v4241_v0  ;;  %4243 = vst [vmem:[#allocation12_spill] sm:$0xff] %v3876_v47  ;;  %v2002_v0 = vmul.f32 %v3804_v50, %v3838_v9 }
 0x172   : > { %v2029_v15 = vadd.f32 %v2028_v48, %v1998_v49  ;;  %1703 = vst [vmem:[%s3622_s20 + $0x80] sm:$0xff] %v3849_v54  ;;  %v3862_v62 = vadd.f32 %v2794_v1, %v1475_v17  ;;  %v2000_v52 = vmul.f32 %v3768_v13, %v3849_v54  ;;  %v1488_v49 = vadd.f32 %v2707_v20, %v1327_v61  ;;  %v3885_v11 = vpop.permute.xlu0 %1941 }
 0x173   : > { %v2715_v53 = vpop.f32.mrf.mxu1  ;;  %v1627_v60 = vpop.f32.mrf.mxu0  ;;  %v1330_v17 = vadd.f32 %v2598_v19, %v3597_v29  ;;  %v1322_v20 = vadd.f32 %v2592_v44, %v3597_v29  ;;  %4244 = vst [vmem:[#allocation16_spill] sm:$0xff] %v3885_v11 }
 0x174   : > { %v2030_v3 = vadd.f32 %v2029_v15, %v1999_v12  ;;  %1706 = vst [vmem:[%s3622_s20 + $0x98] sm:$0xff] %v3862_v62  ;;  %v3871_v48 = vadd.f32 %v1627_v60, %v1467_v31  ;;  %v1480_v31 = vadd.f32 %v2701_v43, %v1319_v2 }
 0x175   : > { %v2717_v32 = vpop.f32.mrf.mxu1  ;;  %v2797_v1 = vpop.f32.mrf.mxu0  ;;  %v1491_v30 = vadd.f32 %v2710_v24, %v1330_v17  ;;  %v2713_v24 = vadd.f32 %v2712_v10, %v3832_v56  ;;  %v2003_v17 = vmul.f32 %v3819_v21, %v3862_v62 }
 0x176   : > { %v2031_v34 = vadd.f32 %v2030_v3, %v2000_v52  ;;  %1704 = vst [vmem:[%s3622_s20 + $0x88] sm:$0xff] %v3871_v48  ;;  %v2001_v12 = vmul.f32 %v3781_v45, %v3871_v48  ;;  %v3882_v15 = vadd.f32 %v2797_v1, %v1488_v49  ;;  %v4245_v3 = vld [vmem:[#allocation4_spill] sm:$0xff]  ;;  %v1483_v49 = vadd.f32 %v2704_v27, %v1322_v20  ;;  %v3906_v27 = vpop.permute.xlu1 %1946  ;;  %v3914_v21 = vpop.permute.xlu0 %1951 }
 0x177   : > { %v2718_v61 = vpop.f32.mrf.mxu1  ;;  %v1640_v19 = vpop.f32.mrf.mxu0  ;;  %v1343_v43 = vadd.f32 %v4245_v3, %v3597_v29  ;;  %4247 = vst [vmem:[#allocation17_spill] sm:$0xff] %v3906_v27  ;;  %v2716_v3 = vadd.f32 %v2715_v53, %v2714_v28  ;;  %4249 = vst [vmem:[#allocation31_spill] sm:$0xff] %v3914_v21 }
 0x178   : > { %v2032_v36 = vadd.f32 %v2031_v34, %v2001_v12  ;;  %1709 = vst [vmem:[%s3622_s20 + $0xb0] sm:$0xff] %v3882_v15  ;;  %v2719_v60 = vadd.f32 %v2718_v61, %v2717_v32  ;;  %v3891_v52 = vadd.f32 %v1640_v19, %v1480_v31  ;;  %v4246_v32 = vld [vmem:[#allocation2_spill] sm:$0xff]  ;;  %v2006_v28 = vmul.f32 %v3876_v47, %v3882_v15 }
 0x179   : > { %v2720_v2 = vpop.f32.mrf.mxu1  ;;  %v2798_v44 = vpop.f32.mrf.mxu0  ;;  %v1335_v12 = vadd.f32 %v4246_v32, %v3597_v29 }
 0x17a   : > { %v2033_v1 = vadd.f32 %v2032_v36, %v2002_v0  ;;  %1707 = vst [vmem:[%s3622_s20 + $0xa0] sm:$0xff] %v3891_v52  ;;  %v3900_v34 = vadd.f32 %v2798_v44, %v1491_v30  ;;  %v2004_v31 = vmul.f32 %v3843_v58, %v3891_v52  ;;  %v1504_v0 = vadd.f32 %v2719_v60, %v1343_v43  ;;  %v4248_v30 = vld [vmem:[#allocation5_spill] sm:$0xff]  ;;  %v4250_v60 = vld [vmem:[#allocation3_spill] sm:$0xff] }
 0x17b   : > { %v2721_v61 = vpop.f32.mrf.mxu1  ;;  %v1643_v19 = vpop.f32.mrf.mxu0  ;;  %v1346_v36 = vadd.f32 %v4248_v30, %v3597_v29  ;;  %v1338_v43 = vadd.f32 %v4250_v60, %v3597_v29 }
 0x17c   : > { %v2034_v56 = vadd.f32 %v2033_v1, %v2003_v17  ;;  %1710 = vst [vmem:[%s3622_s20 + $0xb8] sm:$0xff] %v3900_v34  ;;  %v2722_v10 = vadd.f32 %v2721_v61, %v2720_v2  ;;  %v3910_v20 = vadd.f32 %v1643_v19, %v1483_v49  ;;  %v1496_v2 = vadd.f32 %v2713_v24, %v1335_v12  ;;  %v3930_v24 = vpop.permute.xlu1 %1956 }
 0x17d   : > { %v2723_v44 = vpop.f32.mrf.mxu1  ;;  %v2801_v32 = vpop.f32.mrf.mxu0  ;;  %v1499_v30 = vadd.f32 %v2716_v3, %v1338_v43  ;;  %4251 = vst [vmem:[#allocation13_spill] sm:$0xff] %v3930_v24  ;;  %v2007_v12 = vmul.f32 %v3885_v11, %v3900_v34  ;;  %v4253_v11 = vld [vmem:[#allocation7_spill] sm:$0xff] }
 0x17e   : > { %v2035_v58 = vadd.f32 %v2034_v56, %v2004_v31  ;;  %1708 = vst [vmem:[%s3622_s20 + $0xa8] sm:$0xff] %v3910_v20  ;;  %v2005_v17 = vmul.f32 %v3854_v18, %v3910_v20  ;;  %v3920_v1 = vadd.f32 %v2801_v32, %v1504_v0  ;;  %v1507_v19 = vadd.f32 %v2722_v10, %v1346_v36  ;;  %v4252_v10 = vld [vmem:[#allocation6_spill] sm:$0xff] }
 0x17f   : > { %v2724_v49 = vpop.f32.mrf.mxu1  ;;  %v1656_v61 = vpop.f32.mrf.mxu0  ;;  %v1351_v36 = vadd.f32 %v4252_v10, %v3597_v29  ;;  %v1354_v47 = vadd.f32 %v4253_v11, %v3597_v29 }
 0x180   : > { %v2036_v53 = vadd.f32 %v2035_v58, %v2005_v17  ;;  %1713 = vst [vmem:[%s3622_s20 + $0xd0] sm:$0xff] %v3920_v1  ;;  %v3928_v31 = vadd.f32 %v1656_v61, %v1496_v2  ;;  %v2725_v60 = vadd.f32 %v2724_v49, %v2723_v44  ;;  %v3940_v61 = vpop.permute.xlu0 %1961 }
 0x181   : > { %v2726_v56 = vpop.f32.mrf.mxu1  ;;  %v2802_v0 = vpop.f32.mrf.mxu0 }
 0x182   : > { %v2037_v32 = vadd.f32 %v2036_v53, %v2006_v28  ;;  %1711 = vst [vmem:[%s3622_s20 + $0xc0] sm:$0xff] %v3928_v31  ;;  %v3936_v58 = vadd.f32 %v2802_v0, %v1507_v19  ;;  %v2008_v3 = vmul.f32 %v3906_v27, %v3928_v31  ;;  %v1512_v10 = vadd.f32 %v2725_v60, %v1351_v36 }
 0x183   : > { %v2727_v17 = vpop.f32.mrf.mxu1  ;;  %v1659_v2 = vpop.f32.mrf.mxu0 }
 0x184   : > { %v2038_v43 = vadd.f32 %v2037_v32, %v2007_v12  ;;  %1714 = vst [vmem:[%s3622_s20 + $0xd8] sm:$0xff] %v3936_v58  ;;  %v3946_v28 = vadd.f32 %v1659_v2, %v1499_v30  ;;  %v2728_v19 = vadd.f32 %v2727_v17, %v2726_v56  ;;  %v4254_v12 = vld [vmem:[#allocation8_spill] sm:$0xff]  ;;  %v3956_v2 = vpop.permute.xlu1 %1966  ;;  %v2010_v56 = vmul.f32 %v3930_v24, %v3920_v1  ;;  %v3962_v36 = vpop.permute.xlu0 %1971  ;;  %v4255_v24 = vld [vmem:[#allocation9_spill] sm:$0xff] }
 0x185   : > { %v2729_v44 = vpop.f32.mrf.mxu1  ;;  %v2805_v49 = vpop.f32.mrf.mxu0  ;;  %v1359_v32 = vadd.f32 %v4254_v12, %v3597_v29  ;;  %v2011_v11 = vmul.f32 %v3940_v61, %v3936_v58 }
 0x186   : > { %v2039_v53 = vadd.f32 %v2038_v43, %v2008_v3  ;;  %1712 = vst [vmem:[%s3622_s20 + $0xc8] sm:$0xff] %v3946_v28  ;;  %v2009_v0 = vmul.f32 %v3914_v21, %v3946_v28  ;;  %v1515_v50 = vadd.f32 %v2728_v19, %v1354_v47 }
 0x187   : > { %v2730_v27 = vpop.f32.mrf.mxu1  ;;  %v1672_v30 = vpop.f32.mrf.mxu0 }
 0x188   : > { %v2040_v17 = vadd.f32 %v2039_v53, %v2009_v0  ;;  %v2731_v3 = vadd.f32 %v2730_v27, %v2729_v44  ;;  %v3960_v43 = vadd.f32 %v1672_v30, %v1512_v10  ;;  %v1362_v53 = vadd.f32 %v4255_v24, %v3597_v29  ;;  %v1977_v47 = vpop.permute.xlu1 %1976 }
 0x189   : > { %v2732_v21 = vpop.f32.mrf.mxu1  ;;  %v2806_v60 = vpop.f32.mrf.mxu0 }
 0x18a   : > { %v2041_v12 = vadd.f32 %v2040_v17, %v2010_v56  ;;  %v1520_v18 = vadd.f32 %v2731_v3, %v1359_v32  ;;  %1715 = vst [vmem:[%s3622_s20 + $0xe0] sm:$0xff] %v3960_v43  ;;  %v2012_v27 = vmul.f32 %v3956_v2, %v3960_v43  ;;  %v2053_v17 = vstv %s2825_s27 }
 0x18b   : > { %v2733_v44 = vpop.f32.mrf.mxu1  ;;  %v1675_v0 = vpop.f32.mrf.mxu0  ;;  %3005 = vrcp.f32 %v2053_v17 }
 0x18c   : > { %v1681_v10 = vadd.f32 %v2805_v49, %v1520_v18  ;;  %v2042_v30 = vadd.f32 %v2041_v12, %v2011_v11  ;;  %v2734_v45 = vadd.f32 %v2733_v44, %v2732_v21  ;;  %v3972_v13 = vadd.f32 %v1675_v0, %v1515_v50  ;;  %v1982_v49 = vpop.permute.xlu0 %1981 }
 0x18e   : > { %1717 = vst [vmem:[%s3622_s20 + $0xf0] sm:$0xff] %v1681_v10  ;;  %v2043_v32 = vadd.f32 %v2042_v30, %v2012_v27  ;;  %v1523_v56 = vadd.f32 %v2734_v45, %v1362_v53  ;;  %1716 = vst [vmem:[%s3622_s20 + $0xe8] sm:$0xff] %v3972_v13  ;;  %v2013_v29 = vmul.f32 %v3962_v36, %v3972_v13 }
 0x18f   : > { %v2014_v24 = vmul.f32 %v1977_v47, %v1681_v10 }
 0x190   : > { %v1684_v19 = vadd.f32 %v2806_v60, %v1523_v56  ;;  %v2044_v18 = vadd.f32 %v2043_v32, %v2013_v29 }
 0x192   : > { %1718 = vst [vmem:[%s3622_s20 + $0xf8] sm:$0xff] %v1684_v19  ;;  %v2015_v50 = vmul.f32 %v1982_v49, %v1684_v19  ;;  %v2045_v21 = vadd.f32 %v2044_v18, %v2014_v24 }
 0x194   : > { %v2046_v3 = vadd.f32 %v2045_v21, %v2015_v50 }
 0x196   : > { %v2047_v11 = vrot.slane %v2046_v3, 4 }
 0x198   : > { %v2048_v45 = vadd.f32 %v2047_v11, %v2046_v3  ;;  %v3006_v44 = vpop.eup %3005 }
 0x19a   : > { %v2049_v12 = vrot.slane %v2048_v45, 2 }
 0x19c   : > { %v2050_v53 = vadd.f32 %v2049_v12, %v2048_v45 }
 0x19e   : > { %v2051_v27 = vrot.slane %v2050_v53, 1 }
 0x1a0   : > { %v2052_v60 = vadd.f32 %v2051_v27, %v2050_v53 }
 0x1a2   : > { %v3988_v0 = vmul.f32 %v3006_v44, %v2052_v60  ;;  %2189 = vst [vmem:[%s357_s29] sm:$0x1] %v2052_v60 }
 0x1a4   : > { %v2065_v30 = vsub.f32 %v3774_v59, %v3988_v0  ;;  %v2068_v32 = vsub.f32 %v3799_v51, %v3988_v0  ;;  %v2069_v56 = vsub.f32 %v3825_v38, %v3988_v0  ;;  %v2070_v29 = vsub.f32 %v3787_v6, %v3988_v0 }
 0x1a5   : > { %v2071_v24 = vsub.f32 %v3812_v41, %v3988_v0  ;;  %v2072_v18 = vsub.f32 %v3849_v54, %v3988_v0  ;;  %v2073_v17 = vsub.f32 %v3871_v48, %v3988_v0  ;;  %v2074_v59 = vsub.f32 %v3838_v9, %v3988_v0 }
 0x1a6   : > { %v2075_v50 = vsub.f32 %v3862_v62, %v3988_v0  ;;  %v2086_v45 = vsub.f32 %v1681_v10, %v3988_v0  ;;  %v2087_v3 = vsub.f32 %v1684_v19, %v3988_v0  ;;  %v2056_v12 = vsub.f32 %v3639_v42, %v3988_v0 }
 0x1a7   : > { %v2057_v53 = vsub.f32 %v3663_v40, %v3988_v0  ;;  %v2058_v44 = vsub.f32 %v3630_v7, %v3988_v0  ;;  %v2059_v10 = vsub.f32 %v3651_v35, %v3988_v0  ;;  %v2060_v42 = vsub.f32 %v3691_v23, %v3988_v0 }
 0x1a8   : > { %v4034_v27 = vmul.f32 %v2086_v45, %v1977_v47  ;;  %v4036_v21 = vmul.f32 %v2087_v3, %v1982_v49  ;;  %v2088_v60 = vmul.f32 %v2056_v12, %v3659_v16  ;;  %v2061_v49 = vsub.f32 %v3717_v4, %v3988_v0 }
 0x1a9   : > { %v2089_v11 = vmul.f32 %v2057_v53, %v3482_v25  ;;  %v2090_v19 = vmul.f32 %v2058_v44, %v3492_v37  ;;  %v2091_v3 = vmul.f32 %v2059_v10, %v3504_v57  ;;  %v2062_v7 = vsub.f32 %v3677_v33, %v3988_v0  ;;  %v4256_v10 = vld [vmem:[#allocation20_spill] sm:$0xff] }
 0x1aa   : > { %v2120_v40 = vmul.f32 %v2088_v60, %v2088_v60  ;;  %v2092_v25 = vmul.f32 %v2060_v42, %v3516_v8  ;;  %v2063_v35 = vsub.f32 %v3705_v14, %v3988_v0  ;;  %v2093_v23 = vmul.f32 %v2061_v49, %v3530_v22 }
 0x1ab   : > { %v2121_v47 = vmul.f32 %v2089_v11, %v2089_v11  ;;  %v2122_v16 = vmul.f32 %v2090_v19, %v2090_v19  ;;  %v2123_v37 = vmul.f32 %v2091_v3, %v2091_v3  ;;  %v2064_v11 = vsub.f32 %v3747_v46, %v3988_v0  ;;  %v4257_v19 = vld [vmem:[#allocation35_spill] sm:$0xff]  ;;  %v4259_v3 = vld [vmem:[#allocation30_spill] sm:$0xff] }
 0x1ac   : > { %v2094_v4 = vmul.f32 %v2062_v7, %v3544_v26  ;;  %v2124_v57 = vmul.f32 %v2092_v25, %v2092_v25  ;;  %v2095_v33 = vmul.f32 %v2063_v35, %v3558_v55  ;;  %v2125_v60 = vmul.f32 %v2093_v23, %v2093_v23 }
 0x1ad   : > { %v2152_v45 = vadd.f32 %v2121_v47, %v2120_v40  ;;  %v2066_v44 = vsub.f32 %v3733_v63, %v3988_v0  ;;  %v2096_v14 = vmul.f32 %v2064_v11, %v4256_v10  ;;  %v2067_v40 = vsub.f32 %v4257_v19, %v3988_v0  ;;  %v4258_v47 = vld [vmem:[#allocation26_spill] sm:$0xff]  ;;  %v4261_v63 = vld [vmem:[#allocation33_spill] sm:$0xff]  ;;  %v4263_v10 = vld [vmem:[#allocation36_spill] sm:$0xff] }
 0x1ae   : > { %v2126_v42 = vmul.f32 %v2094_v4, %v2094_v4  ;;  %v2097_v46 = vmul.f32 %v2065_v30, %v4258_v47  ;;  %v2127_v49 = vmul.f32 %v2095_v33, %v2095_v33  ;;  %v2101_v30 = vmul.f32 %v2069_v56, %v3699_v39  ;;  %v4266_v19 = vld [vmem:[#allocation24_spill] sm:$0xff]  ;;  %v4267_v47 = vld [vmem:[#allocation10_spill] sm:$0xff] }
 0x1af   : > { %v2153_v12 = vadd.f32 %v2152_v45, %v2122_v16  ;;  %v2098_v7 = vmul.f32 %v2066_v44, %v4259_v3  ;;  %v2128_v25 = vmul.f32 %v2096_v14, %v2096_v14  ;;  %v4260_v16 = vld [vmem:[#allocation32_spill] sm:$0xff]  ;;  %v2103_v51 = vmul.f32 %v2071_v24, %v3739_v5  ;;  %v4264_v14 = vld [vmem:[#allocation15_spill] sm:$0xff] }
 0x1b0   : > { %v2099_v45 = vmul.f32 %v2067_v40, %v4260_v16  ;;  %v2129_v35 = vmul.f32 %v2097_v46, %v2097_v46  ;;  %v2104_v39 = vmul.f32 %v2072_v18, %v4263_v10  ;;  %v2105_v6 = vmul.f32 %v2073_v17, %v4264_v14 }
 0x1b1   : > { %v2154_v53 = vadd.f32 %v2153_v12, %v2123_v37  ;;  %v2100_v37 = vmul.f32 %v2068_v32, %v4261_v63  ;;  %v2130_v12 = vmul.f32 %v2098_v7, %v2098_v7  ;;  %v2133_v32 = vmul.f32 %v2101_v30, %v2101_v30 }
 0x1b2   : > { %v2131_v4 = vmul.f32 %v2099_v45, %v2099_v45  ;;  %v2136_v41 = vmul.f32 %v2104_v39, %v2104_v39  ;;  %v2107_v54 = vmul.f32 %v2075_v50, %v4266_v19  ;;  %v2137_v18 = vmul.f32 %v2105_v6, %v2105_v6  ;;  %v4273_v45 = vld [vmem:[#allocation16_spill] sm:$0xff] }
 0x1b3   : > { %v2155_v8 = vadd.f32 %v2154_v53, %v2124_v57  ;;  %v4262_v53 = vld [vmem:[#allocation34_spill] sm:$0xff]  ;;  %v4268_v48 = vsub.f32 %v3891_v52, %v3988_v0  ;;  %v4270_v9 = vsub.f32 %v3910_v20, %v3988_v0  ;;  %v4272_v62 = vsub.f32 %v3882_v15, %v3988_v0 }
 0x1b4   : > { %v2102_v33 = vmul.f32 %v2070_v29, %v4262_v53  ;;  %v2135_v29 = vmul.f32 %v2103_v51, %v2103_v51  ;;  %v2139_v3 = vmul.f32 %v2107_v54, %v2107_v54  ;;  %v4274_v52 = vsub.f32 %v3900_v34, %v3988_v0 }
 0x1b5   : > { %v2156_v22 = vadd.f32 %v2155_v8, %v2125_v60  ;;  %v2132_v60 = vmul.f32 %v2100_v37, %v2100_v37  ;;  %v2108_v17 = vmul.f32 %v4268_v48, %v4267_v47  ;;  %v4275_v37 = vld [vmem:[#allocation17_spill] sm:$0xff]  ;;  %v4276_v20 = vsub.f32 %v3928_v31, %v3988_v0 }
 0x1b6   : > { %v2134_v38 = vmul.f32 %v2102_v33, %v2102_v33  ;;  %v4278_v15 = vsub.f32 %v3946_v28, %v3988_v0  ;;  %v4280_v34 = vsub.f32 %v3920_v1, %v3988_v0  ;;  %v4281_v31 = vsub.f32 %v3936_v58, %v3988_v0 }
 0x1b7   : > { %v2157_v26 = vadd.f32 %v2156_v22, %v2126_v42  ;;  %v4265_v22 = vld [vmem:[#allocation22_spill] sm:$0xff]  ;;  %v4282_v28 = vsub.f32 %v3960_v43, %v3988_v0  ;;  %v4283_v1 = vsub.f32 %v3972_v13, %v3988_v0 }
 0x1b8   : > { %v2106_v5 = vmul.f32 %v2074_v59, %v4265_v22 }
 0x1b9   : > { %v2158_v55 = vadd.f32 %v2157_v26, %v2127_v49  ;;  %v4269_v26 = vld [vmem:[#allocation11_spill] sm:$0xff]  ;;  %v2117_v6 = vmul.f32 %v4283_v1, %v3962_v36 }
 0x1ba   : > { %v2138_v46 = vmul.f32 %v2106_v5, %v2106_v5  ;;  %v2109_v59 = vmul.f32 %v4270_v9, %v4269_v26 }
 0x1bb   : > { %v2159_v23 = vadd.f32 %v2158_v55, %v2128_v25  ;;  %v4271_v25 = vld [vmem:[#allocation12_spill] sm:$0xff]  ;;  %v2140_v55 = vmul.f32 %v2108_v17, %v2108_v17 }
 0x1bc   : > { %v2110_v50 = vmul.f32 %v4272_v62, %v4271_v25 }
 0x1bd   : > { %v2160_v11 = vadd.f32 %v2159_v23, %v2129_v35  ;;  %v2111_v35 = vmul.f32 %v4274_v52, %v4273_v45  ;;  %v2141_v23 = vmul.f32 %v2109_v59, %v2109_v59 }
 0x1bf   : > { %v2161_v57 = vadd.f32 %v2160_v11, %v2130_v12  ;;  %v2112_v12 = vmul.f32 %v4276_v20, %v4275_v37  ;;  %v2142_v11 = vmul.f32 %v2110_v50, %v2110_v50  ;;  %v2143_v53 = vmul.f32 %v2111_v35, %v2111_v35 }
 0x1c1   : > { %v2162_v8 = vadd.f32 %v2161_v57, %v2131_v4  ;;  %v4277_v4 = vld [vmem:[#allocation31_spill] sm:$0xff]  ;;  %v2144_v51 = vmul.f32 %v2112_v12, %v2112_v12 }
 0x1c2   : > { %v2113_v57 = vmul.f32 %v4278_v15, %v4277_v4 }
 0x1c3   : > { %v2163_v44 = vadd.f32 %v2162_v8, %v2132_v60  ;;  %v4279_v60 = vld [vmem:[#allocation13_spill] sm:$0xff] }
 0x1c4   : > { %v2114_v8 = vmul.f32 %v4280_v34, %v4279_v60  ;;  %v2145_v10 = vmul.f32 %v2113_v57, %v2113_v57 }
 0x1c5   : > { %v2164_v56 = vadd.f32 %v2163_v44, %v2133_v32  ;;  %v2115_v44 = vmul.f32 %v4281_v31, %v3940_v61  ;;  %v2149_v61 = vmul.f32 %v2117_v6, %v2117_v6 }
 0x1c7   : > { %v2165_v42 = vadd.f32 %v2164_v56, %v2134_v38  ;;  %v2116_v38 = vmul.f32 %v4282_v28, %v3956_v2  ;;  %v2146_v56 = vmul.f32 %v2114_v8, %v2114_v8  ;;  %v2151_v2 = vmul.f32 %v4036_v21, %v4036_v21 }
 0x1c9   : > { %v2166_v24 = vadd.f32 %v2165_v42, %v2135_v29  ;;  %v2147_v29 = vmul.f32 %v2115_v44, %v2115_v44  ;;  %v2148_v22 = vmul.f32 %v2116_v38, %v2116_v38 }
 0x1cb   : > { %v2167_v40 = vadd.f32 %v2166_v24, %v2136_v41  ;;  %v2150_v41 = vmul.f32 %v4034_v27, %v4034_v27 }
 0x1cd   : > { %v2168_v49 = vadd.f32 %v2167_v40, %v2137_v18 }
 0x1cf   : > { %v2169_v7 = vadd.f32 %v2168_v49, %v2138_v46 }
 0x1d1   : > { %v2170_v16 = vadd.f32 %v2169_v7, %v2139_v3 }
 0x1d3   : > { %v2171_v63 = vadd.f32 %v2170_v16, %v2140_v55 }
 0x1d5   : > { %v2172_v30 = vadd.f32 %v2171_v63, %v2141_v23 }
 0x1d7   : > { %v2173_v33 = vadd.f32 %v2172_v30, %v2142_v11 }
 0x1d9   : > { %v2174_v32 = vadd.f32 %v2173_v33, %v2143_v53 }
 0x1db   : > { %v2175_v39 = vadd.f32 %v2174_v32, %v2144_v51 }
 0x1dd   : > { %v2176_v14 = vadd.f32 %v2175_v39, %v2145_v10 }
 0x1df   : > { %v2177_v42 = vadd.f32 %v2176_v14, %v2146_v56 }
 0x1e1   : > { %v2178_v58 = vadd.f32 %v2177_v42, %v2147_v29 }
 0x1e3   : > { %v2179_v5 = vadd.f32 %v2178_v58, %v2148_v22 }
 0x1e5   : > { %v2180_v24 = vadd.f32 %v2179_v5, %v2149_v61 }
 0x1e7   : > { %v2181_v43 = vadd.f32 %v2180_v24, %v2150_v41 }
 0x1e9   : > { %v2182_v19 = vadd.f32 %v2181_v43, %v2151_v2 }
 0x1eb   : > { %v2183_v54 = vrot.slane %v2182_v19, 4 }
 0x1ed   : > { %v2184_v18 = vadd.f32 %v2183_v54, %v2182_v19 }
 0x1ef   : > { %v2185_v13 = vrot.slane %v2184_v18, 2 }
 0x1f1   : > { %v2186_v36 = vadd.f32 %v2185_v13, %v2184_v18 }
 0x1f3   : > { %v2187_v0 = vrot.slane %v2186_v36, 1 }
 0x1f5   : > { %v2188_v40 = vadd.f32 %v2187_v0, %v2186_v36 }
 0x1f7   : > { %2190 = vst [vmem:[%s363_s8] sm:$0x1] %v2188_v40 }
 0x1f8 PF: > { %s17_s23 = sadd.s32 1, %s3029_s23   ;;  %s4284_s21 = smov %s3025_s22 }
 0x1f9   : > { %p14_p6 = scmp.ge.s32.totalorder %s17_s23, 4   ;;  %s4285_s22 = smov %s4287_s24 }
 0x1fb   :  { %16 = sbr.rel (!%p14_p6) target bundleno = 2 (0x2), region = 99 }

// kernel: conv_dru_bn_forward.13
= control target key start
LH: loop header
LB: loop body
LE: loop exit
PB: predicated region body
PF: predicated region fallthrough
CT: control target
= control target key end

     0   :  { %s1345_s15 = smov 0   ;;  %s1347_s16 = smov 0   ;;  %s1555_s0 = inlined_call_operand.vmem [shape: f32[512,128], index: 0, kind: input, shape index: {}]   ;;  %s1556_s1 = inlined_call_operand.vmem [shape: f32[1,128], index: 1, kind: input, shape index: {}]   ;;  %s1557_s2 = inlined_call_operand.vmem [shape: f32[1,128], index: 2, kind: input, shape index: {}]   ;;  %s1558_s3 = inlined_call_operand.vmem [shape: f32[512,128], index: 3, kind: input, shape index: {}]   ;;  %s1559_s4 = inlined_call_operand.vmem [shape: bf16[512,128], index: 4, kind: output, shape index: {}]  }
   0x1   :  { %s1349_s17 = smov 0  }
   0x2 LB: > { %s26_s18 = sadd.s32 1, %s1314_s16  ;;  %p974_p0 = scmp.ge.s32.totalorder %s1318_s17, 1  ;;  %s1318_s17 = sphi %s1349_s17, %s14_s17   ;;  %s1314_s16 = sphi %s1347_s16, %s1561_s16   ;;  %s1310_s15 = sphi %s1345_s15, %s1560_s15  }
   0x3   : > { %p28_p1 = scmp.ge.s32.totalorder %s26_s18, 2  ;;  %p214_p2 = scmp.lt.s32.totalorder %s1318_s17, 3 }
   0x5   : > { %s1563_s18 = smov (%p28_p1, %s26_s18), 0  ;;  %p215_p3 = pnand %p974_p0, %p214_p2 }
   0x6   : > { %s975_s19 = sshll.u32 (!%p215_p3), %s1310_s15, 5 }
   0x7   : > { %218 = sbr.rel (%p215_p3) target bundleno = 124 (0x7c), region = 36  ;;  %p261_p4 = scmp.lt.s32.totalorder (!%p215_p3), %s975_s19, 63 }
   0xc   : > { %s1565_s19 = smov (!%p261_p4, %s975_s19), 63  ;;  %v1369_v0 = vld [vmem:[%s1556_s1] ss:$0 sm:$0xff] }
   0xd   : > { %s976_s20 = sshll.u32 %s1565_s19, 3  ;;  %v1383_v3 = vld [vmem:[%s1557_s2] ss:$0 sm:$0xff]  ;;  %s980_s5 = sshll.u32 %s1565_s19, 2 }
   0xe   : > { %s1376_s25 = scalar_lea.vmem %s1555_s0, %s976_s20  ;;  %s1460_s30 = scalar_lea.vmem %s1558_s3, %s976_s20 }
   0xf   : > { %v293_v1 = vld [vmem:[%s1376_s25] sm:$0xff]  ;;  %v294_v2 = vld [vmem:[%s1376_s25 + $0x8] sm:$0xff]  ;;  %v295_v6 = vld [vmem:[%s1376_s25 + $0x10] sm:$0xff]  ;;  %s1477_s8 = scalar_lea.vmem %s1559_s4, %s980_s5 }
  0x10   : > { %v332_v4 = vmul.f32 %v1369_v0, %v293_v1  ;;  %v333_v5 = vmul.f32 %v1369_v0, %v294_v2  ;;  %v296_v7 = vld [vmem:[%s1376_s25 + $0x18] sm:$0xff]  ;;  %v334_v8 = vmul.f32 %v1369_v0, %v295_v6  ;;  %v297_v10 = vld [vmem:[%s1376_s25 + $0x20] sm:$0xff]  ;;  %v298_v13 = vld [vmem:[%s1376_s25 + $0x28] sm:$0xff] }
  0x11   : > { %v335_v9 = vmul.f32 %v1369_v0, %v296_v7  ;;  %v336_v14 = vmul.f32 %v1369_v0, %v297_v10  ;;  %v337_v17 = vmul.f32 %v1369_v0, %v298_v13  ;;  %v299_v18 = vld [vmem:[%s1376_s25 + $0x30] sm:$0xff]  ;;  %v300_v19 = vld [vmem:[%s1376_s25 + $0x38] sm:$0xff]  ;;  %v301_v36 = vld [vmem:[%s1376_s25 + $0x40] sm:$0xff] }
  0x12   : > { %v371_v11 = vadd.f32 %v1383_v3, %v332_v4  ;;  %v372_v12 = vadd.f32 %v1383_v3, %v333_v5  ;;  %v373_v15 = vadd.f32 %v1383_v3, %v334_v8  ;;  %v338_v23 = vmul.f32 %v1369_v0, %v299_v18  ;;  %v302_v37 = vld [vmem:[%s1376_s25 + $0x48] sm:$0xff]  ;;  %v303_v38 = vld [vmem:[%s1376_s25 + $0x50] sm:$0xff]  ;;  %v304_v50 = vld [vmem:[%s1376_s25 + $0x58] sm:$0xff] }
  0x13   : > { %v374_v16 = vadd.f32 %v1383_v3, %v335_v9  ;;  %v375_v22 = vadd.f32 %v1383_v3, %v336_v14  ;;  %v376_v26 = vadd.f32 %v1383_v3, %v337_v17  ;;  %v339_v27 = vmul.f32 %v1369_v0, %v300_v19  ;;  %v305_v54 = vld [vmem:[%s1376_s25 + $0x60] sm:$0xff]  ;;  %v306_v58 = vld [vmem:[%s1376_s25 + $0x68] sm:$0xff]  ;;  %v307_v6 = vld [vmem:[%s1376_s25 + $0x70] sm:$0xff] }
  0x14   : > { %v403_v20 = vmax.f32 %v371_v11, 0.0  ;;  %v404_v21 = vmax.f32 %v372_v12, 0.0  ;;  %v405_v24 = vmax.f32 %v373_v15, 0.0  ;;  %v377_v31 = vadd.f32 %v1383_v3, %v338_v23  ;;  %v308_v10 = vld [vmem:[%s1376_s25 + $0x78] sm:$0xff] }
  0x15   : > { %v406_v25 = vmax.f32 %v374_v16, 0.0  ;;  %v407_v30 = vmax.f32 %v375_v22, 0.0  ;;  %v408_v34 = vmax.f32 %v376_v26, 0.0  ;;  %v378_v35 = vadd.f32 %v1383_v3, %v339_v27  ;;  %v309_v22 = vld [vmem:[%s1376_s25 + $0x80] sm:$0xff]  ;;  %v310_v26 = vld [vmem:[%s1376_s25 + $0x88] sm:$0xff] }
  0x16   : > { %v467_v28 = vsub.f32 0.0, %v403_v20  ;;  %v468_v29 = vsub.f32 0.0, %v404_v21  ;;  %v469_v32 = vsub.f32 0.0, %v405_v24  ;;  %v409_v42 = vmax.f32 %v377_v31, 0.0 }
  0x17   : > { %v470_v33 = vsub.f32 0.0, %v406_v25  ;;  %v471_v41 = vsub.f32 0.0, %v407_v30  ;;  %v472_v45 = vsub.f32 0.0, %v408_v34  ;;  %v410_v46 = vmax.f32 %v378_v35, 0.0 }
  0x18   : > { %v499_v39 = vmul.f32 1.442695, %v467_v28  ;;  %v501_v40 = vmul.f32 1.442695, %v468_v29  ;;  %v503_v43 = vmul.f32 1.442695, %v469_v32  ;;  %v340_v49 = vmul.f32 %v1369_v0, %v301_v36 }
  0x19   : > { %v505_v44 = vmul.f32 1.442695, %v470_v33  ;;  %v507_v47 = vmul.f32 1.442695, %v471_v41  ;;  %v473_v48 = vsub.f32 0.0, %v409_v42  ;;  %v474_v52 = vsub.f32 0.0, %v410_v46 }
  0x1a   : > { %1168 = vpow2.f32 %v499_v39  ;;  %v509_v51 = vmul.f32 1.442695, %v472_v45  ;;  %v341_v53 = vmul.f32 %v1369_v0, %v302_v37  ;;  %v379_v56 = vadd.f32 %v1383_v3, %v340_v49  ;;  %v311_v45 = vld [vmem:[%s1376_s25 + $0x90] sm:$0xff] }
  0x1b   : > { %1170 = vpow2.f32 %v501_v40  ;;  %v511_v55 = vmul.f32 1.442695, %v473_v48  ;;  %v342_v57 = vmul.f32 %v1369_v0, %v303_v38  ;;  %v513_v59 = vmul.f32 1.442695, %v474_v52 }
  0x1c   : > { %1172 = vpow2.f32 %v503_v43  ;;  %v380_v60 = vadd.f32 %v1383_v3, %v341_v53  ;;  %v343_v61 = vmul.f32 %v1369_v0, %v304_v50  ;;  %v411_v62 = vmax.f32 %v379_v56, 0.0  ;;  %v312_v50 = vld [vmem:[%s1376_s25 + $0x98] sm:$0xff] }
  0x1d   : > { %1174 = vpow2.f32 %v505_v44  ;;  %v381_v63 = vadd.f32 %v1383_v3, %v342_v57  ;;  %v344_v1 = vmul.f32 %v1369_v0, %v305_v54  ;;  %v345_v5 = vmul.f32 %v1369_v0, %v306_v58 }
  0x1e   : > { %1176 = vpow2.f32 %v507_v47  ;;  %v412_v2 = vmax.f32 %v380_v60, 0.0  ;;  %v382_v4 = vadd.f32 %v1383_v3, %v343_v61  ;;  %v475_v7 = vsub.f32 0.0, %v411_v62 }
  0x1f   : > { %1178 = vpow2.f32 %v509_v51  ;;  %v413_v8 = vmax.f32 %v381_v63, 0.0  ;;  %v383_v9 = vadd.f32 %v1383_v3, %v344_v1  ;;  %v384_v13 = vadd.f32 %v1383_v3, %v345_v5  ;;  %v313_v63 = vld [vmem:[%s1376_s25 + $0xa0] sm:$0xff]  ;;  %v314_v1 = vld [vmem:[%s1376_s25 + $0xa8] sm:$0xff] }
  0x20   : > { %1180 = vpow2.f32 %v511_v55  ;;  %v476_v11 = vsub.f32 0.0, %v412_v2  ;;  %v414_v12 = vmax.f32 %v382_v4, 0.0  ;;  %v515_v14 = vmul.f32 1.442695, %v475_v7  ;;  %v315_v7 = vld [vmem:[%s1376_s25 + $0xb0] sm:$0xff] }
  0x21   : > { %1182 = vpow2.f32 %v513_v59  ;;  %v477_v15 = vsub.f32 0.0, %v413_v8  ;;  %v415_v16 = vmax.f32 %v383_v9, 0.0  ;;  %v346_v17 = vmul.f32 %v1369_v0, %v307_v6  ;;  %v316_v8 = vld [vmem:[%s1376_s25 + $0xb8] sm:$0xff] }
  0x22   : > { %v517_v18 = vmul.f32 1.442695, %v476_v11  ;;  %v478_v19 = vsub.f32 0.0, %v414_v12  ;;  %v416_v20 = vmax.f32 %v384_v13, 0.0  ;;  %v347_v21 = vmul.f32 %v1369_v0, %v308_v10 }
  0x23   : > { %1184 = vpow2.f32 %v515_v14  ;;  %v519_v23 = vmul.f32 1.442695, %v477_v15  ;;  %v479_v24 = vsub.f32 0.0, %v415_v16  ;;  %v385_v25 = vadd.f32 %v1383_v3, %v346_v17 }
  0x24   : > { %1186 = vpow2.f32 %v517_v18  ;;  %v521_v27 = vmul.f32 1.442695, %v478_v19  ;;  %v480_v28 = vsub.f32 0.0, %v416_v20  ;;  %v386_v29 = vadd.f32 %v1383_v3, %v347_v21 }
  0x25   : > { %1188 = vpow2.f32 %v519_v23  ;;  %v523_v30 = vmul.f32 1.442695, %v479_v24  ;;  %v417_v31 = vmax.f32 %v385_v25, 0.0  ;;  %v348_v32 = vmul.f32 %v1369_v0, %v309_v22 }
  0x26   : > { %1190 = vpow2.f32 %v521_v27  ;;  %v525_v34 = vmul.f32 1.442695, %v480_v28  ;;  %v418_v35 = vmax.f32 %v386_v29, 0.0  ;;  %v349_v36 = vmul.f32 %v1369_v0, %v310_v26 }
  0x27   : > { %v1169_v33 = vpop.eup %1168  ;;  %1192 = vpow2.f32 %v523_v30  ;;  %v481_v39 = vsub.f32 0.0, %v417_v31  ;;  %v387_v40 = vadd.f32 %v1383_v3, %v348_v32  ;;  %v350_v58 = vmul.f32 %v1369_v0, %v311_v45  ;;  %v435_v32 = vld [vmem:[%s1460_s30] sm:$0xff] }
  0x28   : > { %v1171_v37 = vpop.eup %1170  ;;  %v563_v38 = vadd.f32 1.0, %v1169_v33  ;;  %1194 = vpow2.f32 %v525_v34  ;;  %v482_v43 = vsub.f32 0.0, %v418_v35  ;;  %v388_v44 = vadd.f32 %v1383_v3, %v349_v36 }
  0x29   : > { %v1173_v41 = vpop.eup %1172  ;;  %v564_v42 = vadd.f32 1.0, %v1171_v37  ;;  %v527_v48 = vmul.f32 1.442695, %v481_v39  ;;  %v419_v49 = vmax.f32 %v387_v40, 0.0  ;;  %v351_v62 = vmul.f32 %v1369_v0, %v312_v50  ;;  %v436_v37 = vld [vmem:[%s1460_s30 + $0x8] sm:$0xff] }
  0x2a   : > { %v1175_v46 = vpop.eup %1174  ;;  %1196 = vrcp.f32 %v563_v38  ;;  %v565_v47 = vadd.f32 1.0, %v1173_v41  ;;  %v529_v53 = vmul.f32 1.442695, %v482_v43  ;;  %v420_v54 = vmax.f32 %v388_v44, 0.0 }
  0x2b   : > { %v1177_v51 = vpop.eup %1176  ;;  %1198 = vrcp.f32 %v564_v42  ;;  %v566_v52 = vadd.f32 1.0, %v1175_v46  ;;  %v483_v57 = vsub.f32 0.0, %v419_v49  ;;  %v389_v6 = vadd.f32 %v1383_v3, %v350_v58  ;;  %v437_v42 = vld [vmem:[%s1460_s30 + $0x10] sm:$0xff]  ;;  %v317_v46 = vld [vmem:[%s1376_s25 + $0xc0] sm:$0xff]  ;;  %v438_v49 = vld [vmem:[%s1460_s30 + $0x18] sm:$0xff] }
  0x2c   : > { %v1179_v55 = vpop.eup %1178  ;;  %1200 = vrcp.f32 %v565_v47  ;;  %v567_v56 = vadd.f32 1.0, %v1177_v51  ;;  %v484_v61 = vsub.f32 0.0, %v420_v54  ;;  %v390_v11 = vadd.f32 %v1383_v3, %v351_v62  ;;  %v439_v54 = vld [vmem:[%s1460_s30 + $0x20] sm:$0xff] }
  0x2d   : > { %v1181_v59 = vpop.eup %1180  ;;  %1202 = vrcp.f32 %v566_v52  ;;  %v568_v60 = vadd.f32 1.0, %v1179_v55  ;;  %v1443_v5 = vmul.f32 1.442695, %v483_v57  ;;  %v421_v12 = vmax.f32 %v389_v6, 0.0  ;;  %v318_v57 = vld [vmem:[%s1376_s25 + $0xc8] sm:$0xff] }
  0x2e   : > { %v1183_v2 = vpop.eup %1182  ;;  %1204 = vrcp.f32 %v567_v56  ;;  %v569_v4 = vadd.f32 1.0, %v1181_v59  ;;  %v1448_v10 = vmul.f32 1.442695, %v484_v61  ;;  %v352_v13 = vmul.f32 %v1369_v0, %v313_v63 }
  0x2f   : > { %1206 = vrcp.f32 %v568_v60  ;;  %v570_v9 = vadd.f32 1.0, %v1183_v2  ;;  %v353_v14 = vmul.f32 %v1369_v0, %v314_v1  ;;  %v422_v16 = vmax.f32 %v390_v11, 0.0  ;;  %v440_v60 = vld [vmem:[%s1460_s30 + $0x28] sm:$0xff] }
  0x30   : > { %1208 = vrcp.f32 %v569_v4  ;;  %v1185_v15 = vpop.eup %1184  ;;  %v354_v17 = vmul.f32 %v1369_v0, %v315_v7  ;;  %v355_v18 = vmul.f32 %v1369_v0, %v316_v8  ;;  %v485_v21 = vsub.f32 0.0, %v421_v12  ;;  %v441_v4 = vld [vmem:[%s1460_s30 + $0x30] sm:$0xff] }
  0x31   : > { %1210 = vrcp.f32 %v570_v9  ;;  %v1187_v19 = vpop.eup %1186  ;;  %v571_v20 = vadd.f32 1.0, %v1185_v15  ;;  %v391_v22 = vadd.f32 %v1383_v3, %v352_v13  ;;  %v486_v25 = vsub.f32 0.0, %v422_v16  ;;  %v442_v9 = vld [vmem:[%s1460_s30 + $0x38] sm:$0xff]  ;;  %v319_v12 = vld [vmem:[%s1376_s25 + $0xd0] sm:$0xff] }
  0x32   : > { %1212 = vpow2.f32 %v527_v48  ;;  %v1189_v23 = vpop.eup %1188  ;;  %v572_v24 = vadd.f32 1.0, %v1187_v19  ;;  %v392_v26 = vadd.f32 %v1383_v3, %v353_v14  ;;  %v535_v29 = vmul.f32 1.442695, %v485_v21 }
  0x33   : > { %1214 = vpow2.f32 %v529_v53  ;;  %v1191_v27 = vpop.eup %1190  ;;  %v573_v28 = vadd.f32 1.0, %v1189_v23  ;;  %v423_v30 = vmax.f32 %v391_v22, 0.0  ;;  %v537_v34 = vmul.f32 1.442695, %v486_v25 }
  0x34   : > { %1216 = vrcp.f32 %v571_v20  ;;  %v1193_v31 = vpop.eup %1192  ;;  %v574_v33 = vadd.f32 1.0, %v1191_v27  ;;  %v424_v35 = vmax.f32 %v392_v26, 0.0  ;;  %v393_v40 = vadd.f32 %v1383_v3, %v354_v17  ;;  %v320_v20 = vld [vmem:[%s1376_s25 + $0xd8] sm:$0xff]  ;;  %v444_v27 = vld [vmem:[%s1460_s30 + $0x48] sm:$0xff] }
  0x35   : > { %1218 = vrcp.f32 %v572_v24  ;;  %v1195_v36 = vpop.eup %1194  ;;  %v575_v38 = vadd.f32 1.0, %v1193_v31  ;;  %v487_v39 = vsub.f32 0.0, %v423_v30  ;;  %v394_v45 = vadd.f32 %v1383_v3, %v355_v18  ;;  %v443_v24 = vld [vmem:[%s1460_s30 + $0x40] sm:$0xff] }
  0x36   : > { %1220 = vrcp.f32 %v573_v28  ;;  %v576_v43 = vadd.f32 1.0, %v1195_v36  ;;  %v488_v44 = vsub.f32 0.0, %v424_v35  ;;  %v425_v51 = vmax.f32 %v393_v40, 0.0  ;;  %v321_v36 = vld [vmem:[%s1376_s25 + $0xe0] sm:$0xff] }
  0x37   : > { %v1197_v41 = vpop.eup %1196  ;;  %1222 = vrcp.f32 %v574_v33  ;;  %v539_v50 = vmul.f32 1.442695, %v487_v39  ;;  %v426_v56 = vmax.f32 %v394_v45, 0.0  ;;  %v356_v62 = vmul.f32 %v1369_v0, %v317_v46  ;;  %v445_v33 = vld [vmem:[%s1460_s30 + $0x50] sm:$0xff]  ;;  %v446_v39 = vld [vmem:[%s1460_s30 + $0x58] sm:$0xff] }
  0x38   : > { %v1199_v47 = vpop.eup %1198  ;;  %v659_v48 = vmul.f32 %v1197_v41, %v435_v32  ;;  %1224 = vrcp.f32 %v575_v38  ;;  %v541_v55 = vmul.f32 1.442695, %v488_v44  ;;  %v489_v61 = vsub.f32 0.0, %v425_v51  ;;  %v447_v44 = vld [vmem:[%s1460_s30 + $0x60] sm:$0xff] }
  0x39   : > { %v1201_v52 = vpop.eup %1200  ;;  %v660_v53 = vmul.f32 %v1199_v47, %v436_v37  ;;  %1226 = vrcp.f32 %v576_v43  ;;  %v490_v6 = vsub.f32 0.0, %v426_v56  ;;  %v395_v18 = vadd.f32 %v1383_v3, %v356_v62  ;;  %v322_v47 = vld [vmem:[%s1376_s25 + $0xe8] sm:$0xff]  ;;  %v323_v62 = vld [vmem:[%s1376_s25 + $0xf0] sm:$0xff] }
  0x3a   : > { %v1203_v58 = vpop.eup %1202  ;;  %v661_v59 = vmul.f32 %v1201_v52, %v437_v42  ;;  %1228 = vpow2.f32 %v1443_v5  ;;  %v543_v11 = vmul.f32 1.442695, %v489_v61  ;;  %v357_v5 = vmul.f32 %v1369_v0, %v318_v57 }
  0x3b   : > { %v1205_v63 = vpop.eup %1204  ;;  %v1052_v1 = vpack.c.bf16 %v660_v53, %v659_v48  ;;  %v662_v2 = vmul.f32 %v1203_v58, %v438_v49  ;;  %1230 = vpow2.f32 %v1448_v10  ;;  %v545_v16 = vmul.f32 1.442695, %v490_v6 }
  0x3c   : > { %v1207_v7 = vpop.eup %1206  ;;  %v663_v8 = vmul.f32 %v1205_v63, %v439_v54  ;;  %1232 = vpow2.f32 %v535_v29  ;;  %v396_v19 = vadd.f32 %v1383_v3, %v357_v5  ;;  %v358_v25 = vmul.f32 %v1369_v0, %v319_v12 }
  0x3d   : > { %v1209_v13 = vpop.eup %1208  ;;  %1053 = vst [vmem:[%s1477_s8] sm:$0xff] %v1052_v1   ;;  %v1057_v14 = vpack.c.bf16 %v662_v2, %v661_v59  ;;  %v664_v15 = vmul.f32 %v1207_v7, %v440_v60  ;;  %1234 = vpow2.f32 %v537_v34  ;;  %v427_v29 = vmax.f32 %v395_v18, 0.0 }
  0x3e   : > { %v1211_v10 = vpop.eup %1210  ;;  %v665_v17 = vmul.f32 %v1209_v13, %v441_v4  ;;  %1236 = vpow2.f32 %v539_v50  ;;  %v428_v30 = vmax.f32 %v396_v19, 0.0  ;;  %v359_v35 = vmul.f32 %v1369_v0, %v320_v20  ;;  %v448_v50 = vld [vmem:[%s1460_s30 + $0x68] sm:$0xff] }
  0x3f   : > { %v1213_v21 = vpop.eup %1212  ;;  %1129 = vst [vmem:[%s1477_s8 + $0x8] sm:$0xff] %v1057_v14   ;;  %v1062_v22 = vpack.c.bf16 %v664_v15, %v663_v8  ;;  %v666_v23 = vmul.f32 %v1211_v10, %v442_v9  ;;  %1238 = vpow2.f32 %v541_v55  ;;  %v491_v40 = vsub.f32 0.0, %v427_v29 }
  0x40   : > { %v1215_v26 = vpop.eup %1214  ;;  %v577_v28 = vadd.f32 1.0, %v1213_v21  ;;  %1240 = vpow2.f32 %v543_v11  ;;  %v492_v41 = vsub.f32 0.0, %v428_v30  ;;  %v397_v45 = vadd.f32 %v1383_v3, %v358_v25  ;;  %v324_v11 = vld [vmem:[%s1376_s25 + $0xf8] sm:$0xff] }
  0x41   : > { %v1217_v31 = vpop.eup %1216  ;;  %1130 = vst [vmem:[%s1477_s8 + $0x10] sm:$0xff] %v1062_v22   ;;  %v1067_v32 = vpack.c.bf16 %v666_v23, %v665_v17  ;;  %v578_v34 = vadd.f32 1.0, %v1215_v26  ;;  %1242 = vpow2.f32 %v545_v16  ;;  %v398_v46 = vadd.f32 %v1383_v3, %v359_v35 }
  0x42   : > { %v1219_v37 = vpop.eup %1218  ;;  %v667_v38 = vmul.f32 %v1217_v31, %v443_v24  ;;  %1244 = vrcp.f32 %v577_v28  ;;  %v547_v51 = vmul.f32 1.442695, %v491_v40  ;;  %v549_v52 = vmul.f32 1.442695, %v492_v41 }
  0x43   : > { %v1221_v42 = vpop.eup %1220  ;;  %1131 = vst [vmem:[%s1477_s8 + $0x18] sm:$0xff] %v1067_v32   ;;  %v668_v43 = vmul.f32 %v1219_v37, %v444_v27  ;;  %1246 = vrcp.f32 %v578_v34  ;;  %v360_v53 = vmul.f32 %v1369_v0, %v321_v36  ;;  %v429_v57 = vmax.f32 %v397_v45, 0.0  ;;  %v449_v27 = vld [vmem:[%s1460_s30 + $0x70] sm:$0xff]  ;;  %v450_v32 = vld [vmem:[%s1460_s30 + $0x78] sm:$0xff] }
  0x44   : > { %v1223_v48 = vpop.eup %1222  ;;  %v669_v49 = vmul.f32 %v1221_v42, %v445_v33  ;;  %1248 = vpow2.f32 %v547_v51  ;;  %v361_v60 = vmul.f32 %v1369_v0, %v322_v47  ;;  %v430_v4 = vmax.f32 %v398_v46, 0.0 }
  0x45   : > { %v1225_v54 = vpop.eup %1224  ;;  %v1072_v55 = vpack.c.bf16 %v668_v43, %v667_v38  ;;  %v670_v56 = vmul.f32 %v1223_v48, %v446_v39  ;;  %v399_v61 = vadd.f32 %v1383_v3, %v360_v53  ;;  %1250 = vpow2.f32 %v549_v52  ;;  %v452_v53 = vld [vmem:[%s1460_s30 + $0x88] sm:$0xff] }
  0x46   : > { %v1227_v58 = vpop.eup %1226  ;;  %v671_v59 = vmul.f32 %v1225_v54, %v447_v44  ;;  %v400_v8 = vadd.f32 %v1383_v3, %v361_v60  ;;  %v362_v14 = vmul.f32 %v1369_v0, %v323_v62  ;;  %v493_v10 = vsub.f32 0.0, %v429_v57 }
  0x47   : > { %v1229_v63 = vpop.eup %1228  ;;  %1132 = vst [vmem:[%s1477_s8 + $0x20] sm:$0xff] %v1072_v55   ;;  %v1077_v1 = vpack.c.bf16 %v670_v56, %v669_v49  ;;  %v672_v2 = vmul.f32 %v1227_v58, %v448_v50  ;;  %v431_v9 = vmax.f32 %v399_v61, 0.0  ;;  %v494_v20 = vsub.f32 0.0, %v430_v4  ;;  %v451_v50 = vld [vmem:[%s1460_s30 + $0x80] sm:$0xff]  ;;  %v453_v55 = vld [vmem:[%s1460_s30 + $0x90] sm:$0xff]  ;;  %v454_v58 = vld [vmem:[%s1460_s30 + $0x98] sm:$0xff] }
  0x48   : > { %v1231_v6 = vpop.eup %1230  ;;  %v579_v7 = vadd.f32 1.0, %v1229_v63  ;;  %v432_v17 = vmax.f32 %v400_v8, 0.0  ;;  %v363_v21 = vmul.f32 %v1369_v0, %v324_v11  ;;  %v401_v25 = vadd.f32 %v1383_v3, %v362_v14  ;;  %v455_v61 = vld [vmem:[%s1460_s30 + $0xa0] sm:$0xff]  ;;  %v458_v11 = vld [vmem:[%s1460_s30 + $0xb8] sm:$0xff] }
  0x49   : > { %v1233_v5 = vpop.eup %1232  ;;  %1133 = vst [vmem:[%s1477_s8 + $0x28] sm:$0xff] %v1077_v1   ;;  %v1082_v12 = vpack.c.bf16 %v672_v2, %v671_v59  ;;  %v580_v13 = vadd.f32 1.0, %v1231_v6  ;;  %v495_v24 = vsub.f32 0.0, %v431_v9  ;;  %v551_v34 = vmul.f32 1.442695, %v493_v10  ;;  %v456_v1 = vld [vmem:[%s1460_s30 + $0xa8] sm:$0xff] }
  0x4a   : > { %v1235_v15 = vpop.eup %1234  ;;  %1252 = vrcp.f32 %v579_v7  ;;  %v581_v16 = vadd.f32 1.0, %v1233_v5  ;;  %v496_v29 = vsub.f32 0.0, %v432_v17  ;;  %v402_v30 = vadd.f32 %v1383_v3, %v363_v21  ;;  %v457_v7 = vld [vmem:[%s1460_s30 + $0xb0] sm:$0xff] }
  0x4b   : > { %v1237_v18 = vpop.eup %1236  ;;  %1134 = vst [vmem:[%s1477_s8 + $0x30] sm:$0xff] %v1082_v12   ;;  %1254 = vrcp.f32 %v580_v13  ;;  %v582_v19 = vadd.f32 1.0, %v1235_v15  ;;  %v433_v35 = vmax.f32 %v401_v25, 0.0  ;;  %v553_v37 = vmul.f32 1.442695, %v494_v20  ;;  %v460_v25 = vld [vmem:[%s1460_s30 + $0xc8] sm:$0xff] }
  0x4c   : > { %v1239_v22 = vpop.eup %1238  ;;  %1256 = vrcp.f32 %v581_v16  ;;  %v583_v23 = vadd.f32 1.0, %v1237_v18  ;;  %v434_v38 = vmax.f32 %v402_v30, 0.0  ;;  %v555_v41 = vmul.f32 1.442695, %v495_v24 }
  0x4d   : > { %v1241_v26 = vpop.eup %1240  ;;  %1258 = vrcp.f32 %v582_v19  ;;  %v584_v28 = vadd.f32 1.0, %v1239_v22  ;;  %v497_v42 = vsub.f32 0.0, %v433_v35  ;;  %v557_v3 = vmul.f32 1.442695, %v496_v29  ;;  %v459_v22 = vld [vmem:[%s1460_s30 + $0xc0] sm:$0xff] }
  0x4e   : > { %v1243_v31 = vpop.eup %1242  ;;  %1260 = vrcp.f32 %v583_v23  ;;  %v585_v33 = vadd.f32 1.0, %v1241_v26  ;;  %v498_v44 = vsub.f32 0.0, %v434_v38 }
  0x4f   : > { %v1245_v0 = vpop.eup %1244  ;;  %1262 = vrcp.f32 %v584_v28  ;;  %v586_v36 = vadd.f32 1.0, %v1243_v31  ;;  %v559_v49 = vmul.f32 1.442695, %v497_v42  ;;  %v464_v42 = vld [vmem:[%s1460_s30 + $0xe8] sm:$0xff] }
  0x50   : > { %v1247_v39 = vpop.eup %1246  ;;  %v673_v40 = vmul.f32 %v1245_v0, %v449_v27  ;;  %1264 = vrcp.f32 %v585_v33  ;;  %v561_v52 = vmul.f32 1.442695, %v498_v44 }
  0x51   : > { %v674_v43 = vmul.f32 %v1247_v39, %v450_v32  ;;  %1266 = vrcp.f32 %v586_v36  ;;  %v1249_v45 = vpop.eup %1248  ;;  %v461_v36 = vld [vmem:[%s1460_s30 + $0xd0] sm:$0xff]  ;;  %v463_v39 = vld [vmem:[%s1460_s30 + $0xe0] sm:$0xff] }
  0x52   : > { %1268 = vpow2.f32 %v551_v34  ;;  %v1251_v47 = vpop.eup %1250  ;;  %v587_v48 = vadd.f32 1.0, %v1249_v45 }
  0x53   : > { %v1087_v46 = vpack.c.bf16 %v674_v43, %v673_v40  ;;  %1270 = vpow2.f32 %v553_v37  ;;  %v588_v51 = vadd.f32 1.0, %v1251_v47  ;;  %v462_v37 = vld [vmem:[%s1460_s30 + $0xd8] sm:$0xff] }
  0x54   : > { %1272 = vpow2.f32 %v555_v41 }
  0x55   : > { %1135 = vst [vmem:[%s1477_s8 + $0x38] sm:$0xff] %v1087_v46   ;;  %1274 = vpow2.f32 %v557_v3 }
  0x56   : > { %1276 = vrcp.f32 %v587_v48  ;;  %v465_v48 = vld [vmem:[%s1460_s30 + $0xf0] sm:$0xff] }
  0x57   : > { %v1253_v54 = vpop.eup %1252  ;;  %1278 = vrcp.f32 %v588_v51 }
  0x58   : > { %v1255_v56 = vpop.eup %1254  ;;  %v675_v57 = vmul.f32 %v1253_v54, %v451_v50  ;;  %1280 = vpow2.f32 %v559_v49  ;;  %v466_v49 = vld [vmem:[%s1460_s30 + $0xf8] sm:$0xff] }
  0x59   : > { %v1257_v59 = vpop.eup %1256  ;;  %v676_v60 = vmul.f32 %v1255_v56, %v452_v53  ;;  %1282 = vpow2.f32 %v561_v52 }
  0x5a   : > { %v1259_v62 = vpop.eup %1258  ;;  %v677_v63 = vmul.f32 %v1257_v59, %v453_v55 }
  0x5b   : > { %v1261_v2 = vpop.eup %1260  ;;  %v1092_v4 = vpack.c.bf16 %v676_v60, %v675_v57  ;;  %v678_v6 = vmul.f32 %v1259_v62, %v454_v58 }
  0x5c   : > { %v1263_v8 = vpop.eup %1262  ;;  %v679_v9 = vmul.f32 %v1261_v2, %v455_v61 }
  0x5d   : > { %v1265_v5 = vpop.eup %1264  ;;  %1136 = vst [vmem:[%s1477_s8 + $0x40] sm:$0xff] %v1092_v4   ;;  %v1097_v12 = vpack.c.bf16 %v678_v6, %v677_v63  ;;  %v680_v13 = vmul.f32 %v1263_v8, %v456_v1 }
  0x5e   : > { %v1267_v14 = vpop.eup %1266  ;;  %v681_v15 = vmul.f32 %v1265_v5, %v457_v7 }
  0x5f   : > { %v1269_v16 = vpop.eup %1268  ;;  %1137 = vst [vmem:[%s1477_s8 + $0x48] sm:$0xff] %v1097_v12   ;;  %v1102_v10 = vpack.c.bf16 %v680_v13, %v679_v9  ;;  %v682_v17 = vmul.f32 %v1267_v14, %v458_v11 }
  0x60   : > { %v1271_v18 = vpop.eup %1270  ;;  %v589_v19 = vadd.f32 1.0, %v1269_v16 }
  0x61   : > { %v1273_v20 = vpop.eup %1272  ;;  %1138 = vst [vmem:[%s1477_s8 + $0x50] sm:$0xff] %v1102_v10   ;;  %v1107_v21 = vpack.c.bf16 %v682_v17, %v681_v15  ;;  %v590_v23 = vadd.f32 1.0, %v1271_v18 }
  0x62   : > { %v1275_v24 = vpop.eup %1274  ;;  %1284 = vrcp.f32 %v589_v19  ;;  %v591_v26 = vadd.f32 1.0, %v1273_v20 }
  0x63   : > { %v1277_v27 = vpop.eup %1276  ;;  %1139 = vst [vmem:[%s1477_s8 + $0x58] sm:$0xff] %v1107_v21   ;;  %1286 = vrcp.f32 %v590_v23  ;;  %v592_v28 = vadd.f32 1.0, %v1275_v24 }
  0x64   : > { %v1279_v29 = vpop.eup %1278  ;;  %v683_v30 = vmul.f32 %v1277_v27, %v459_v22  ;;  %1288 = vrcp.f32 %v591_v26 }
  0x65   : > { %v1281_v31 = vpop.eup %1280  ;;  %v684_v32 = vmul.f32 %v1279_v29, %v460_v25  ;;  %1290 = vrcp.f32 %v592_v28 }
  0x66   : > { %v1283_v33 = vpop.eup %1282  ;;  %v593_v34 = vadd.f32 1.0, %v1281_v31 }
  0x67   : > { %v1112_v35 = vpack.c.bf16 %v684_v32, %v683_v30  ;;  %v594_v0 = vadd.f32 1.0, %v1283_v33 }
  0x68   : > { %1292 = vrcp.f32 %v593_v34 }
  0x69   : > { %1140 = vst [vmem:[%s1477_s8 + $0x60] sm:$0xff] %v1112_v35   ;;  %1294 = vrcp.f32 %v594_v0 }
  0x6f   : > { %v1285_v38 = vpop.eup %1284 }
  0x70   : > { %v1287_v40 = vpop.eup %1286  ;;  %v685_v41 = vmul.f32 %v1285_v38, %v461_v36 }
  0x71   : > { %v1289_v43 = vpop.eup %1288  ;;  %v686_v3 = vmul.f32 %v1287_v40, %v462_v37 }
  0x72   : > { %v1291_v44 = vpop.eup %1290  ;;  %v687_v45 = vmul.f32 %v1289_v43, %v463_v39 }
  0x73   : > { %v1117_v46 = vpack.c.bf16 %v686_v3, %v685_v41  ;;  %v688_v47 = vmul.f32 %v1291_v44, %v464_v42 }
  0x75   : > { %v1293_v50 = vpop.eup %1292  ;;  %1141 = vst [vmem:[%s1477_s8 + $0x68] sm:$0xff] %v1117_v46   ;;  %v1122_v51 = vpack.c.bf16 %v688_v47, %v687_v45 }
  0x76   : > { %v1295_v52 = vpop.eup %1294  ;;  %v689_v53 = vmul.f32 %v1293_v50, %v465_v48 }
  0x77   : > { %1142 = vst [vmem:[%s1477_s8 + $0x70] sm:$0xff] %v1122_v51   ;;  %v690_v54 = vmul.f32 %v1295_v52, %v466_v49 }
  0x79   : > { %v1127_v55 = vpack.c.bf16 %v690_v54, %v689_v53 }
  0x7b   : > { %1143 = vst [vmem:[%s1477_s8 + $0x78] sm:$0xff] %v1127_v55  }
  0x7c PF: > { %s14_s17 = sadd.s32 1, %s1318_s17   ;;  %s1560_s15 = smov %s1314_s16 }
  0x7d   : > { %p11_p5 = scmp.ge.s32.totalorder %s14_s17, 4   ;;  %s1561_s16 = smov %s1563_s18 }
  0x7f   :  { %13 = sbr.rel (!%p11_p5) target bundleno = 2 (0x2), region = 75 }

// kernel: conv_dru_bn_forward.19
= control target key start
LH: loop header
LB: loop body
LE: loop exit
PB: predicated region body
PF: predicated region fallthrough
CT: control target
= control target key end

     0   :  { %10 = vsyncpa [#allocation3], 0  ;;  %s2043_s0 = inlined_call_operand.vmem [shape: f32[512,128], index: 0, kind: input, shape index: {}]   ;;  %s2044_s1 = inlined_call_operand.vmem [shape: f32[1,128], index: 1, kind: input, shape index: {}]   ;;  %s2045_s2 = inlined_call_operand.vmem [shape: f32[1,128], index: 2, kind: input, shape index: {}]   ;;  %s2046_s3 = inlined_call_operand.vmem [shape: f32[512,128], index: 3, kind: input, shape index: {}]   ;;  %s2047_s4 = inlined_call_operand.vmem [shape: bf16[512,128], index: 4, kind: input, shape index: {}]   ;;  %s2048_s5 = inlined_call_operand.hbm [shape: f32[512,128], index: 5, kind: output, shape index: {}]  }
   0x1   :  { %12 = vsyncpa [#allocation3 + $0x1], 0  ;;  %s1574_s18 = smov 0   ;;  %s1576_s19 = smov 0  }
   0x2   :  { %s1578_s20 = smov 0   ;;  %s1580_s21 = smov 0  }
   0x3   :  { %s1582_s22 = smov 0   ;;  %s1584_s23 = smov 0  }
   0x4 LB: > { %s1111_s24 = sadd.s32 4294967295, %s1539_s23   ;;  %s1112_s25 = sadd.s32 4294967294, %s1539_s23   ;;  %s1539_s23 = sphi %s1584_s23, %s18_s23   ;;  %s1535_s22 = sphi %s1582_s22, %s2055_s22   ;;  %s1531_s21 = sphi %s1580_s21, %s2054_s21   ;;  %s1527_s20 = sphi %s1578_s20, %s2053_s20   ;;  %s1523_s19 = sphi %s1576_s19, %s2052_s19   ;;  %s1519_s18 = sphi %s1574_s18, %s2051_s18  }
   0x5   : > { %s30_s26 = sadd.s32 1, %s1535_s22  ;;  %s175_s27 = sadd.s32 1, %s1527_s20 }
   0x6   : > { %p32_p0 = scmp.ge.s32.totalorder %s30_s26, 2  ;;  %p185_p1 = scmp.ne.s32.totalorder %s1527_s20, %s1523_s19 }
   0x7   : > { %p186_p2 = scmp.eq.s32.totalorder %s1111_s24, 1  ;;  %p191_p3 = scmp.ne.s32.totalorder %s1523_s19, %s1519_s18 }
   0x8   : > { %s2057_s26 = smov (%p32_p0, %s30_s26), 0  ;;  %p192_p5 = scmp.eq.s32.totalorder %s1112_s25, 1 }
   0x9   : > { %p1614_p4 = por %p186_p2, %p185_p1  ;;  %s170_s29 = ssub.s32 %s1535_s22, %s2057_s26 }
   0xa   : > { %p1117_p6 = scmp.ge.s32.totalorder %s1539_s23, 1  ;;  %p173_p7 = scmp.eq.s32.totalorder %s170_s29, 0 }
   0xb   : > { %p1621_p8 = por %p192_p5, %p191_p3  ;;  %p258_p9 = scmp.lt.s32.totalorder %s1539_s23, 3 }
   0xc   : > { %s1627_s6 = scalar_select %p173_p7, %s1527_s20, %s175_s27  }
   0xd   : > { %p259_p10 = pnand %p1117_p6, %p258_p9 }
   0xe   : > { %s1119_s7 = sshll.u32 (!%p259_p10), %s1531_s21, 5  ;;  %s308_s10 = sand.u32 (!%p259_p10), 1, %s1523_s19  }
   0xf   : > { %262 = sbr.rel (%p259_p10) target bundleno = 178 (0xb2), region = 40  ;;  %p312_p11 = scmp.lt.s32.totalorder (!%p259_p10), %s1119_s7, 63 }
  0x10   : > { %s1998_s27 = scalar_lea.sflag (!%p259_p10), [#allocation3], %s308_s10  ;;  %s1541_s29 = smov (!%p259_p10), [#allocation2]  }
  0x14   : > { %s2059_s7 = smov (!%p312_p11, %s1119_s7), 63  ;;  %v1637_v0 = vld [vmem:[%s2044_s1] ss:$0 sm:$0xff] }
  0x15   : > { %s1120_s8 = sshll.u32 %s2059_s7, 3  ;;  %s1124_s9 = sshll.u32 %s2059_s7, 2  ;;  %v1655_v2 = vld [vmem:[%s2045_s2] ss:$0 sm:$0xff] }
  0x16   : > { %s1644_s14 = scalar_lea.vmem %s2043_s0, %s1120_s8  ;;  %s1649_s17 = scalar_lea.vmem %s2047_s4, %s1124_s9 }
  0x17   : > { %v345_v1 = vld [vmem:[%s1644_s14] sm:$0xff]  ;;  %v346_v3 = vld [vmem:[%s1644_s14 + $0x8] sm:$0xff]  ;;  %v347_v7 = vld [vmem:[%s1644_s14 + $0x10] sm:$0xff]  ;;  %s1736_s9 = scalar_lea.vmem %s2046_s3, %s1120_s8  ;;  %s1753_s7 = sshll.u32 %s308_s10, 8 }
  0x18   : > { %v384_v4 = vmul.f32 %v1637_v0, %v345_v1  ;;  %v1134_v5 = vld [vmem:[%s1649_s17] sm:$0xff]   ;;  %v385_v6 = vmul.f32 %v1637_v0, %v346_v3  ;;  %v386_v10 = vmul.f32 %v1637_v0, %v347_v7  ;;  %v1197_v11 = vld [vmem:[%s1649_s17 + $0x8] sm:$0xff]   ;;  %v348_v12 = vld [vmem:[%s1644_s14 + $0x18] sm:$0xff]  ;;  %s1783_s8 = scalar_lea.vmem [#allocation2], %s1753_s7 }
  0x19   : > { %v1135_v8 = vunpack.c.l.bf16 %v1134_v5  ;;  %v1136_v9 = vunpack.c.h.bf16 %v1134_v5  ;;  %v1139_v15 = vunpack.c.l.bf16 %v1197_v11  ;;  %v387_v16 = vmul.f32 %v1637_v0, %v348_v12  ;;  %v349_v21 = vld [vmem:[%s1644_s14 + $0x20] sm:$0xff]  ;;  %v1198_v25 = vld [vmem:[%s1649_s17 + $0x10] sm:$0xff]   ;;  %v350_v26 = vld [vmem:[%s1644_s14 + $0x28] sm:$0xff]  ;;  %s982_s16 = sshll.u32 %s1783_s8, 4  ;;  %s1993_s16 = int_to_ptr.vmem [resolvable:$true] %s982_s16 }
  0x1a   : > { %v423_v13 = vadd.f32 %v1655_v2, %v384_v4  ;;  %v424_v14 = vadd.f32 %v1655_v2, %v385_v6  ;;  %v425_v19 = vadd.f32 %v1655_v2, %v386_v10  ;;  %v1140_v20 = vunpack.c.h.bf16 %v1197_v11  ;;  %v351_v30 = vld [vmem:[%s1644_s14 + $0x30] sm:$0xff]  ;;  %v1199_v34 = vld [vmem:[%s1649_s17 + $0x18] sm:$0xff]   ;;  %v353_v50 = vld [vmem:[%s1644_s14 + $0x40] sm:$0xff] }
  0x1b   : > { %v583_v17 = vsub.f32 0.0, %v1135_v8  ;;  %v584_v18 = vsub.f32 0.0, %v1136_v9  ;;  %v585_v24 = vsub.f32 0.0, %v1139_v15  ;;  %v426_v32 = vadd.f32 %v1655_v2, %v387_v16  ;;  %v352_v45 = vld [vmem:[%s1644_s14 + $0x38] sm:$0xff]  ;;  %v1200_v51 = vld [vmem:[%s1649_s17 + $0x20] sm:$0xff]   ;;  %v354_v61 = vld [vmem:[%s1644_s14 + $0x48] sm:$0xff] }
  0x1c   : > { %v455_v22 = vmax.f32 %v423_v13, 0.0  ;;  %v456_v23 = vmax.f32 %v424_v14, 0.0  ;;  %v586_v29 = vsub.f32 0.0, %v1140_v20  ;;  %v457_v31 = vmax.f32 %v425_v19, 0.0  ;;  %v1201_v7 = vld [vmem:[%s1649_s17 + $0x28] sm:$0xff]   ;;  %v355_v11 = vld [vmem:[%s1644_s14 + $0x50] sm:$0xff] }
  0x1d   : > { %v615_v27 = vmul.f32 1.442695, %v583_v17  ;;  %v617_v28 = vmul.f32 1.442695, %v584_v18  ;;  %v388_v33 = vmul.f32 %v1637_v0, %v349_v21  ;;  %v619_v35 = vmul.f32 1.442695, %v585_v24 }
  0x1e   : > { %1269 = vtanh.f32 %v455_v22  ;;  %v1143_v36 = vunpack.c.l.bf16 %v1198_v25  ;;  %v389_v37 = vmul.f32 %v1637_v0, %v350_v26  ;;  %v621_v38 = vmul.f32 1.442695, %v586_v29  ;;  %v1202_v29 = vld [vmem:[%s1649_s17 + $0x30] sm:$0xff]  }
  0x1f   : > { %1271 = vpow2.f32 %v615_v27  ;;  %v427_v39 = vadd.f32 %v1655_v2, %v388_v33  ;;  %v1144_v40 = vunpack.c.h.bf16 %v1198_v25  ;;  %v390_v41 = vmul.f32 %v1637_v0, %v351_v30  ;;  %v357_v25 = vld [vmem:[%s1644_s14 + $0x60] sm:$0xff]  ;;  %v358_v33 = vld [vmem:[%s1644_s14 + $0x68] sm:$0xff] }
  0x20   : > { %1273 = vpow2.f32 %v617_v28  ;;  %v587_v42 = vsub.f32 0.0, %v1143_v36  ;;  %v428_v43 = vadd.f32 %v1655_v2, %v389_v37  ;;  %v1147_v44 = vunpack.c.l.bf16 %v1199_v34 }
  0x21   : > { %1275 = vtanh.f32 %v456_v23  ;;  %v458_v46 = vmax.f32 %v426_v32, 0.0  ;;  %v588_v47 = vsub.f32 0.0, %v1144_v40  ;;  %v459_v52 = vmax.f32 %v427_v39, 0.0  ;;  %v356_v23 = vld [vmem:[%s1644_s14 + $0x58] sm:$0xff] }
  0x22   : > { %1277 = vpow2.f32 %v619_v35  ;;  %v623_v48 = vmul.f32 1.442695, %v587_v42  ;;  %v589_v49 = vsub.f32 0.0, %v1147_v44  ;;  %v429_v53 = vadd.f32 %v1655_v2, %v390_v41 }
  0x23   : > { %1279 = vtanh.f32 %v457_v31  ;;  %v391_v54 = vmul.f32 %v1637_v0, %v352_v45  ;;  %v460_v55 = vmax.f32 %v428_v43, 0.0  ;;  %v625_v56 = vmul.f32 1.442695, %v588_v47  ;;  %v1711_v43 = vld [vmem:[%s1649_s17 + $0x38] sm:$0xff]  }
  0x24   : > { %1281 = vpow2.f32 %v621_v38  ;;  %v1148_v57 = vunpack.c.h.bf16 %v1199_v34  ;;  %v392_v59 = vmul.f32 %v1637_v0, %v353_v50  ;;  %v1151_v60 = vunpack.c.l.bf16 %v1200_v51  ;;  %v359_v38 = vld [vmem:[%s1644_s14 + $0x70] sm:$0xff] }
  0x25   : > { %1283 = vtanh.f32 %v458_v46  ;;  %v430_v58 = vadd.f32 %v1655_v2, %v391_v54  ;;  %v627_v62 = vmul.f32 1.442695, %v589_v49  ;;  %v461_v1 = vmax.f32 %v429_v53, 0.0 }
  0x26   : > { %1285 = vpow2.f32 %v623_v48  ;;  %v590_v63 = vsub.f32 0.0, %v1148_v57  ;;  %v591_v3 = vsub.f32 0.0, %v1151_v60  ;;  %v1152_v4 = vunpack.c.h.bf16 %v1200_v51 }
  0x27   : > { %1287 = vtanh.f32 %v459_v52  ;;  %v393_v6 = vmul.f32 %v1637_v0, %v354_v61  ;;  %v462_v8 = vmax.f32 %v430_v58, 0.0  ;;  %v431_v9 = vadd.f32 %v1655_v2, %v392_v59 }
  0x28   : > { %1289 = vpow2.f32 %v625_v56  ;;  %v629_v5 = vmul.f32 1.442695, %v590_v63  ;;  %v631_v13 = vmul.f32 1.442695, %v591_v3  ;;  %v592_v14 = vsub.f32 0.0, %v1152_v4  ;;  %v360_v4 = vld [vmem:[%s1644_s14 + $0x78] sm:$0xff] }
  0x29   : > { %1291 = vtanh.f32 %v460_v55  ;;  %v1155_v15 = vunpack.c.l.bf16 %v1201_v7  ;;  %v432_v17 = vadd.f32 %v1655_v2, %v393_v6  ;;  %v463_v19 = vmax.f32 %v431_v9, 0.0 }
  0x2a   : > { %1293 = vpow2.f32 %v627_v62  ;;  %v394_v20 = vmul.f32 %v1637_v0, %v355_v11  ;;  %v1156_v24 = vunpack.c.h.bf16 %v1201_v7  ;;  %v633_v27 = vmul.f32 1.442695, %v592_v14 }
  0x2b   : > { %v1691_v10 = vpop.eup %1269  ;;  %1295 = vtanh.f32 %v461_v1  ;;  %v593_v28 = vsub.f32 0.0, %v1155_v15  ;;  %v464_v32 = vmax.f32 %v432_v17, 0.0  ;;  %v395_v36 = vmul.f32 %v1637_v0, %v356_v23  ;;  %v775_v15 = vld [vmem:[%s1736_s9] sm:$0xff] }
  0x2c   : > { %v1272_v12 = vpop.eup %1271  ;;  %1297 = vpow2.f32 %v629_v5  ;;  %v433_v35 = vadd.f32 %v1655_v2, %v394_v20  ;;  %v396_v37 = vmul.f32 %v1637_v0, %v357_v25  ;;  %v594_v41 = vsub.f32 0.0, %v1156_v24  ;;  %v1758_v24 = vld [vmem:[%s1649_s17 + $0x40] sm:$0xff]   ;;  %v362_v25 = vld [vmem:[%s1644_s14 + $0x88] sm:$0xff] }
  0x2d   : > { %v679_v16 = vadd.f32 1.0, %v1272_v12  ;;  %v1274_v18 = vpop.eup %1273  ;;  %1299 = vtanh.f32 %v462_v8  ;;  %v1159_v42 = vunpack.c.l.bf16 %v1202_v29  ;;  %v635_v45 = vmul.f32 1.442695, %v593_v28 }
  0x2e   : > { %v1696_v21 = vpop.eup %1275  ;;  %v680_v22 = vadd.f32 1.0, %v1274_v18  ;;  %v397_v46 = vmul.f32 %v1637_v0, %v358_v33  ;;  %v1160_v47 = vunpack.c.h.bf16 %v1202_v29  ;;  %v398_v50 = vmul.f32 %v1637_v0, %v359_v38 }
  0x2f   : > { %1301 = vrcp.f32 %v679_v16  ;;  %v1278_v26 = vpop.eup %1277  ;;  %v465_v52 = vmax.f32 %v433_v35, 0.0  ;;  %v1718_v53 = vadd.f32 %v1655_v2, %v395_v36  ;;  %v1163_v54 = vunpack.c.l.bf16 %v1711_v43 }
  0x30   : > { %1303 = vpow2.f32 %v631_v13  ;;  %v1701_v30 = vpop.eup %1279  ;;  %v681_v31 = vadd.f32 1.0, %v1278_v26  ;;  %v1724_v57 = vadd.f32 %v1655_v2, %v396_v37  ;;  %v595_v58 = vsub.f32 0.0, %v1159_v42  ;;  %v361_v13 = vld [vmem:[%s1644_s14 + $0x80] sm:$0xff]  ;;  %v777_v37 = vld [vmem:[%s1736_s9 + $0x10] sm:$0xff] }
  0x31   : > { %1305 = vrcp.f32 %v680_v22  ;;  %v1282_v34 = vpop.eup %1281  ;;  %v637_v60 = vmul.f32 1.442695, %v594_v41  ;;  %v1727_v61 = vadd.f32 %v1655_v2, %v397_v46  ;;  %v596_v62 = vsub.f32 0.0, %v1160_v47  ;;  %v778_v47 = vld [vmem:[%s1736_s9 + $0x18] sm:$0xff] }
  0x32   : > { %1307 = vtanh.f32 %v463_v19  ;;  %v1708_v39 = vpop.eup %1283  ;;  %v682_v40 = vadd.f32 1.0, %v1282_v34  ;;  %v1739_v3 = vadd.f32 %v1655_v2, %v398_v50  ;;  %v466_v6 = vmax.f32 %v1718_v53, 0.0 }
  0x33   : > { %1309 = vrcp.f32 %v681_v31  ;;  %v1286_v44 = vpop.eup %1285  ;;  %v597_v7 = vsub.f32 0.0, %v1163_v54  ;;  %v467_v11 = vmax.f32 %v1724_v57, 0.0  ;;  %v639_v12 = vmul.f32 1.442695, %v595_v58 }
  0x34   : > { %1311 = vpow2.f32 %v633_v27  ;;  %v1714_v48 = vpop.eup %1287  ;;  %v683_v49 = vadd.f32 1.0, %v1286_v44  ;;  %v468_v16 = vmax.f32 %v1727_v61, 0.0  ;;  %v641_v17 = vmul.f32 1.442695, %v596_v62  ;;  %v776_v27 = vld [vmem:[%s1736_s9 + $0x8] sm:$0xff] }
  0x35   : > { %1313 = vrcp.f32 %v682_v40  ;;  %v1290_v51 = vpop.eup %1289  ;;  %v399_v18 = vmul.f32 %v1637_v0, %v360_v4  ;;  %v469_v23 = vmax.f32 %v1739_v3, 0.0  ;;  %v1762_v29 = vmul.f32 1.442695, %v597_v7  ;;  %v784_v61 = vld [vmem:[%s1736_s9 + $0x48] sm:$0xff] }
  0x36   : > { %1315 = vtanh.f32 %v464_v32  ;;  %v1721_v55 = vpop.eup %1291  ;;  %v684_v56 = vadd.f32 1.0, %v1290_v51  ;;  %v1164_v31 = vunpack.c.h.bf16 %v1711_v43  ;;  %v400_v32 = vmul.f32 %v1637_v0, %v361_v13  ;;  %v780_v13 = vld [vmem:[%s1736_s9 + $0x28] sm:$0xff] }
  0x37   : > { %1317 = vrcp.f32 %v683_v49  ;;  %v1294_v59 = vpop.eup %1293  ;;  %v1771_v38 = vadd.f32 %v1655_v2, %v399_v18  ;;  %v1167_v40 = vunpack.c.l.bf16 %v1758_v24  ;;  %v401_v41 = vmul.f32 %v1637_v0, %v362_v25 }
  0x38   : > { %1319 = vpow2.f32 %v635_v45  ;;  %v1729_v63 = vpop.eup %1295  ;;  %v685_v1 = vadd.f32 1.0, %v1294_v59  ;;  %v598_v50 = vsub.f32 0.0, %v1164_v31  ;;  %v1778_v51 = vadd.f32 %v1655_v2, %v400_v32  ;;  %v779_v59 = vld [vmem:[%s1736_s9 + $0x20] sm:$0xff] }
  0x39   : > { %1321 = vrcp.f32 %v684_v56  ;;  %v1298_v5 = vpop.eup %1297  ;;  %v599_v62 = vsub.f32 0.0, %v1167_v40 }
  0x3a   : > { %1323 = vtanh.f32 %v465_v52  ;;  %v1744_v8 = vpop.eup %1299  ;;  %v686_v9 = vadd.f32 1.0, %v1298_v5  ;;  %v471_v18 = vmax.f32 %v1778_v51, 0.0 }
  0x3b   : > { %1325 = vrcp.f32 %v685_v1  ;;  %v1790_v1 = vadd.f32 %v1655_v2, %v401_v41  ;;  %v647_v31 = vmul.f32 1.442695, %v599_v62 }
  0x3c   : > { %v1302_v14 = vpop.eup %1301  ;;  %1327 = vpow2.f32 %v637_v60  ;;  %v470_v60 = vmax.f32 %v1771_v38, 0.0 }
  0x3d   : > { %v1304_v19 = vpop.eup %1303  ;;  %v807_v20 = vsub.f32 1.0, %v1302_v14  ;;  %v871_v22 = vmul.f32 %v1302_v14, %v1691_v10  ;;  %1329 = vrcp.f32 %v686_v9 }
  0x3e   : > { %v1306_v26 = vpop.eup %1305  ;;  %v687_v28 = vadd.f32 1.0, %v1304_v19  ;;  %1331 = vpow2.f32 %v639_v12 }
  0x3f   : > { %v1766_v33 = vpop.eup %1307  ;;  %v839_v34 = vmul.f32 %v807_v20, %v775_v15  ;;  %v808_v10 = vsub.f32 1.0, %v1306_v26  ;;  %v872_v35 = vmul.f32 %v1306_v26, %v1696_v21  ;;  %v645_v15 = vmul.f32 1.442695, %v598_v50  ;;  %v363_v26 = vld [vmem:[%s1644_s14 + $0x90] sm:$0xff] }
  0x40   : > { %v1310_v36 = vpop.eup %1309  ;;  %1333 = vrcp.f32 %v687_v28  ;;  %v781_v28 = vld [vmem:[%s1736_s9 + $0x30] sm:$0xff] }
  0x41   : > { %v1312_v42 = vpop.eup %1311  ;;  %v903_v43 = vadd.f32 %v871_v22, %v839_v34  ;;  %v840_v44 = vmul.f32 %v808_v10, %v776_v27  ;;  %v809_v45 = vsub.f32 1.0, %v1310_v36  ;;  %v873_v46 = vmul.f32 %v1310_v36, %v1701_v30  ;;  %v1206_v50 = vld [vmem:[%s1649_s17 + $0x50] sm:$0xff]  }
  0x42   : > { %v1314_v21 = vpop.eup %1313  ;;  %v688_v49 = vadd.f32 1.0, %v1312_v42  ;;  %1335 = vtanh.f32 %v466_v6  ;;  %v402_v42 = vmul.f32 %v1637_v0, %v363_v26 }
  0x43   : > { %v1780_v52 = vpop.eup %1315  ;;  %935 = vst [vmem:[%s1783_s8] sm:$0xff] %v903_v43  ;;  %v904_v53 = vadd.f32 %v872_v35, %v840_v44  ;;  %v841_v54 = vmul.f32 %v809_v45, %v777_v37  ;;  %v810_v56 = vsub.f32 1.0, %v1314_v21  ;;  %v874_v30 = vmul.f32 %v1314_v21, %v1708_v39  ;;  %v1795_v39 = vld [vmem:[%s1649_s17 + $0x48] sm:$0xff]  }
  0x44   : > { %v1318_v58 = vpop.eup %1317  ;;  %1337 = vrcp.f32 %v688_v49  ;;  %v1171_v32 = vunpack.c.l.bf16 %v1795_v39  ;;  %v1172_v57 = vunpack.c.h.bf16 %v1795_v39  ;;  %v441_v39 = vadd.f32 %v1655_v2, %v402_v42 }
  0x45   : > { %v1320_v4 = vpop.eup %1319  ;;  %936 = vst [vmem:[%s1783_s8 + $0x8] sm:$0xff] %v904_v53  ;;  %v905_v5 = vadd.f32 %v873_v46, %v841_v54  ;;  %v842_v6 = vmul.f32 %v810_v56, %v778_v47  ;;  %v811_v7 = vsub.f32 1.0, %v1318_v58  ;;  %v875_v9 = vmul.f32 %v1318_v58, %v1714_v48  ;;  %v364_v46 = vld [vmem:[%s1644_s14 + $0x98] sm:$0xff] }
  0x46   : > { %v1322_v12 = vpop.eup %1321  ;;  %v689_v14 = vadd.f32 1.0, %v1320_v4  ;;  %1339 = vpow2.f32 %v641_v17  ;;  %v1168_v17 = vunpack.c.h.bf16 %v1758_v24  ;;  %v472_v24 = vmax.f32 %v1790_v1, 0.0 }
  0x47   : > { %v1799_v19 = vpop.eup %1323  ;;  %937 = vst [vmem:[%s1783_s8 + $0x10] sm:$0xff] %v905_v5  ;;  %v906_v20 = vadd.f32 %v874_v30, %v842_v6  ;;  %v843_v22 = vmul.f32 %v811_v7, %v779_v59  ;;  %v812_v25 = vsub.f32 1.0, %v1322_v12  ;;  %v876_v48 = vmul.f32 %v1322_v12, %v1721_v55  ;;  %v782_v55 = vld [vmem:[%s1736_s9 + $0x38] sm:$0xff]  ;;  %v783_v30 = vld [vmem:[%s1736_s9 + $0x40] sm:$0xff] }
  0x48   : > { %v1326_v27 = vpop.eup %1325  ;;  %1341 = vrcp.f32 %v689_v14  ;;  %v600_v47 = vsub.f32 0.0, %v1168_v17  ;;  %v601_v49 = vsub.f32 0.0, %v1171_v32  ;;  %v403_v62 = vmul.f32 %v1637_v0, %v364_v46  ;;  %v1837_v14 = vld [vmem:[%s1649_s17 + $0x58] sm:$0xff]  }
  0x49   : > { %v1328_v34 = vpop.eup %1327  ;;  %938 = vst [vmem:[%s1783_s8 + $0x18] sm:$0xff] %v906_v20  ;;  %v907_v10 = vadd.f32 %v875_v9, %v843_v22  ;;  %v844_v35 = vmul.f32 %v812_v25, %v780_v13  ;;  %v813_v36 = vsub.f32 1.0, %v1326_v27  ;;  %v877_v37 = vmul.f32 %v1326_v27, %v1729_v63  ;;  %v368_v46 = vld [vmem:[%s1644_s14 + $0xb8] sm:$0xff] }
  0x4a   : > { %v1330_v40 = vpop.eup %1329  ;;  %v690_v41 = vadd.f32 1.0, %v1328_v34  ;;  %1343 = vtanh.f32 %v467_v11  ;;  %v365_v11 = vld [vmem:[%s1644_s14 + $0xa0] sm:$0xff]  ;;  %v1175_v7 = vunpack.c.l.bf16 %v1206_v50  ;;  %v649_v9 = vmul.f32 1.442695, %v600_v47 }
  0x4b   : > { %939 = vst [vmem:[%s1783_s8 + $0x20] sm:$0xff] %v907_v10  ;;  %v908_v43 = vadd.f32 %v876_v48, %v844_v35  ;;  %v845_v44 = vmul.f32 %v813_v36, %v781_v28  ;;  %v814_v45 = vsub.f32 1.0, %v1330_v40  ;;  %v878_v63 = vmul.f32 %v1330_v40, %v1744_v8  ;;  %v1332_v21 = vpop.eup %1331  ;;  %v366_v28 = vld [vmem:[%s1644_s14 + $0xa8] sm:$0xff]  ;;  %v367_v36 = vld [vmem:[%s1644_s14 + $0xb0] sm:$0xff] }
  0x4c   : > { %1345 = vrcp.f32 %v690_v41  ;;  %v691_v58 = vadd.f32 1.0, %v1332_v21  ;;  %v404_v6 = vmul.f32 %v1637_v0, %v365_v11  ;;  %v602_v12 = vsub.f32 0.0, %v1172_v57 }
  0x4d   : > { %v1334_v53 = vpop.eup %1333  ;;  %940 = vst [vmem:[%s1783_s8 + $0x28] sm:$0xff] %v908_v43  ;;  %v909_v54 = vadd.f32 %v877_v37, %v845_v44  ;;  %v846_v56 = vmul.f32 %v814_v45, %v782_v55  ;;  %1347 = vpow2.f32 %v1762_v29  ;;  %v1176_v13 = vunpack.c.h.bf16 %v1206_v50  ;;  %v1860_v43 = vld [vmem:[%s1649_s17 + $0x60] sm:$0xff]   ;;  %v786_v44 = vld [vmem:[%s1736_s9 + $0x58] sm:$0xff] }
  0x4e   : > { %v815_v8 = vsub.f32 1.0, %v1334_v53  ;;  %v879_v59 = vmul.f32 %v1334_v53, %v1766_v33  ;;  %1349 = vtanh.f32 %v468_v16  ;;  %v651_v16 = vmul.f32 1.442695, %v601_v49 }
  0x4f   : > { %v1827_v4 = vpop.eup %1335  ;;  %941 = vst [vmem:[%s1783_s8 + $0x30] sm:$0xff] %v909_v54  ;;  %v910_v5 = vadd.f32 %v878_v63, %v846_v56  ;;  %1351 = vrcp.f32 %v691_v58  ;;  %v442_v48 = vadd.f32 %v1655_v2, %v403_v62  ;;  %v1844_v3 = vadd.f32 %v1655_v2, %v404_v6 }
  0x50   : > { %v847_v29 = vmul.f32 %v815_v8, %v783_v30  ;;  %1353 = vpow2.f32 %v645_v15  ;;  %v1179_v17 = vunpack.c.l.bf16 %v1837_v14  ;;  %v473_v38 = vmax.f32 %v441_v39, 0.0  ;;  %v787_v30 = vld [vmem:[%s1736_s9 + $0x60] sm:$0xff] }
  0x51   : > { %v1338_v33 = vpop.eup %1337  ;;  %942 = vst [vmem:[%s1783_s8 + $0x38] sm:$0xff] %v910_v5  ;;  %1355 = vtanh.f32 %v469_v23  ;;  %v603_v23 = vsub.f32 0.0, %v1175_v7  ;;  %v604_v32 = vsub.f32 0.0, %v1176_v13  ;;  %v474_v40 = vmax.f32 %v442_v48, 0.0  ;;  %v369_v39 = vld [vmem:[%s1644_s14 + $0xc0] sm:$0xff] }
  0x52   : > { %v911_v20 = vadd.f32 %v879_v59, %v847_v29  ;;  %v816_v22 = vsub.f32 1.0, %v1338_v33  ;;  %v880_v15 = vmul.f32 %v1338_v33, %v1780_v52  ;;  %1357 = vpow2.f32 %v647_v31  ;;  %v785_v31 = vld [vmem:[%s1736_s9 + $0x50] sm:$0xff] }
  0x53   : > { %v1340_v25 = vpop.eup %1339  ;;  %1359 = vtanh.f32 %v470_v60  ;;  %v653_v60 = vmul.f32 1.442695, %v602_v12  ;;  %v655_v55 = vmul.f32 1.442695, %v603_v23  ;;  %v405_v41 = vmul.f32 %v1637_v0, %v366_v28 }
  0x54   : > { %943 = vst [vmem:[%s1783_s8 + $0x40] sm:$0xff] %v911_v20  ;;  %v848_v26 = vmul.f32 %v816_v22, %v784_v61  ;;  %v692_v27 = vadd.f32 1.0, %v1340_v25  ;;  %1361 = vpow2.f32 %v649_v9  ;;  %v605_v42 = vsub.f32 0.0, %v1179_v17  ;;  %v1209_v22 = vld [vmem:[%s1649_s17 + $0x68] sm:$0xff]  }
  0x55   : > { %v1342_v52 = vpop.eup %1341  ;;  %1363 = vtanh.f32 %v471_v18  ;;  %v475_v18 = vmax.f32 %v1844_v3, 0.0  ;;  %v657_v45 = vmul.f32 1.442695, %v604_v32  ;;  %v406_v63 = vmul.f32 %v1637_v0, %v367_v36 }
  0x56   : > { %v912_v34 = vadd.f32 %v880_v15, %v848_v26  ;;  %v817_v10 = vsub.f32 1.0, %v1342_v52  ;;  %v881_v35 = vmul.f32 %v1342_v52, %v1799_v19  ;;  %1365 = vrcp.f32 %v692_v27  ;;  %v788_v52 = vld [vmem:[%s1736_s9 + $0x68] sm:$0xff] }
  0x57   : > { %v1344_v37 = vpop.eup %1343  ;;  %1367 = vpow2.f32 %v651_v16  ;;  %v1180_v21 = vunpack.c.h.bf16 %v1837_v14  ;;  %v444_v50 = vadd.f32 %v1655_v2, %v405_v41  ;;  %v1183_v53 = vunpack.c.l.bf16 %v1860_v43 }
  0x58   : > { %944 = vst [vmem:[%s1783_s8 + $0x48] sm:$0xff] %v912_v34  ;;  %v849_v51 = vmul.f32 %v817_v10, %v785_v31  ;;  %1369 = vtanh.f32 %v472_v24  ;;  %v659_v58 = vmul.f32 1.442695, %v605_v42  ;;  %v407_v8 = vmul.f32 %v1637_v0, %v368_v46  ;;  %v1210_v42 = vld [vmem:[%s1649_s17 + $0x70] sm:$0xff]  }
  0x59   : > { %v1346_v19 = vpop.eup %1345  ;;  %1371 = vpow2.f32 %v653_v60  ;;  %v606_v5 = vsub.f32 0.0, %v1180_v21  ;;  %v445_v9 = vadd.f32 %v1655_v2, %v406_v63  ;;  %v476_v16 = vmax.f32 %v444_v50, 0.0  ;;  %v789_v50 = vld [vmem:[%s1736_s9 + $0x70] sm:$0xff] }
  0x5a   : > { %v1348_v47 = vpop.eup %1347  ;;  %v913_v49 = vadd.f32 %v881_v35, %v849_v51  ;;  %v818_v1 = vsub.f32 1.0, %v1346_v19  ;;  %v882_v24 = vmul.f32 %v1346_v19, %v1827_v4  ;;  %1373 = vtanh.f32 %v473_v38 }
  0x5b   : > { %v1350_v57 = vpop.eup %1349  ;;  %v693_v11 = vadd.f32 1.0, %v1348_v47  ;;  %1375 = vpow2.f32 %v655_v55  ;;  %v607_v12 = vsub.f32 0.0, %v1183_v53  ;;  %v1184_v20 = vunpack.c.h.bf16 %v1860_v43 }
  0x5c   : > { %v1352_v54 = vpop.eup %1351  ;;  %945 = vst [vmem:[%s1783_s8 + $0x50] sm:$0xff] %v913_v49  ;;  %v850_v56 = vmul.f32 %v818_v1, %v786_v44  ;;  %1377 = vtanh.f32 %v474_v40  ;;  %v661_v48 = vmul.f32 1.442695, %v606_v5  ;;  %v408_v3 = vmul.f32 %v1637_v0, %v369_v39  ;;  %v370_v40 = vld [vmem:[%s1644_s14 + $0xc8] sm:$0xff]  ;;  %v371_v44 = vld [vmem:[%s1644_s14 + $0xd0] sm:$0xff] }
  0x5d   : > { %v1354_v59 = vpop.eup %1353  ;;  %v819_v62 = vsub.f32 1.0, %v1352_v54  ;;  %v883_v4 = vmul.f32 %v1352_v54, %v1344_v37  ;;  %1379 = vrcp.f32 %v693_v11  ;;  %v477_v27 = vmax.f32 %v445_v9, 0.0 }
  0x5e   : > { %v1872_v6 = vpop.eup %1355  ;;  %v914_v7 = vadd.f32 %v882_v24, %v850_v56  ;;  %v694_v29 = vadd.f32 1.0, %v1354_v59  ;;  %1381 = vpow2.f32 %v657_v45  ;;  %v446_v28 = vadd.f32 %v1655_v2, %v407_v8 }
  0x5f   : > { %v1358_v33 = vpop.eup %1357  ;;  %v851_v61 = vmul.f32 %v819_v62, %v787_v30  ;;  %1383 = vtanh.f32 %v475_v18  ;;  %v663_v31 = vmul.f32 1.442695, %v607_v12  ;;  %v1187_v38 = vunpack.c.l.bf16 %v1209_v22 }
  0x60   : > { %v1876_v13 = vpop.eup %1359  ;;  %946 = vst [vmem:[%s1783_s8 + $0x58] sm:$0xff] %v914_v7  ;;  %1385 = vrcp.f32 %v694_v29  ;;  %v695_v14 = vadd.f32 1.0, %v1358_v33  ;;  %v608_v10 = vsub.f32 0.0, %v1184_v20  ;;  %v447_v37 = vadd.f32 %v1655_v2, %v408_v3  ;;  %v790_v29 = vld [vmem:[%s1736_s9 + $0x78] sm:$0xff] }
  0x61   : > { %v1362_v15 = vpop.eup %1361  ;;  %v915_v25 = vadd.f32 %v883_v4, %v851_v61  ;;  %1387 = vpow2.f32 %v659_v58  ;;  %v478_v51 = vmax.f32 %v446_v28, 0.0  ;;  %v1188_v18 = vunpack.c.h.bf16 %v1209_v22  ;;  %v1909_v33 = vld [vmem:[%s1649_s17 + $0x78] sm:$0xff]   ;;  %v791_v22 = vld [vmem:[%s1736_s9 + $0x80] sm:$0xff] }
  0x62   : > { %v1882_v23 = vpop.eup %1363  ;;  %1389 = vrcp.f32 %v695_v14  ;;  %v696_v26 = vadd.f32 1.0, %v1362_v15  ;;  %v609_v45 = vsub.f32 0.0, %v1187_v38  ;;  %v409_v21 = vmul.f32 %v1637_v0, %v370_v40 }
  0x63   : > { %v1366_v17 = vpop.eup %1365  ;;  %947 = vst [vmem:[%s1783_s8 + $0x60] sm:$0xff] %v915_v25  ;;  %1391 = vtanh.f32 %v476_v16  ;;  %v665_v47 = vmul.f32 1.442695, %v608_v10  ;;  %v479_v24 = vmax.f32 %v447_v37, 0.0  ;;  %v410_v53 = vmul.f32 %v1637_v0, %v371_v44 }
  0x64   : > { %v1368_v60 = vpop.eup %1367  ;;  %v820_v32 = vsub.f32 1.0, %v1366_v17  ;;  %v884_v34 = vmul.f32 %v1366_v17, %v1350_v57  ;;  %1393 = vrcp.f32 %v696_v26  ;;  %v1191_v57 = vunpack.c.l.bf16 %v1210_v42 }
  0x65   : > { %v1887_v35 = vpop.eup %1369  ;;  %v697_v36 = vadd.f32 1.0, %v1368_v60  ;;  %1395 = vpow2.f32 %v661_v48  ;;  %v610_v54 = vsub.f32 0.0, %v1188_v18  ;;  %v667_v8 = vmul.f32 1.442695, %v609_v45 }
  0x66   : > { %v1372_v55 = vpop.eup %1371  ;;  %v852_v41 = vmul.f32 %v820_v32, %v788_v52  ;;  %1397 = vtanh.f32 %v477_v27  ;;  %v1905_v4 = vadd.f32 %v1655_v2, %v409_v21  ;;  %v611_v9 = vsub.f32 0.0, %v1191_v57 }
  0x67   : > { %v1892_v43 = vpop.eup %1373  ;;  %1399 = vrcp.f32 %v697_v36  ;;  %v698_v19 = vadd.f32 1.0, %v1372_v55  ;;  %v1192_v39 = vunpack.c.h.bf16 %v1210_v42  ;;  %v1913_v12 = vadd.f32 %v1655_v2, %v410_v53  ;;  %v792_v2 = vld [vmem:[%s1736_s9 + $0x88] sm:$0xff] }
  0x68   : > { %v1376_v63 = vpop.eup %1375  ;;  %v916_v46 = vadd.f32 %v884_v34, %v852_v41  ;;  %1401 = vpow2.f32 %v663_v31  ;;  %v669_v25 = vmul.f32 1.442695, %v610_v54  ;;  %v1195_v28 = vunpack.c.l.bf16 %v1909_v33 }
  0x69   : > { %v1896_v49 = vpop.eup %1377  ;;  %1403 = vrcp.f32 %v698_v19  ;;  %v699_v1 = vadd.f32 1.0, %v1376_v63  ;;  %v480_v52 = vmax.f32 %v1905_v4, 0.0  ;;  %v671_v31 = vmul.f32 1.442695, %v611_v9  ;;  %v793_v19 = vld [vmem:[%s1736_s9 + $0x90] sm:$0xff] }
  0x6a   : > { %v1380_v11 = vpop.eup %1379  ;;  %948 = vst [vmem:[%s1783_s8 + $0x68] sm:$0xff] %v916_v46  ;;  %1405 = vtanh.f32 %v478_v51  ;;  %v612_v38 = vsub.f32 0.0, %v1192_v39  ;;  %v481_v55 = vmax.f32 %v1913_v12, 0.0  ;;  %v613_v44 = vsub.f32 0.0, %v1195_v28 }
  0x6b   : > { %v1382_v56 = vpop.eup %1381  ;;  %v821_v30 = vsub.f32 1.0, %v1380_v11  ;;  %v885_v58 = vmul.f32 %v1380_v11, %v1872_v6  ;;  %1407 = vrcp.f32 %v699_v1  ;;  %v1196_v45 = vunpack.c.h.bf16 %v1909_v33 }
  0x6c   : > { %v1902_v59 = vpop.eup %1383  ;;  %v700_v62 = vadd.f32 1.0, %v1382_v56  ;;  %1409 = vpow2.f32 %v665_v47  ;;  %v673_v11 = vmul.f32 1.442695, %v612_v38  ;;  %v376_v38 = vld [vmem:[%s1644_s14 + $0xf8] sm:$0xff] }
  0x6d   : > { %v1386_v5 = vpop.eup %1385  ;;  %v853_v7 = vmul.f32 %v821_v30, %v789_v50  ;;  %1411 = vtanh.f32 %v479_v24  ;;  %v794_v24 = vld [vmem:[%s1736_s9 + $0x98] sm:$0xff]  ;;  %v795_v30 = vld [vmem:[%s1736_s9 + $0xa0] sm:$0xff]  ;;  %v614_v4 = vsub.f32 0.0, %v1196_v45 }
  0x6e   : > { %v1388_v6 = vpop.eup %1387  ;;  %v822_v61 = vsub.f32 1.0, %v1386_v5  ;;  %v886_v16 = vmul.f32 %v1386_v5, %v1876_v13  ;;  %1413 = vrcp.f32 %v700_v62  ;;  %v372_v13 = vld [vmem:[%s1644_s14 + $0xd8] sm:$0xff]  ;;  %v675_v62 = vmul.f32 1.442695, %v613_v44 }
  0x6f   : > { %v1390_v14 = vpop.eup %1389  ;;  %v917_v20 = vadd.f32 %v885_v58, %v853_v7  ;;  %v701_v15 = vadd.f32 1.0, %v1388_v6  ;;  %1415 = vpow2.f32 %v667_v8  ;;  %v411_v41 = vmul.f32 %v1637_v0, %v372_v13  ;;  %v374_v8 = vld [vmem:[%s1644_s14 + $0xe8] sm:$0xff] }
  0x70   : > { %v1916_v48 = vpop.eup %1391  ;;  %v854_v3 = vmul.f32 %v822_v61, %v790_v29  ;;  %v823_v26 = vsub.f32 1.0, %v1390_v14  ;;  %v887_v27 = vmul.f32 %v1390_v14, %v1882_v23  ;;  %v373_v23 = vld [vmem:[%s1644_s14 + $0xe0] sm:$0xff]  ;;  %v796_v14 = vld [vmem:[%s1736_s9 + $0xa8] sm:$0xff] }
  0x71   : > { %v1394_v17 = vpop.eup %1393  ;;  %949 = vst [vmem:[%s1783_s8 + $0x70] sm:$0xff] %v917_v20  ;;  %1417 = vrcp.f32 %v701_v15  ;;  %v412_v21 = vmul.f32 %v1637_v0, %v373_v23  ;;  %v1945_v0 = vld [vmem:[%s2045_s2] ss:$0 sm:$0xff] }
  0x72   : > { %v1396_v60 = vpop.eup %1395  ;;  %v918_v32 = vadd.f32 %v886_v16, %v854_v3  ;;  %v855_v34 = vmul.f32 %v823_v26, %v791_v22  ;;  %v824_v10 = vsub.f32 1.0, %v1394_v17  ;;  %v888_v36 = vmul.f32 %v1394_v17, %v1887_v35  ;;  %v1462_v20 = vld [vmem:[%s2044_s1] ss:$0 sm:$0xff] }
  0x73   : > { %v1926_v37 = vpop.eup %1397  ;;  %v702_v40 = vadd.f32 1.0, %v1396_v60  ;;  %1419 = vpow2.f32 %v669_v25  ;;  %v450_v58 = vadd.f32 %v1945_v0, %v411_v41  ;;  %v451_v6 = vadd.f32 %v1945_v0, %v412_v21 }
  0x74   : > { %v1400_v51 = vpop.eup %1399  ;;  %950 = vst [vmem:[%s1783_s8 + $0x78] sm:$0xff] %v918_v32  ;;  %v919_v18 = vadd.f32 %v887_v27, %v855_v34  ;;  %v856_v42 = vmul.f32 %v824_v10, %v792_v2  ;;  %v413_v22 = vmul.f32 %v1462_v20, %v374_v8  ;;  %v677_v26 = vmul.f32 1.442695, %v614_v4 }
  0x75   : > { %v1402_v35 = vpop.eup %1401  ;;  %v825_v63 = vsub.f32 1.0, %v1400_v51  ;;  %v889_v46 = vmul.f32 %v1400_v51, %v1892_v43  ;;  %1421 = vrcp.f32 %v702_v40  ;;  %v482_v28 = vmax.f32 %v450_v58, 0.0  ;;  %v798_v51 = vld [vmem:[%s1736_s9 + $0xb8] sm:$0xff]  ;;  %v800_v58 = vld [vmem:[%s1736_s9 + $0xc8] sm:$0xff] }
  0x76   : > { %v1404_v47 = vpop.eup %1403  ;;  %951 = vst [vmem:[%s1783_s8 + $0x80] sm:$0xff] %v919_v18  ;;  %v920_v1 = vadd.f32 %v888_v36, %v856_v42  ;;  %v703_v57 = vadd.f32 1.0, %v1402_v35  ;;  %1423 = vpow2.f32 %v671_v31  ;;  %v483_v10 = vmax.f32 %v451_v6, 0.0 }
  0x77   : > { %v1937_v50 = vpop.eup %1405  ;;  %v857_v53 = vmul.f32 %v825_v63, %v793_v19  ;;  %v826_v54 = vsub.f32 1.0, %v1404_v47  ;;  %v890_v56 = vmul.f32 %v1404_v47, %v1896_v49  ;;  %1425 = vtanh.f32 %v480_v52  ;;  %v797_v52 = vld [vmem:[%s1736_s9 + $0xb0] sm:$0xff]  ;;  %v799_v47 = vld [vmem:[%s1736_s9 + $0xc0] sm:$0xff] }
  0x78   : > { %v1408_v43 = vpop.eup %1407  ;;  %952 = vst [vmem:[%s1783_s8 + $0x88] sm:$0xff] %v920_v1  ;;  %1427 = vrcp.f32 %v703_v57  ;;  %v452_v36 = vadd.f32 %v1945_v0, %v413_v22  ;;  %v802_v22 = vld [vmem:[%s1736_s9 + $0xd8] sm:$0xff] }
  0x79   : > { %v1410_v5 = vpop.eup %1409  ;;  %v921_v7 = vadd.f32 %v889_v46, %v857_v53  ;;  %v858_v49 = vmul.f32 %v826_v54, %v794_v24  ;;  %v827_v29 = vsub.f32 1.0, %v1408_v43  ;;  %v891_v9 = vmul.f32 %v1408_v43, %v1902_v59  ;;  %v375_v59 = vld [vmem:[%s1644_s14 + $0xf0] sm:$0xff]  ;;  %s1132_s14 = sshll.u32 %s1531_s21, 12  ;;  %s1463_s21 = scalar_lea.vmem %s1993_s16, 4096 }
  0x7a   : > { %v1412_v39 = vpop.eup %1411  ;;  %v704_v33 = vadd.f32 1.0, %v1410_v5  ;;  %1429 = vpow2.f32 %v673_v11  ;;  %v414_v31 = vmul.f32 %v1462_v20, %v375_v59  ;;  %v484_v63 = vmax.f32 %v452_v36, 0.0  ;;  %s1991_s25 = scalar_lea.hbm %s2048_s5, %s1132_s14  ;;  %p1464_p12 = scmp.ne.s32.totalorder %s1993_s16, %s1463_s21 }
  0x7b   : > { %v1414_v61 = vpop.eup %1413  ;;  %953 = vst [vmem:[%s1783_s8 + $0x90] sm:$0xff] %v921_v7  ;;  %v922_v16 = vadd.f32 %v890_v56, %v858_v49  ;;  %v859_v12 = vmul.f32 %v827_v29, %v795_v30  ;;  %1431 = vtanh.f32 %v481_v55  ;;  %v415_v55 = vmul.f32 %v1462_v20, %v376_v38 }
  0x7c   : > { %v1416_v15 = vpop.eup %1415  ;;  %v828_v25 = vsub.f32 1.0, %v1414_v61  ;;  %v892_v3 = vmul.f32 %v1414_v61, %v1916_v48  ;;  %1433 = vrcp.f32 %v704_v33  ;;  %v453_v18 = vadd.f32 %v1945_v0, %v414_v31  ;;  %p1465_p13 = pnand %p1464_p12, %p1614_p4 }
  0x7d   : > { %954 = vst [vmem:[%s1783_s8 + $0x98] sm:$0xff] %v922_v16  ;;  %v923_v27 = vadd.f32 %v891_v9, %v859_v12  ;;  %v705_v13 = vadd.f32 1.0, %v1416_v15  ;;  %1435 = vpow2.f32 %v675_v62  ;;  %v454_v1 = vadd.f32 %v1945_v0, %v415_v55  ;;  %v801_v9 = vld [vmem:[%s1736_s9 + $0xd0] sm:$0xff] }
  0x7e   : > { %v1418_v17 = vpop.eup %1417  ;;  %v860_v2 = vmul.f32 %v828_v25, %v796_v14  ;;  %v485_v54 = vmax.f32 %v453_v18, 0.0  ;;  %p1466_p0 = pneg %p1465_p13 }
  0x7f   : > { %955 = vst [vmem:[%s1783_s8 + $0xa0] sm:$0xff] %v923_v27  ;;  %v829_v60 = vsub.f32 1.0, %v1418_v17  ;;  %v893_v32 = vmul.f32 %v1418_v17, %v1926_v37  ;;  %1437 = vrcp.f32 %v705_v13  ;;  %v486_v8 = vmax.f32 %v454_v1, 0.0  ;;  %v803_v13 = vld [vmem:[%s1736_s9 + $0xe0] sm:$0xff] }
  0x80   : > { %v1420_v48 = vpop.eup %1419  ;;  %v924_v34 = vadd.f32 %v892_v3, %v860_v2  ;;  %1439 = vpow2.f32 %v677_v26 }
  0x81   : > { %v861_v23 = vmul.f32 %v829_v60, %v797_v52  ;;  %1441 = vtanh.f32 %v482_v28  ;;  %v706_v40 = vadd.f32 1.0, %v1420_v48  ;;  %v804_v60 = vld [vmem:[%s1736_s9 + $0xe8] sm:$0xff] }
  0x82   : > { %v1422_v41 = vpop.eup %1421  ;;  %956 = vst [vmem:[%s1783_s8 + $0xa8] sm:$0xff] %v924_v34 }
  0x83   : > { %v1424_v42 = vpop.eup %1423  ;;  %v925_v37 = vadd.f32 %v893_v32, %v861_v23  ;;  %v830_v19 = vsub.f32 1.0, %v1422_v41  ;;  %v894_v44 = vmul.f32 %v1422_v41, %v1937_v50  ;;  %1443 = vrcp.f32 %v706_v40  ;;  %v805_v40 = vld [vmem:[%s1736_s9 + $0xf0] sm:$0xff] }
  0x84   : > { %v1426_v45 = vpop.eup %1425  ;;  %1445 = vtanh.f32 %v483_v10  ;;  %v707_v35 = vadd.f32 1.0, %v1424_v42 }
  0x85   : > { %v1428_v46 = vpop.eup %1427  ;;  %957 = vst [vmem:[%s1783_s8 + $0xb0] sm:$0xff] %v925_v37  ;;  %v862_v21 = vmul.f32 %v830_v19, %v798_v51  ;;  %v806_v19 = vld [vmem:[%s1736_s9 + $0xf8] sm:$0xff]  ;;  %s1467_s9 = sshll.u32 %s1541_s29, 4  ;;  %s1468_s9 = int_to_ptr.vmem [resolvable:$false] %s1467_s9 }
  0x86   : > { %v831_v24 = vsub.f32 1.0, %v1428_v46  ;;  %v895_v57 = vmul.f32 %v1428_v46, %v1412_v39  ;;  %1447 = vrcp.f32 %v707_v35  ;;  %s1469_s7 = scalar_lea.vmem %s1468_s9, 8192  ;;  %p1470_p1 = scmp.lt.s32.totalorder %s1993_s16, %s1468_s9 }
  0x87   : > { %v1430_v11 = vpop.eup %1429  ;;  %v926_v53 = vadd.f32 %v894_v44, %v862_v21  ;;  %1449 = vtanh.f32 %v484_v63  ;;  %p1471_p2 = scmp.lt.s32.totalorder %s1469_s7, %s1463_s21 }
  0x88   : > { %v1432_v50 = vpop.eup %1431  ;;  %v863_v56 = vmul.f32 %v831_v24, %v799_v47  ;;  %v708_v43 = vadd.f32 1.0, %v1430_v11 }
  0x89   : > { %v1434_v30 = vpop.eup %1433  ;;  %958 = vst [vmem:[%s1783_s8 + $0xb8] sm:$0xff] %v926_v53  ;;  %p1472_p3 = por %p1471_p2, %p1470_p1 }
  0x8a   : > { %v1436_v62 = vpop.eup %1435  ;;  %v927_v4 = vadd.f32 %v895_v57, %v863_v56  ;;  %v832_v5 = vsub.f32 1.0, %v1434_v30  ;;  %v896_v0 = vmul.f32 %v1434_v30, %v1426_v45  ;;  %1451 = vrcp.f32 %v708_v43 }
  0x8b   : > { %1453 = vtanh.f32 %v485_v54  ;;  %v709_v7 = vadd.f32 1.0, %v1436_v62  ;;  %p1473_p5 = pnand %p1472_p3, %p1466_p0 }
  0x8c   : > { %v1438_v49 = vpop.eup %1437  ;;  %959 = vst [vmem:[%s1783_s8 + $0xc0] sm:$0xff] %v927_v4  ;;  %v864_v29 = vmul.f32 %v832_v5, %v800_v58 }
  0x8d   : > { %v1440_v39 = vpop.eup %1439  ;;  %v833_v33 = vsub.f32 1.0, %v1438_v49  ;;  %v897_v6 = vmul.f32 %v1438_v49, %v1432_v50  ;;  %1455 = vrcp.f32 %v709_v7 }
  0x8e   : > { %v1442_v61 = vpop.eup %1441  ;;  %v928_v16 = vadd.f32 %v896_v0, %v864_v29  ;;  %1457 = vtanh.f32 %v486_v8  ;;  %v710_v12 = vadd.f32 1.0, %v1440_v39 }
  0x8f   : > { %v865_v14 = vmul.f32 %v833_v33, %v801_v9 }
  0x90   : > { %v1444_v20 = vpop.eup %1443  ;;  %960 = vst [vmem:[%s1783_s8 + $0xc8] sm:$0xff] %v928_v16  ;;  %1459 = vrcp.f32 %v710_v12 }
  0x91   : > { %v1446_v59 = vpop.eup %1445  ;;  %v929_v15 = vadd.f32 %v897_v6, %v865_v14  ;;  %v834_v25 = vsub.f32 1.0, %v1444_v20  ;;  %v898_v3 = vmul.f32 %v1444_v20, %v1442_v61 }
  0x93   : > { %v1448_v26 = vpop.eup %1447  ;;  %961 = vst [vmem:[%s1783_s8 + $0xd0] sm:$0xff] %v929_v15  ;;  %v866_v27 = vmul.f32 %v834_v25, %v802_v22 }
  0x94   : > { %v835_v28 = vsub.f32 1.0, %v1448_v26  ;;  %v899_v17 = vmul.f32 %v1448_v26, %v1446_v59  ;;  %v1450_v2 = vpop.eup %1449 }
  0x95   : > { %v930_v52 = vadd.f32 %v898_v3, %v866_v27 }
  0x96   : > { %v867_v31 = vmul.f32 %v835_v28, %v803_v13 }
  0x97   : > { %v1452_v38 = vpop.eup %1451  ;;  %962 = vst [vmem:[%s1783_s8 + $0xd8] sm:$0xff] %v930_v52 }
  0x98   : > { %v1454_v32 = vpop.eup %1453  ;;  %v931_v48 = vadd.f32 %v899_v17, %v867_v31  ;;  %v836_v34 = vsub.f32 1.0, %v1452_v38  ;;  %v900_v10 = vmul.f32 %v1452_v38, %v1450_v2 }
  0x9a   : > { %v1456_v36 = vpop.eup %1455  ;;  %963 = vst [vmem:[%s1783_s8 + $0xe0] sm:$0xff] %v931_v48  ;;  %v868_v23 = vmul.f32 %v836_v34, %v804_v60 }
  0x9b   : > { %v1458_v55 = vpop.eup %1457  ;;  %v837_v41 = vsub.f32 1.0, %v1456_v36  ;;  %v901_v51 = vmul.f32 %v1456_v36, %v1454_v32 }
  0x9c   : > { %v932_v18 = vadd.f32 %v900_v10, %v868_v23 }
  0x9d   : > { %v1460_v42 = vpop.eup %1459  ;;  %v869_v37 = vmul.f32 %v837_v41, %v805_v40 }
  0x9e   : > { %964 = vst [vmem:[%s1783_s8 + $0xe8] sm:$0xff] %v932_v18  ;;  %v838_v44 = vsub.f32 1.0, %v1460_v42  ;;  %v902_v45 = vmul.f32 %v1460_v42, %v1458_v55 }
  0x9f   : > { %v933_v35 = vadd.f32 %v901_v51, %v869_v37 }
  0xa0   : > { %v870_v63 = vmul.f32 %v838_v44, %v806_v19 }
  0xa1   : > { %965 = vst [vmem:[%s1783_s8 + $0xf0] sm:$0xff] %v933_v35 }
  0xa2   : > { %v934_v46 = vadd.f32 %v902_v45, %v870_v63 }
  0xa4   : > { %966 = vst [vmem:[%s1783_s8 + $0xf8] sm:$0xff] %v934_v46 }
  0xa5   : > { %1476 = shalt.err (!%p1473_p5)
}
  0xa6   : > { %s1477_s10 = scalar_lea.hbm %s1991_s25, 4096  ;;  %s1481_s12 = scalar_lea.hbm %s2048_s5, 8192 }
  0xa7   : > { %p1478_p6 = scmp.ne.s32.totalorder %s1991_s25, %s1477_s10  ;;  %p1482_p10 = scmp.lt.s32.totalorder %s1991_s25, %s2048_s5 }
  0xa8   : > { %p1483_p11 = scmp.lt.s32.totalorder %s1481_s12, %s1477_s10 }
  0xa9   : > { %p1479_p7 = pnand %p1478_p6, %p1614_p4 }
  0xaa   : > { %p1484_p12 = por %p1483_p11, %p1482_p10 }
  0xab   : > { %p1480_p9 = pneg %p1479_p7 }
  0xad   : > { %p1485_p13 = pnand %p1484_p12, %p1480_p9 }
  0xaf   : > { %1488 = shalt.err (!%p1485_p13)
}
  0xb0   : > { %s1542_s14 = smov 128   ;;  %s1543_s17 = smov 8  }
  0xb1   : > { %1212 = dma.vmem_to_hbm [thread:$0]  (%p1614_p4), %s1993_s16, 4096, %s1991_s25, %s1998_s27, %s1542_s14, %s1542_s14, %s1543_s17  }
  0xb2 PF: > { %p1218_p0 = scmp.ge.s32.totalorder %s1539_s23, 2  ;;  %s997_s24 = sand.u32 1, %s1519_s18  }
  0xb3   : > { %s998_s21 = scalar_lea.sflag [#allocation3], %s997_s24 }
  0xb4   : > { %p1215_p1 = pnand %p1218_p0, %p1621_p8 }
  0xb6   : > { %p1216_p2 = pneg %p1215_p1 }
  0xb8   : > { %1514 = dma.done.wait (%p1216_p2), %s998_s21, 4096  }
  0xb9   : > { %1516 = vsyncadd (%p1216_p2), %s998_s21, 4294963200  ;;  %s18_s23 = sadd.s32 1, %s1539_s23   ;;  %s2051_s18 = smov %s1523_s19 }
  0xba   : > { %p15_p3 = scmp.ge.s32.totalorder %s18_s23, 4   ;;  %s2052_s19 = smov %s1527_s20 }
  0xbb   : > { %s2053_s20 = smov %s1627_s6  ;;  %s2054_s21 = smov %s1535_s22 }
  0xbc   : > { %s2055_s22 = smov %s2057_s26  ;;  %17 = sbr.rel (!%p15_p3) target bundleno = 4 (0x4), region = 87 }
  0xc1   :  { %1003 = vsyncpa [#allocation3], 1 }
  0xc2   :  { %1005 = vsyncpa [#allocation3 + $0x1], 1 }

</bundles_post_ra>
